<compile_context>
chip_gen: v7x
topology: tpu7x:2x2x1
jax: 0.10.0
libtpu: 0.0.40
codegen_flags: <defaults>
</compile_context>

<pallas_src>
import math

import jax
import jax.numpy as jnp
from jax.experimental import pallas as pl
from jax.experimental.pallas import tpu as pltpu

_LANE = 128           # TPU lane width; all matmul N dims are padded to this.
_NUM_CLASSES = 10


# ----------------------------- Pallas kernels ------------------------------ #

def _conv_relu_pool_kernel(p_ref, w_ref, b_ref, o_ref):
    """Fused (4*Mq, K) @ (K, 128) matmul + bias + ReLU + 2x2 max-pool.

    The im2col rows are laid out as four contiguous blocks of Mq rows, one per
    position inside the 2x2 pooling window, so pooling reduces to an
    elementwise max of the four blocks (VPU work, overlapped with the MXU).
    """
    mq = o_ref.shape[0]
    assert p_ref.shape[0] == 4 * mq
    y = jnp.dot(p_ref[...], w_ref[...], preferred_element_type=jnp.float32)
    y = jnp.maximum(y + b_ref[...], 0.0)
    o_ref[...] = jnp.maximum(
        jnp.maximum(y[0 * mq:1 * mq, :], y[1 * mq:2 * mq, :]),
        jnp.maximum(y[2 * mq:3 * mq, :], y[3 * mq:4 * mq, :]),
    )


def _fc_softmax_kernel(x_ref, w3_ref, b3_ref, w4_ref, b4_ref, w5_ref, b5_ref,
                       o_ref):
    """Fused fc3 -> fc4 -> fc5 -> softmax on a single (B, 128) VMEM tile.

    Padded lanes carry exact zeros through the (activation-free) FC chain and
    are masked to -1e30 before the softmax so they cannot leak into the
    denominator.
    """
    h = jnp.dot(x_ref[...], w3_ref[...], preferred_element_type=jnp.float32) + b3_ref[...]
    h = jnp.dot(h, w4_ref[...], preferred_element_type=jnp.float32) + b4_ref[...]
    logits = jnp.dot(h, w5_ref[...], preferred_element_type=jnp.float32) + b5_ref[...]
    lane = jax.lax.broadcasted_iota(jnp.int32, logits.shape, dimension=1)
    logits = jnp.where(lane < _NUM_CLASSES, logits, -1e30)
    m = jnp.max(logits, axis=1, keepdims=True)
    e = jnp.exp(logits - m)
    s = jnp.sum(e, axis=1, keepdims=True)
    # pl.reciprocal(approx=True) is an option when ~1e-4 relative error is OK;
    # exact reciprocal keeps the output bit-comparable with the reference.
    o_ref[...] = e * pl.reciprocal(s, approx=False)


# ----------------------------- Pallas wrappers ----------------------------- #

def _vmem_spec():
    # Whole-array block resident in VMEM (arrays here are at most ~0.8 MiB).
    return pl.BlockSpec(memory_space=pltpu.MemorySpace.VMEM)


def conv_relu_pool(rows, w, b, mq_pad):
    """rows: (4*mq_pad, K), w: (K, 128), b: (1, 128) -> pooled (mq_pad, 128)."""
    return pl.pallas_call(
        _conv_relu_pool_kernel,
        out_shape=jax.ShapeDtypeStruct((mq_pad, w.shape[1]), jnp.float32),
        in_specs=[_vmem_spec()] * 3,
        out_specs=_vmem_spec(),
    )(rows, w, b)


def fc_softmax(x, w3, b3, w4, b4, w5, b5):
    """x: (B, 512) -> softmax probabilities, lane-padded to (B, 128)."""
    return pl.pallas_call(
        _fc_softmax_kernel,
        out_shape=jax.ShapeDtypeStruct((x.shape[0], w5.shape[1]), jnp.float32),
        in_specs=[_vmem_spec()] * 7,
        out_specs=_vmem_spec(),
    )(x, w3, b3, w4, b4, w5, b5)


# ------------------------------ Layout helpers ------------------------------ #

def _round_up(n, m):
    return (n + m - 1) // m * m


def _im2col_nhwc(x, k):
    """x: (B, H, W, C) NHWC -> (B, Ho, Wo, C*k*k).

    Patch columns are ordered (c, kh, kw) to match PyTorch's
    Conv2d weight.reshape(Cout, Cin*k*k) flattening."""
    B, H, W, C = x.shape
    Ho, Wo = H - k + 1, W - k + 1
    slices = [x[:, i:i + Ho, j:j + Wo, :] for i in range(k) for j in range(k)]
    p = jnp.stack(slices, axis=-1)              # (B, Ho, Wo, C, k*k)
    return p.reshape(B, Ho, Wo, C * k * k)      # col = c*k*k + kh*k + kw


def _pool_quadrant_rows(p, k_pad):
    """p: (B, Ho, Wo, K) im2col patches, Ho/Wo even.

    Returns (rows, mq, mq_pad): rows is (4*mq_pad, k_pad), four contiguous
    blocks (one per 2x2-pool-window position), each block holding the
    (b, ph, pw) grid of output pixels in row-major order, zero-padded to an
    8-aligned row count and to k_pad columns."""
    B, Ho, Wo, K = p.shape
    mq = B * (Ho // 2) * (Wo // 2)
    mq_pad = _round_up(mq, 8)
    blocks = []
    for dh in (0, 1):
        for dw in (0, 1):
            q = p[:, dh::2, dw::2, :].reshape(mq, K)
            q = jnp.pad(q, ((0, mq_pad - mq), (0, k_pad - K)))
            blocks.append(q)
    return jnp.concatenate(blocks, axis=0), mq, mq_pad


# ------------------------------- Model glue -------------------------------- #

def init_params(key):
    """Deterministic PyTorch-default-style (kaiming-uniform-ish) init, in
    PyTorch layouts (Cout,Cin,k,k) / (out,in)."""
    def uni(k, shape, fan_in):
        bound = 1.0 / math.sqrt(fan_in)
        return jax.random.uniform(k, shape, jnp.float32, -bound, bound)

    ks = jax.random.split(key, 10)
    return {
        "conv1_w": uni(ks[0], (6, 3, 5, 5), 3 * 5 * 5),
        "conv1_b": uni(ks[1], (6,), 3 * 5 * 5),
        "conv2_w": uni(ks[2], (16, 6, 5, 5), 6 * 5 * 5),
        "conv2_b": uni(ks[3], (16,), 6 * 5 * 5),
        "fc3_w": uni(ks[4], (120, 400), 400),
        "fc3_b": uni(ks[5], (120,), 400),
        "fc4_w": uni(ks[6], (84, 120), 120),
        "fc4_b": uni(ks[7], (84,), 120),
        "fc5_w": uni(ks[8], (10, 84), 84),
        "fc5_b": uni(ks[9], (10,), 84),
    }


def pack_params(params):
    """One-time weight packing: transpose to (K, N), zero-pad K to a multiple
    of 128 and N to 128 lanes, and permute fc3's columns from NCHW-flatten to
    NHWC-flatten order so the hot path needs no transposes."""
    def pad2(a, rows, cols):
        return jnp.pad(a, ((0, rows - a.shape[0]), (0, cols - a.shape[1])))

    def pad_bias(b):
        return jnp.pad(b.reshape(1, -1), ((0, 0), (0, _LANE - b.shape[0])))

    w1 = params["conv1_w"].reshape(6, 75).T            # (75, 6), rows = (c,kh,kw)
    w2 = params["conv2_w"].reshape(16, 150).T          # (150, 16)
    # fc3 columns: (c, h, w) order -> (h, w, c) order (matches NHWC flatten).
    w3 = params["fc3_w"].reshape(120, 16, 5, 5).transpose(0, 2, 3, 1).reshape(120, 400).T
    w4 = params["fc4_w"].T
    w5 = params["fc5_w"].T

    return {
        "w1": pad2(w1, 128, _LANE), "b1": pad_bias(params["conv1_b"]),
        "w2": pad2(w2, 256, _LANE), "b2": pad_bias(params["conv2_b"]),
        "w3": pad2(w3, 512, _LANE), "b3": pad_bias(params["fc3_b"]),
        "w4": pad2(w4, 128, _LANE), "b4": pad_bias(params["fc4_b"]),
        "w5": pad2(w5, 128, _LANE), "b5": pad_bias(params["fc5_b"]),
    }


def hdr_m_forward(packed, x):
    """Forward pass matching HDR_M.forward. x: (B, 3, 32, 32) NCHW float32."""
    B = x.shape[0]

    # conv1 + ReLU + 2x2 max-pool (kernel 1)
    xn = x.transpose(0, 2, 3, 1)                                   # one-time NHWC
    rows1, mq1, mq1p = _pool_quadrant_rows(_im2col_nhwc(xn, 5), 128)
    a1 = conv_relu_pool(rows1, packed["w1"], packed["b1"], mq1p)   # (mq1p, 128)
    a1 = a1[:mq1].reshape(B, 14, 14, _LANE)[..., :6]               # (B,14,14,6)

    # conv2 + ReLU + 2x2 max-pool (kernel 2)
    rows2, mq2, mq2p = _pool_quadrant_rows(_im2col_nhwc(a1, 5), 256)
    a2 = conv_relu_pool(rows2, packed["w2"], packed["b2"], mq2p)   # (mq2p, 128)

    # Flatten in NHWC order (fc3 weights were pre-permuted to match), pad K.
    flat = a2[:mq2, :16].reshape(B, 400)
    flat = jnp.pad(flat, ((0, 0), (0, 512 - 400)))

    # fc3 + fc4 + fc5 + softmax (kernel 3)
    probs = fc_softmax(flat, packed["w3"], packed["b3"],
                       packed["w4"], packed["b4"],
                       packed["w5"], packed["b5"])                 # (B, 128)
    return probs[:, :_NUM_CLASSES]


def hdr_m_reference(params, x):
    """Pure-JAX/XLA reference of HDR_M.forward, for correctness checking."""
    dn = ("NCHW", "OIHW", "NCHW")
    y = jax.lax.conv_general_dilated(x, params["conv1_w"], (1, 1), "VALID",
                                     dimension_numbers=dn)
    y = jnp.maximum(y + params["conv1_b"][None, :, None, None], 0.0)
    y = jax.lax.reduce_window(y, -jnp.inf, jax.lax.max, (1, 1, 2, 2),
                              (1, 1, 2, 2), "VALID")
    y = jax.lax.conv_general_dilated(y, params["conv2_w"], (1, 1), "VALID",
                                     dimension_numbers=dn)
    y = jnp.maximum(y + params["conv2_b"][None, :, None, None], 0.0)
    y = jax.lax.reduce_window(y, -jnp.inf, jax.lax.max, (1, 1, 2, 2),
                              (1, 1, 2, 2), "VALID")
    f = y.reshape(y.shape[0], -1)                    # NCHW flatten == torch .view
    f = f @ params["fc3_w"].T + params["fc3_b"]
    f = f @ params["fc4_w"].T + params["fc4_b"]
    f = f @ params["fc5_w"].T + params["fc5_b"]
    return jax.nn.softmax(f, axis=1)


if __name__ == "__main__":
    key = jax.random.PRNGKey(0)
    k_param, k_x = jax.random.split(key)
    params = init_params(k_param)
    packed = pack_params(params)                     # one-time weight packing
    # Spatial size must be 32x32 so the flatten hits 5*5*16 = 400 exactly.
    x = jax.random.normal(k_x, (2, 3, 32, 32), dtype=jnp.float32)

    out = jax.block_until_ready(jax.jit(hdr_m_forward)(packed, x))
    ref = jax.block_until_ready(jax.jit(hdr_m_reference)(params, x))

    assert out.shape == (2, _NUM_CLASSES)
    assert bool(jnp.all(jnp.isfinite(out)))
    assert bool(jnp.allclose(jnp.sum(out, axis=1), 1.0, atol=1e-5))
    # Tolerance covers TPU MXU default-precision differences; a layout /
    # permutation bug would blow far past it.
    assert bool(jnp.allclose(out, ref, atol=2e-3)), float(jnp.max(jnp.abs(out - ref)))
    print("KERNEL_OK")
</pallas_src>

<mosaic_0001>
module attributes {stable_mosaic.version = 11 : i64} {
  func.func @_conv_relu_pool_kernel(%arg0: memref<1568x128xf32, #tpu.memory_space<vmem>>, %arg1: memref<128x128xf32, #tpu.memory_space<vmem>>, %arg2: memref<1x128xf32, #tpu.memory_space<vmem>>, %arg3: memref<392x128xf32, #tpu.memory_space<vmem>>) attributes {dimension_semantics = [], scalar_prefetch = 0 : i64, scratch_operands = 0 : i64, tpu.core_type = #tpu.core_type<tc>} {
    %c0 = arith.constant 0 : index
    %c0_0 = arith.constant 0 : index
    %0 = vector.load %arg0[%c0, %c0_0] : memref<1568x128xf32, #tpu.memory_space<vmem>>, vector<1568x128xf32>
    %c0_1 = arith.constant 0 : index
    %c0_2 = arith.constant 0 : index
    %1 = vector.load %arg1[%c0_1, %c0_2] : memref<128x128xf32, #tpu.memory_space<vmem>>, vector<128x128xf32>
    %cst = arith.constant dense<0.000000e+00> : vector<1568x128xf32>
    %2 = tpu.matmul %0, %1, %cst {dimension_numbers = #tpu.dot_dimension_numbers<[1], [0], [0], [1], [0, 0, 1, 1], [], []>} : vector<1568x128xf32>, vector<128x128xf32>, vector<1568x128xf32> -> vector<1568x128xf32>
    %c0_3 = arith.constant 0 : index
    %c0_4 = arith.constant 0 : index
    %3 = vector.load %arg2[%c0_3, %c0_4] : memref<1x128xf32, #tpu.memory_space<vmem>>, vector<1x128xf32>
    %4 = vector.broadcast %3 : vector<1x128xf32> to vector<1568x128xf32>
    %5 = arith.addf %2, %4 : vector<1568x128xf32>
    %cst_5 = arith.constant 0.000000e+00 : f32
    %6 = vector.broadcast %cst_5 : f32 to vector<1568x128xf32>
    %7 = arith.maximumf %5, %6 : vector<1568x128xf32>
    %8 = vector.extract_strided_slice %7 {offsets = [0, 0], sizes = [392, 128], strides = [1, 1]} : vector<1568x128xf32> to vector<392x128xf32>
    %9 = vector.extract_strided_slice %7 {offsets = [392, 0], sizes = [392, 128], strides = [1, 1]} : vector<1568x128xf32> to vector<392x128xf32>
    %10 = arith.maximumf %8, %9 : vector<392x128xf32>
    %11 = vector.extract_strided_slice %7 {offsets = [784, 0], sizes = [392, 128], strides = [1, 1]} : vector<1568x128xf32> to vector<392x128xf32>
    %12 = vector.extract_strided_slice %7 {offsets = [1176, 0], sizes = [392, 128], strides = [1, 1]} : vector<1568x128xf32> to vector<392x128xf32>
    %13 = arith.maximumf %11, %12 : vector<392x128xf32>
    %14 = arith.maximumf %10, %13 : vector<392x128xf32>
    %c0_6 = arith.constant 0 : index
    %c0_7 = arith.constant 0 : index
    %15 = vector.load %arg3[%c0_6, %c0_7] : memref<392x128xf32, #tpu.memory_space<vmem>>, vector<392x128xf32>
    tpu.vector_store %arg3[%c0_6, %c0_7], %14 {strides = array<i32>} : memref<392x128xf32, #tpu.memory_space<vmem>>, vector<392x128xf32>,
    return
  }
}

module attributes {stable_mosaic.version = 11 : i64} {
  func.func @_conv_relu_pool_kernel(%arg0: memref<224x256xf32, #tpu.memory_space<vmem>>, %arg1: memref<256x128xf32, #tpu.memory_space<vmem>>, %arg2: memref<1x128xf32, #tpu.memory_space<vmem>>, %arg3: memref<56x128xf32, #tpu.memory_space<vmem>>) attributes {dimension_semantics = [], scalar_prefetch = 0 : i64, scratch_operands = 0 : i64, tpu.core_type = #tpu.core_type<tc>} {
    %c0 = arith.constant 0 : index
    %c0_0 = arith.constant 0 : index
    %0 = vector.load %arg0[%c0, %c0_0] : memref<224x256xf32, #tpu.memory_space<vmem>>, vector<224x256xf32>
    %c0_1 = arith.constant 0 : index
    %c0_2 = arith.constant 0 : index
    %1 = vector.load %arg1[%c0_1, %c0_2] : memref<256x128xf32, #tpu.memory_space<vmem>>, vector<256x128xf32>
    %cst = arith.constant dense<0.000000e+00> : vector<224x128xf32>
    %2 = tpu.matmul %0, %1, %cst {dimension_numbers = #tpu.dot_dimension_numbers<[1], [0], [0], [1], [0, 0, 1, 1], [], []>} : vector<224x256xf32>, vector<256x128xf32>, vector<224x128xf32> -> vector<224x128xf32>
    %c0_3 = arith.constant 0 : index
    %c0_4 = arith.constant 0 : index
    %3 = vector.load %arg2[%c0_3, %c0_4] : memref<1x128xf32, #tpu.memory_space<vmem>>, vector<1x128xf32>
    %4 = vector.broadcast %3 : vector<1x128xf32> to vector<224x128xf32>
    %5 = arith.addf %2, %4 : vector<224x128xf32>
    %cst_5 = arith.constant 0.000000e+00 : f32
    %6 = vector.broadcast %cst_5 : f32 to vector<224x128xf32>
    %7 = arith.maximumf %5, %6 : vector<224x128xf32>
    %8 = vector.extract_strided_slice %7 {offsets = [0, 0], sizes = [56, 128], strides = [1, 1]} : vector<224x128xf32> to vector<56x128xf32>
    %9 = vector.extract_strided_slice %7 {offsets = [56, 0], sizes = [56, 128], strides = [1, 1]} : vector<224x128xf32> to vector<56x128xf32>
    %10 = arith.maximumf %8, %9 : vector<56x128xf32>
    %11 = vector.extract_strided_slice %7 {offsets = [112, 0], sizes = [56, 128], strides = [1, 1]} : vector<224x128xf32> to vector<56x128xf32>
    %12 = vector.extract_strided_slice %7 {offsets = [168, 0], sizes = [56, 128], strides = [1, 1]} : vector<224x128xf32> to vector<56x128xf32>
    %13 = arith.maximumf %11, %12 : vector<56x128xf32>
    %14 = arith.maximumf %10, %13 : vector<56x128xf32>
    %c0_6 = arith.constant 0 : index
    %c0_7 = arith.constant 0 : index
    %15 = vector.load %arg3[%c0_6, %c0_7] : memref<56x128xf32, #tpu.memory_space<vmem>>, vector<56x128xf32>
    tpu.vector_store %arg3[%c0_6, %c0_7], %14 {strides = array<i32>} : memref<56x128xf32, #tpu.memory_space<vmem>>, vector<56x128xf32>,
    return
  }
}

module attributes {stable_mosaic.version = 11 : i64} {
  func.func @_fc_softmax_kernel(%arg0: memref<2x512xf32, #tpu.memory_space<vmem>>, %arg1: memref<512x128xf32, #tpu.memory_space<vmem>>, %arg2: memref<1x128xf32, #tpu.memory_space<vmem>>, %arg3: memref<128x128xf32, #tpu.memory_space<vmem>>, %arg4: memref<1x128xf32, #tpu.memory_space<vmem>>, %arg5: memref<128x128xf32, #tpu.memory_space<vmem>>, %arg6: memref<1x128xf32, #tpu.memory_space<vmem>>, %arg7: memref<2x128xf32, #tpu.memory_space<vmem>>) attributes {dimension_semantics = [], scalar_prefetch = 0 : i64, scratch_operands = 0 : i64, tpu.core_type = #tpu.core_type<tc>} {
    %c0 = arith.constant 0 : index
    %c0_0 = arith.constant 0 : index
    %0 = vector.load %arg0[%c0, %c0_0] : memref<2x512xf32, #tpu.memory_space<vmem>>, vector<2x512xf32>
    %c0_1 = arith.constant 0 : index
    %c0_2 = arith.constant 0 : index
    %1 = vector.load %arg1[%c0_1, %c0_2] : memref<512x128xf32, #tpu.memory_space<vmem>>, vector<512x128xf32>
    %cst = arith.constant dense<0.000000e+00> : vector<2x128xf32>
    %2 = tpu.matmul %0, %1, %cst {dimension_numbers = #tpu.dot_dimension_numbers<[1], [0], [0], [1], [0, 0, 1, 1], [], []>} : vector<2x512xf32>, vector<512x128xf32>, vector<2x128xf32> -> vector<2x128xf32>
    %c0_3 = arith.constant 0 : index
    %c0_4 = arith.constant 0 : index
    %3 = vector.load %arg2[%c0_3, %c0_4] : memref<1x128xf32, #tpu.memory_space<vmem>>, vector<1x128xf32>
    %4 = vector.broadcast %3 : vector<1x128xf32> to vector<2x128xf32>
    %5 = arith.addf %2, %4 : vector<2x128xf32>
    %c0_5 = arith.constant 0 : index
    %c0_6 = arith.constant 0 : index
    %6 = vector.load %arg3[%c0_5, %c0_6] : memref<128x128xf32, #tpu.memory_space<vmem>>, vector<128x128xf32>
    %cst_7 = arith.constant dense<0.000000e+00> : vector<2x128xf32>
    %7 = tpu.matmul %5, %6, %cst_7 {dimension_numbers = #tpu.dot_dimension_numbers<[1], [0], [0], [1], [0, 0, 1, 1], [], []>} : vector<2x128xf32>, vector<128x128xf32>, vector<2x128xf32> -> vector<2x128xf32>
    %c0_8 = arith.constant 0 : index
    %c0_9 = arith.constant 0 : index
    %8 = vector.load %arg4[%c0_8, %c0_9] : memref<1x128xf32, #tpu.memory_space<vmem>>, vector<1x128xf32>
    %9 = vector.broadcast %8 : vector<1x128xf32> to vector<2x128xf32>
    %10 = arith.addf %7, %9 : vector<2x128xf32>
    %c0_10 = arith.constant 0 : index
    %c0_11 = arith.constant 0 : index
    %11 = vector.load %arg5[%c0_10, %c0_11] : memref<128x128xf32, #tpu.memory_space<vmem>>, vector<128x128xf32>
    %cst_12 = arith.constant dense<0.000000e+00> : vector<2x128xf32>
    %12 = tpu.matmul %10, %11, %cst_12 {dimension_numbers = #tpu.dot_dimension_numbers<[1], [0], [0], [1], [0, 0, 1, 1], [], []>} : vector<2x128xf32>, vector<128x128xf32>, vector<2x128xf32> -> vector<2x128xf32>
    %c0_13 = arith.constant 0 : index
    %c0_14 = arith.constant 0 : index
    %13 = vector.load %arg6[%c0_13, %c0_14] : memref<1x128xf32, #tpu.memory_space<vmem>>, vector<1x128xf32>
    %14 = vector.broadcast %13 : vector<1x128xf32> to vector<2x128xf32>
    %15 = arith.addf %12, %14 : vector<2x128xf32>
    %16 = tpu.iota {dimensions = array<i32: 1>} : vector<2x128xi32>
    %c10_i32 = arith.constant 10 : i32
    %17 = vector.broadcast %c10_i32 : i32 to vector<2x128xi32>
    %18 = arith.cmpi slt, %16, %17 : vector<2x128xi32>
    %cst_15 = arith.constant -1.000000e+30 : f32
    %19 = vector.broadcast %cst_15 : f32 to vector<2x128xf32>
    %20 = arith.select %18, %15, %19 : vector<2x128xi1>, vector<2x128xf32>
    %cst_16 = arith.constant dense<0xFF800000> : vector<2xf32>
    %21 = vector.multi_reduction <maximumf>, %20, %cst_16 [1] : vector<2x128xf32> to vector<2xf32>
    %22 = vector.shape_cast %21 : vector<2xf32> to vector<2x1xf32>
    %23 = vector.broadcast %22 : vector<2x1xf32> to vector<2x128xf32>
    %24 = arith.subf %20, %23 : vector<2x128xf32>
    %25 = math.exp %24 : vector<2x128xf32>
    %cst_17 = arith.constant dense<0.000000e+00> : vector<2xf32>
    %26 = vector.multi_reduction <add>, %25, %cst_17 [1] : vector<2x128xf32> to vector<2xf32>
    %27 = vector.shape_cast %26 : vector<2xf32> to vector<2x1xf32>
    %28 = tpu.reciprocal %27 : vector<2x1xf32> -> vector<2x1xf32>
    %29 = vector.broadcast %28 : vector<2x1xf32> to vector<2x128xf32>
    %30 = arith.mulf %25, %29 : vector<2x128xf32>
    %c0_18 = arith.constant 0 : index
    %c0_19 = arith.constant 0 : index
    %31 = vector.load %arg7[%c0_18, %c0_19] : memref<2x128xf32, #tpu.memory_space<vmem>>, vector<2x128xf32>
    tpu.vector_store %arg7[%c0_18, %c0_19], %30 {strides = array<i32>} : memref<2x128xf32, #tpu.memory_space<vmem>>, vector<2x128xf32>,
    return
  }
}

</mosaic_0001>

<bundles_post_ra>
// kernel: hdr_m_forward.3
= control target key start
LH: loop header
LB: loop body
LE: loop exit
PB: predicated region body
PF: predicated region fallthrough
CT: control target
= control target key end

     0   :  { %s4039_s1 = inlined_call_operand.vmem [shape: f32[128,128], index: 1, kind: input, shape index: {}]   ;;  %s4040_s0 = inlined_call_operand.vmem [shape: f32[1568,128], index: 0, kind: input, shape index: {}]   ;;  %s4041_s2 = inlined_call_operand.vmem [shape: f32[1,128], index: 2, kind: input, shape index: {}]   ;;  %s4042_s3 = inlined_call_operand.vmem [shape: f32[392,128], index: 3, kind: output, shape index: {}]  }
   0x1   :  { %v210_v0 = vld [vmem:[%s4039_s1] sm:$0xff]  ;;  %v211_v1 = vld [vmem:[%s4039_s1 + $0x8] sm:$0xff]  ;;  %v212_v2 = vld [vmem:[%s4039_s1 + $0x10] sm:$0xff] }
   0x2   :  { %v2213_v3 = vpack.c.bf16 %v211_v1, %v210_v0  ;;  %v213_v4 = vld [vmem:[%s4039_s1 + $0x18] sm:$0xff]  ;;  %v214_v6 = vld [vmem:[%s4039_s1 + $0x20] sm:$0xff]  ;;  %v215_v7 = vld [vmem:[%s4039_s1 + $0x28] sm:$0xff] }
   0x3   :  { %v2217_v5 = vpack.c.bf16 %v213_v4, %v212_v2  ;;  %v2221_v8 = vpack.c.bf16 %v215_v7, %v214_v6  ;;  %v14_v9 = vld [vmem:[%s4040_s0] sm:$0xff]  ;;  %v112_v10 = vld [vmem:[%s4040_s0 + $0x310] sm:$0xff]  ;;  %v217_v12 = vld [vmem:[%s4039_s1 + $0x38] sm:$0xff] }
   0x4   :  { %2214 = vmatprep.subr.bf16.mxu0 %v2213_v3  ;;  %2245 = vmatprep.subr.bf16.mxu1 %v2213_v3  ;;  %v216_v11 = vld [vmem:[%s4039_s1 + $0x30] sm:$0xff]  ;;  %v218_v14 = vld [vmem:[%s4039_s1 + $0x40] sm:$0xff]  ;;  %v219_v15 = vld [vmem:[%s4039_s1 + $0x48] sm:$0xff] }
   0x5   :  { %2216 = vmatpush3.bf16.msra.mxu0 %v2213_v3  ;;  %2253 = vmatpush3.bf16.msra.mxu1 %v2213_v3  ;;  %v2225_v13 = vpack.c.bf16 %v217_v12, %v216_v11  ;;  %v2229_v16 = vpack.c.bf16 %v219_v15, %v218_v14  ;;  %v220_v17 = vld [vmem:[%s4039_s1 + $0x50] sm:$0xff]  ;;  %v221_v18 = vld [vmem:[%s4039_s1 + $0x58] sm:$0xff]  ;;  %v222_v20 = vld [vmem:[%s4039_s1 + $0x60] sm:$0xff] }
   0x6   :  { %2218 = vmatprep.subr.bf16.mxu0 %v2217_v5  ;;  %2246 = vmatprep.subr.bf16.mxu1 %v2217_v5  ;;  %v2233_v19 = vpack.c.bf16 %v221_v18, %v220_v17  ;;  %v223_v21 = vld [vmem:[%s4039_s1 + $0x68] sm:$0xff]  ;;  %v224_v23 = vld [vmem:[%s4039_s1 + $0x70] sm:$0xff]  ;;  %v225_v24 = vld [vmem:[%s4039_s1 + $0x78] sm:$0xff] }
   0x7   :  { %1919 = vmatprep.mubr.f32.mxu0 %v14_v9  ;;  %2066 = vmatprep.mubr.f32.mxu1 %v112_v10  ;;  %v2237_v22 = vpack.c.bf16 %v223_v21, %v222_v20  ;;  %v2241_v25 = vpack.c.bf16 %v225_v24, %v224_v23  ;;  %v15_v26 = vld [vmem:[%s4040_s0 + $0x8] sm:$0xff]  ;;  %v113_v27 = vld [vmem:[%s4040_s0 + $0x318] sm:$0xff]  ;;  %v16_v28 = vld [vmem:[%s4040_s0 + $0x10] sm:$0xff] }
   0x8   :  { %v114_v29 = vld [vmem:[%s4040_s0 + $0x320] sm:$0xff]  ;;  %v17_v30 = vld [vmem:[%s4040_s0 + $0x18] sm:$0xff]  ;;  %v115_v31 = vld [vmem:[%s4040_s0 + $0x328] sm:$0xff] }
   0x9   :  { %2220 = vmatpush3.bf16.msra.mxu0 %v2217_v5  ;;  %2254 = vmatpush3.bf16.msra.mxu1 %v2217_v5  ;;  %v18_v32 = vld [vmem:[%s4040_s0 + $0x20] sm:$0xff]  ;;  %v116_v33 = vld [vmem:[%s4040_s0 + $0x330] sm:$0xff]  ;;  %v19_v34 = vld [vmem:[%s4040_s0 + $0x28] sm:$0xff] }
   0xa   :  { %2222 = vmatprep.subr.bf16.mxu0 %v2221_v8  ;;  %2247 = vmatprep.subr.bf16.mxu1 %v2221_v8  ;;  %v117_v35 = vld [vmem:[%s4040_s0 + $0x338] sm:$0xff]  ;;  %v20_v36 = vld [vmem:[%s4040_s0 + $0x30] sm:$0xff]  ;;  %v118_v37 = vld [vmem:[%s4040_s0 + $0x340] sm:$0xff] }
   0xb   :  { %v21_v38 = vld [vmem:[%s4040_s0 + $0x38] sm:$0xff]  ;;  %v119_v39 = vld [vmem:[%s4040_s0 + $0x348] sm:$0xff]  ;;  %v22_v40 = vld [vmem:[%s4040_s0 + $0x40] sm:$0xff] }
   0xc   :  { %v120_v41 = vld [vmem:[%s4040_s0 + $0x350] sm:$0xff]  ;;  %v23_v42 = vld [vmem:[%s4040_s0 + $0x48] sm:$0xff]  ;;  %v121_v43 = vld [vmem:[%s4040_s0 + $0x358] sm:$0xff] }
   0xd   :  { %2224 = vmatpush3.bf16.msra.mxu0 %v2221_v8  ;;  %2255 = vmatpush3.bf16.msra.mxu1 %v2221_v8  ;;  %v24_v44 = vld [vmem:[%s4040_s0 + $0x50] sm:$0xff]  ;;  %v122_v45 = vld [vmem:[%s4040_s0 + $0x360] sm:$0xff]  ;;  %v25_v46 = vld [vmem:[%s4040_s0 + $0x58] sm:$0xff] }
   0xe   :  { %2226 = vmatprep.subr.bf16.mxu0 %v2225_v13  ;;  %2248 = vmatprep.subr.bf16.mxu1 %v2225_v13  ;;  %v123_v47 = vld [vmem:[%s4040_s0 + $0x368] sm:$0xff]  ;;  %v26_v48 = vld [vmem:[%s4040_s0 + $0x60] sm:$0xff]  ;;  %v124_v49 = vld [vmem:[%s4040_s0 + $0x370] sm:$0xff] }
   0xf   :  { %v27_v50 = vld [vmem:[%s4040_s0 + $0x68] sm:$0xff]  ;;  %v125_v51 = vld [vmem:[%s4040_s0 + $0x378] sm:$0xff]  ;;  %v28_v52 = vld [vmem:[%s4040_s0 + $0x70] sm:$0xff] }
  0x10   :  { %v126_v53 = vld [vmem:[%s4040_s0 + $0x380] sm:$0xff]  ;;  %v29_v54 = vld [vmem:[%s4040_s0 + $0x78] sm:$0xff]  ;;  %v127_v55 = vld [vmem:[%s4040_s0 + $0x388] sm:$0xff] }
  0x11   :  { %2228 = vmatpush3.bf16.msra.mxu0 %v2225_v13  ;;  %2256 = vmatpush3.bf16.msra.mxu1 %v2225_v13  ;;  %v30_v56 = vld [vmem:[%s4040_s0 + $0x80] sm:$0xff]  ;;  %v128_v57 = vld [vmem:[%s4040_s0 + $0x390] sm:$0xff]  ;;  %v31_v58 = vld [vmem:[%s4040_s0 + $0x88] sm:$0xff] }
  0x12   :  { %2230 = vmatprep.subr.bf16.mxu0 %v2229_v16  ;;  %2249 = vmatprep.subr.bf16.mxu1 %v2229_v16  ;;  %v129_v59 = vld [vmem:[%s4040_s0 + $0x398] sm:$0xff]  ;;  %v32_v60 = vld [vmem:[%s4040_s0 + $0x90] sm:$0xff]  ;;  %v130_v61 = vld [vmem:[%s4040_s0 + $0x3a0] sm:$0xff] }
  0x13   :  { %v33_v62 = vld [vmem:[%s4040_s0 + $0x98] sm:$0xff]  ;;  %v131_v63 = vld [vmem:[%s4040_s0 + $0x3a8] sm:$0xff]  ;;  %v34_v0 = vld [vmem:[%s4040_s0 + $0xa0] sm:$0xff] }
  0x14   :  { %v132_v1 = vld [vmem:[%s4040_s0 + $0x3b0] sm:$0xff]  ;;  %v35_v2 = vld [vmem:[%s4040_s0 + $0xa8] sm:$0xff]  ;;  %v133_v3 = vld [vmem:[%s4040_s0 + $0x3b8] sm:$0xff] }
  0x15   :  { %2232 = vmatpush3.bf16.msra.mxu0 %v2229_v16  ;;  %2257 = vmatpush3.bf16.msra.mxu1 %v2229_v16  ;;  %v36_v4 = vld [vmem:[%s4040_s0 + $0xb0] sm:$0xff]  ;;  %v134_v5 = vld [vmem:[%s4040_s0 + $0x3c0] sm:$0xff]  ;;  %v37_v6 = vld [vmem:[%s4040_s0 + $0xb8] sm:$0xff] }
  0x16   :  { %2234 = vmatprep.subr.bf16.mxu0 %v2233_v19  ;;  %2250 = vmatprep.subr.bf16.mxu1 %v2233_v19  ;;  %v135_v7 = vld [vmem:[%s4040_s0 + $0x3c8] sm:$0xff]  ;;  %v38_v8 = vld [vmem:[%s4040_s0 + $0xc0] sm:$0xff]  ;;  %v136_v9 = vld [vmem:[%s4040_s0 + $0x3d0] sm:$0xff] }
  0x17   :  { %v39_v10 = vld [vmem:[%s4040_s0 + $0xc8] sm:$0xff]  ;;  %v137_v11 = vld [vmem:[%s4040_s0 + $0x3d8] sm:$0xff]  ;;  %v40_v12 = vld [vmem:[%s4040_s0 + $0xd0] sm:$0xff] }
  0x18   :  { %v138_v13 = vld [vmem:[%s4040_s0 + $0x3e0] sm:$0xff]  ;;  %v41_v14 = vld [vmem:[%s4040_s0 + $0xd8] sm:$0xff]  ;;  %v139_v15 = vld [vmem:[%s4040_s0 + $0x3e8] sm:$0xff] }
  0x19   :  { %2236 = vmatpush3.bf16.msra.mxu0 %v2233_v19  ;;  %2258 = vmatpush3.bf16.msra.mxu1 %v2233_v19  ;;  %v42_v16 = vld [vmem:[%s4040_s0 + $0xe0] sm:$0xff]  ;;  %v140_v17 = vld [vmem:[%s4040_s0 + $0x3f0] sm:$0xff]  ;;  %v43_v18 = vld [vmem:[%s4040_s0 + $0xe8] sm:$0xff] }
  0x1a   :  { %2238 = vmatprep.subr.bf16.mxu0 %v2237_v22  ;;  %2251 = vmatprep.subr.bf16.mxu1 %v2237_v22  ;;  %v141_v19 = vld [vmem:[%s4040_s0 + $0x3f8] sm:$0xff]  ;;  %v44_v20 = vld [vmem:[%s4040_s0 + $0xf0] sm:$0xff]  ;;  %v142_v21 = vld [vmem:[%s4040_s0 + $0x400] sm:$0xff] }
  0x1b   :  { %v143_v23 = vld [vmem:[%s4040_s0 + $0x408] sm:$0xff]  ;;  %v46_v24 = vld [vmem:[%s4040_s0 + $0x100] sm:$0xff] }
  0x1d   :  { %2240 = vmatpush3.bf16.msra.mxu0 %v2237_v22  ;;  %2259 = vmatpush3.bf16.msra.mxu1 %v2237_v22  ;;  %v45_v22 = vld [vmem:[%s4040_s0 + $0xf8] sm:$0xff] }
  0x1e   :  { %2242 = vmatprep.subr.bf16.mxu0 %v2241_v25  ;;  %2252 = vmatprep.subr.bf16.mxu1 %v2241_v25 }
  0x21   :  { %2244 = vmatpush3.bf16.msra.mxu0 %v2241_v25  ;;  %2260 = vmatpush3.bf16.msra.mxu1 %v2241_v25  ;;  %v144_v25 = vld [vmem:[%s4040_s0 + $0x410] sm:$0xff] }
  0x24   :  { %1920 = vmatmul.mubr.f32.vlgmr.msra.gmra.mrb[0].mxu0 %v15_v26  ;;  %2067 = vmatmul.mubr.f32.vlgmr.msra.gmra.mrb[0].mxu1 %v113_v27  ;;  %v47_v26 = vld [vmem:[%s4040_s0 + $0x108] sm:$0xff]  ;;  %v145_v27 = vld [vmem:[%s4040_s0 + $0x418] sm:$0xff] }
  0x25   :  { %1922 = vmatprep.mubr.f32.mxu0 %v16_v28  ;;  %2069 = vmatprep.mubr.f32.mxu1 %v114_v29  ;;  %v48_v28 = vld [vmem:[%s4040_s0 + $0x110] sm:$0xff]  ;;  %v146_v29 = vld [vmem:[%s4040_s0 + $0x420] sm:$0xff] }
  0x28   :  { %1923 = vmatmul.mubr.f32.gmra.mrb[2].mxu0 %v17_v30  ;;  %2070 = vmatmul.mubr.f32.gmra.mrb[2].mxu1 %v115_v31  ;;  %v49_v30 = vld [vmem:[%s4040_s0 + $0x118] sm:$0xff]  ;;  %v147_v31 = vld [vmem:[%s4040_s0 + $0x428] sm:$0xff] }
  0x29   :  { %1925 = vmatprep.mubr.f32.mxu0 %v18_v32  ;;  %2072 = vmatprep.mubr.f32.mxu1 %v116_v33  ;;  %v50_v32 = vld [vmem:[%s4040_s0 + $0x120] sm:$0xff]  ;;  %v148_v33 = vld [vmem:[%s4040_s0 + $0x430] sm:$0xff] }
  0x2c   :  { %1926 = vmatmul.mubr.f32.gmra.mrb[4].mxu0 %v19_v34  ;;  %2073 = vmatmul.mubr.f32.gmra.mrb[4].mxu1 %v117_v35  ;;  %v51_v34 = vld [vmem:[%s4040_s0 + $0x128] sm:$0xff]  ;;  %v149_v35 = vld [vmem:[%s4040_s0 + $0x438] sm:$0xff] }
  0x2d   :  { %1928 = vmatprep.mubr.f32.mxu0 %v20_v36  ;;  %2075 = vmatprep.mubr.f32.mxu1 %v118_v37  ;;  %v52_v36 = vld [vmem:[%s4040_s0 + $0x130] sm:$0xff]  ;;  %v150_v37 = vld [vmem:[%s4040_s0 + $0x440] sm:$0xff] }
  0x30   :  { %1929 = vmatmul.mubr.f32.gmra.mrb[6].mxu0 %v21_v38  ;;  %2076 = vmatmul.mubr.f32.gmra.mrb[6].mxu1 %v119_v39  ;;  %v53_v38 = vld [vmem:[%s4040_s0 + $0x138] sm:$0xff]  ;;  %v151_v39 = vld [vmem:[%s4040_s0 + $0x448] sm:$0xff] }
  0x31   :  { %1931 = vmatprep.mubr.f32.mxu0 %v22_v40  ;;  %2078 = vmatprep.mubr.f32.mxu1 %v120_v41  ;;  %v54_v40 = vld [vmem:[%s4040_s0 + $0x140] sm:$0xff]  ;;  %v152_v41 = vld [vmem:[%s4040_s0 + $0x450] sm:$0xff] }
  0x34   :  { %1932 = vmatmul.mubr.f32.gmra.mrb[8].mxu0 %v23_v42  ;;  %2079 = vmatmul.mubr.f32.gmra.mrb[8].mxu1 %v121_v43  ;;  %v55_v42 = vld [vmem:[%s4040_s0 + $0x148] sm:$0xff]  ;;  %v153_v43 = vld [vmem:[%s4040_s0 + $0x458] sm:$0xff] }
  0x35   :  { %1934 = vmatprep.mubr.f32.mxu0 %v24_v44  ;;  %2081 = vmatprep.mubr.f32.mxu1 %v122_v45  ;;  %v56_v44 = vld [vmem:[%s4040_s0 + $0x150] sm:$0xff]  ;;  %v154_v45 = vld [vmem:[%s4040_s0 + $0x460] sm:$0xff] }
  0x38   :  { %1935 = vmatmul.mubr.f32.gmra.mrb[10].mxu0 %v25_v46  ;;  %2082 = vmatmul.mubr.f32.gmra.mrb[10].mxu1 %v123_v47  ;;  %v57_v46 = vld [vmem:[%s4040_s0 + $0x158] sm:$0xff]  ;;  %v155_v47 = vld [vmem:[%s4040_s0 + $0x468] sm:$0xff] }
  0x39   :  { %1937 = vmatprep.mubr.f32.mxu0 %v26_v48  ;;  %2084 = vmatprep.mubr.f32.mxu1 %v124_v49  ;;  %v58_v48 = vld [vmem:[%s4040_s0 + $0x160] sm:$0xff]  ;;  %v156_v49 = vld [vmem:[%s4040_s0 + $0x470] sm:$0xff] }
  0x3c   :  { %1938 = vmatmul.mubr.f32.gmra.mrb[12].mxu0 %v27_v50  ;;  %2085 = vmatmul.mubr.f32.gmra.mrb[12].mxu1 %v125_v51  ;;  %v59_v50 = vld [vmem:[%s4040_s0 + $0x168] sm:$0xff]  ;;  %v157_v51 = vld [vmem:[%s4040_s0 + $0x478] sm:$0xff] }
  0x3d   :  { %1940 = vmatprep.mubr.f32.mxu0 %v28_v52  ;;  %2087 = vmatprep.mubr.f32.mxu1 %v126_v53  ;;  %v60_v52 = vld [vmem:[%s4040_s0 + $0x170] sm:$0xff]  ;;  %v158_v53 = vld [vmem:[%s4040_s0 + $0x480] sm:$0xff] }
  0x40   :  { %1941 = vmatmul.mubr.f32.gmra.mrb[14].mxu0 %v29_v54  ;;  %2088 = vmatmul.mubr.f32.gmra.mrb[14].mxu1 %v127_v55  ;;  %v61_v54 = vld [vmem:[%s4040_s0 + $0x178] sm:$0xff]  ;;  %v159_v55 = vld [vmem:[%s4040_s0 + $0x488] sm:$0xff] }
  0x41   :  { %1943 = vmatprep.mubr.f32.mxu0 %v30_v56  ;;  %2090 = vmatprep.mubr.f32.mxu1 %v128_v57  ;;  %v62_v56 = vld [vmem:[%s4040_s0 + $0x180] sm:$0xff]  ;;  %v160_v57 = vld [vmem:[%s4040_s0 + $0x490] sm:$0xff] }
  0x44   :  { %1944 = vmatmul.mubr.f32.gmra.mrb[16].mxu0 %v31_v58  ;;  %2091 = vmatmul.mubr.f32.gmra.mrb[16].mxu1 %v129_v59  ;;  %v63_v58 = vld [vmem:[%s4040_s0 + $0x188] sm:$0xff]  ;;  %v161_v59 = vld [vmem:[%s4040_s0 + $0x498] sm:$0xff] }
  0x45   :  { %1946 = vmatprep.mubr.f32.mxu0 %v32_v60  ;;  %2093 = vmatprep.mubr.f32.mxu1 %v130_v61  ;;  %v64_v60 = vld [vmem:[%s4040_s0 + $0x190] sm:$0xff]  ;;  %v162_v61 = vld [vmem:[%s4040_s0 + $0x4a0] sm:$0xff] }
  0x48   :  { %1947 = vmatmul.mubr.f32.gmra.mrb[18].mxu0 %v33_v62  ;;  %2094 = vmatmul.mubr.f32.gmra.mrb[18].mxu1 %v131_v63  ;;  %v65_v62 = vld [vmem:[%s4040_s0 + $0x198] sm:$0xff]  ;;  %v163_v63 = vld [vmem:[%s4040_s0 + $0x4a8] sm:$0xff] }
  0x49   :  { %1949 = vmatprep.mubr.f32.mxu0 %v34_v0  ;;  %2096 = vmatprep.mubr.f32.mxu1 %v132_v1  ;;  %v66_v0 = vld [vmem:[%s4040_s0 + $0x1a0] sm:$0xff]  ;;  %v164_v1 = vld [vmem:[%s4040_s0 + $0x4b0] sm:$0xff] }
  0x4c   :  { %1950 = vmatmul.mubr.f32.gmra.mrb[20].mxu0 %v35_v2  ;;  %2097 = vmatmul.mubr.f32.gmra.mrb[20].mxu1 %v133_v3  ;;  %v67_v2 = vld [vmem:[%s4040_s0 + $0x1a8] sm:$0xff]  ;;  %v165_v3 = vld [vmem:[%s4040_s0 + $0x4b8] sm:$0xff] }
  0x4d   :  { %1952 = vmatprep.mubr.f32.mxu0 %v36_v4  ;;  %2099 = vmatprep.mubr.f32.mxu1 %v134_v5  ;;  %v68_v4 = vld [vmem:[%s4040_s0 + $0x1b0] sm:$0xff]  ;;  %v166_v5 = vld [vmem:[%s4040_s0 + $0x4c0] sm:$0xff] }
  0x50   :  { %1953 = vmatmul.mubr.f32.gmra.mrb[22].mxu0 %v37_v6  ;;  %2100 = vmatmul.mubr.f32.gmra.mrb[22].mxu1 %v135_v7  ;;  %v69_v6 = vld [vmem:[%s4040_s0 + $0x1b8] sm:$0xff]  ;;  %v167_v7 = vld [vmem:[%s4040_s0 + $0x4c8] sm:$0xff] }
  0x51   :  { %1955 = vmatprep.mubr.f32.mxu0 %v38_v8  ;;  %2102 = vmatprep.mubr.f32.mxu1 %v136_v9  ;;  %v70_v8 = vld [vmem:[%s4040_s0 + $0x1c0] sm:$0xff]  ;;  %v168_v9 = vld [vmem:[%s4040_s0 + $0x4d0] sm:$0xff] }
  0x54   :  { %1956 = vmatmul.mubr.f32.gmra.mrb[24].mxu0 %v39_v10  ;;  %2103 = vmatmul.mubr.f32.gmra.mrb[24].mxu1 %v137_v11  ;;  %v71_v10 = vld [vmem:[%s4040_s0 + $0x1c8] sm:$0xff]  ;;  %v169_v11 = vld [vmem:[%s4040_s0 + $0x4d8] sm:$0xff] }
  0x55   :  { %1958 = vmatprep.mubr.f32.mxu0 %v40_v12  ;;  %2105 = vmatprep.mubr.f32.mxu1 %v138_v13  ;;  %v72_v12 = vld [vmem:[%s4040_s0 + $0x1d0] sm:$0xff]  ;;  %v170_v13 = vld [vmem:[%s4040_s0 + $0x4e0] sm:$0xff] }
  0x58   :  { %1959 = vmatmul.mubr.f32.gmra.mrb[26].mxu0 %v41_v14  ;;  %2106 = vmatmul.mubr.f32.gmra.mrb[26].mxu1 %v139_v15  ;;  %v73_v14 = vld [vmem:[%s4040_s0 + $0x1d8] sm:$0xff]  ;;  %v171_v15 = vld [vmem:[%s4040_s0 + $0x4e8] sm:$0xff] }
  0x59   :  { %1961 = vmatprep.mubr.f32.mxu0 %v42_v16  ;;  %2108 = vmatprep.mubr.f32.mxu1 %v140_v17  ;;  %v74_v16 = vld [vmem:[%s4040_s0 + $0x1e0] sm:$0xff]  ;;  %v172_v17 = vld [vmem:[%s4040_s0 + $0x4f0] sm:$0xff] }
  0x5c   :  { %1962 = vmatmul.mubr.f32.gmra.mrb[28].mxu0 %v43_v18  ;;  %2109 = vmatmul.mubr.f32.gmra.mrb[28].mxu1 %v141_v19  ;;  %v75_v18 = vld [vmem:[%s4040_s0 + $0x1e8] sm:$0xff]  ;;  %v173_v19 = vld [vmem:[%s4040_s0 + $0x4f8] sm:$0xff] }
  0x5d   :  { %1964 = vmatprep.mubr.f32.mxu0 %v44_v20  ;;  %2111 = vmatprep.mubr.f32.mxu1 %v142_v21  ;;  %v76_v20 = vld [vmem:[%s4040_s0 + $0x1f0] sm:$0xff]  ;;  %v174_v21 = vld [vmem:[%s4040_s0 + $0x500] sm:$0xff] }
  0x60   :  { %1965 = vmatmul.mubr.f32.gmra.mrb[30].mxu0 %v45_v22  ;;  %2112 = vmatmul.mubr.f32.gmra.mrb[30].mxu1 %v143_v23  ;;  %v77_v22 = vld [vmem:[%s4040_s0 + $0x1f8] sm:$0xff]  ;;  %v175_v23 = vld [vmem:[%s4040_s0 + $0x508] sm:$0xff] }
  0x61   :  { %1967 = vmatprep.mubr.f32.mxu0 %v46_v24  ;;  %2114 = vmatprep.mubr.f32.mxu1 %v144_v25  ;;  %v78_v24 = vld [vmem:[%s4040_s0 + $0x200] sm:$0xff]  ;;  %v176_v25 = vld [vmem:[%s4040_s0 + $0x510] sm:$0xff] }
  0x64   :  { %1968 = vmatmul.mubr.f32.gmra.mrb[32].mxu0 %v47_v26  ;;  %2115 = vmatmul.mubr.f32.gmra.mrb[32].mxu1 %v145_v27  ;;  %v79_v26 = vld [vmem:[%s4040_s0 + $0x208] sm:$0xff]  ;;  %v177_v27 = vld [vmem:[%s4040_s0 + $0x518] sm:$0xff] }
  0x65   :  { %1970 = vmatprep.mubr.f32.mxu0 %v48_v28  ;;  %2117 = vmatprep.mubr.f32.mxu1 %v146_v29  ;;  %v80_v28 = vld [vmem:[%s4040_s0 + $0x210] sm:$0xff]  ;;  %v178_v29 = vld [vmem:[%s4040_s0 + $0x520] sm:$0xff] }
  0x68   :  { %1971 = vmatmul.mubr.f32.gmra.mrb[34].mxu0 %v49_v30  ;;  %2118 = vmatmul.mubr.f32.gmra.mrb[34].mxu1 %v147_v31  ;;  %v81_v30 = vld [vmem:[%s4040_s0 + $0x218] sm:$0xff]  ;;  %v179_v31 = vld [vmem:[%s4040_s0 + $0x528] sm:$0xff] }
  0x69   :  { %1973 = vmatprep.mubr.f32.mxu0 %v50_v32  ;;  %2120 = vmatprep.mubr.f32.mxu1 %v148_v33  ;;  %v82_v32 = vld [vmem:[%s4040_s0 + $0x220] sm:$0xff]  ;;  %v180_v33 = vld [vmem:[%s4040_s0 + $0x530] sm:$0xff] }
  0x6c   :  { %1974 = vmatmul.mubr.f32.gmra.mrb[36].mxu0 %v51_v34  ;;  %2121 = vmatmul.mubr.f32.gmra.mrb[36].mxu1 %v149_v35  ;;  %v83_v34 = vld [vmem:[%s4040_s0 + $0x228] sm:$0xff]  ;;  %v181_v35 = vld [vmem:[%s4040_s0 + $0x538] sm:$0xff] }
  0x6d   :  { %1976 = vmatprep.mubr.f32.mxu0 %v52_v36  ;;  %2123 = vmatprep.mubr.f32.mxu1 %v150_v37  ;;  %v84_v36 = vld [vmem:[%s4040_s0 + $0x230] sm:$0xff]  ;;  %v182_v37 = vld [vmem:[%s4040_s0 + $0x540] sm:$0xff] }
  0x70   :  { %1977 = vmatmul.mubr.f32.gmra.mrb[38].mxu0 %v53_v38  ;;  %2124 = vmatmul.mubr.f32.gmra.mrb[38].mxu1 %v151_v39  ;;  %v85_v38 = vld [vmem:[%s4040_s0 + $0x238] sm:$0xff]  ;;  %v183_v39 = vld [vmem:[%s4040_s0 + $0x548] sm:$0xff] }
  0x71   :  { %1979 = vmatprep.mubr.f32.mxu0 %v54_v40  ;;  %2126 = vmatprep.mubr.f32.mxu1 %v152_v41  ;;  %v86_v40 = vld [vmem:[%s4040_s0 + $0x240] sm:$0xff]  ;;  %v184_v41 = vld [vmem:[%s4040_s0 + $0x550] sm:$0xff] }
  0x74   :  { %1980 = vmatmul.mubr.f32.gmra.mrb[40].mxu0 %v55_v42  ;;  %2127 = vmatmul.mubr.f32.gmra.mrb[40].mxu1 %v153_v43  ;;  %v87_v42 = vld [vmem:[%s4040_s0 + $0x248] sm:$0xff]  ;;  %v185_v43 = vld [vmem:[%s4040_s0 + $0x558] sm:$0xff] }
  0x75   :  { %1982 = vmatprep.mubr.f32.mxu0 %v56_v44  ;;  %2129 = vmatprep.mubr.f32.mxu1 %v154_v45  ;;  %v88_v44 = vld [vmem:[%s4040_s0 + $0x250] sm:$0xff]  ;;  %v186_v45 = vld [vmem:[%s4040_s0 + $0x560] sm:$0xff] }
  0x78   :  { %1983 = vmatmul.mubr.f32.gmra.mrb[42].mxu0 %v57_v46  ;;  %2130 = vmatmul.mubr.f32.gmra.mrb[42].mxu1 %v155_v47  ;;  %v89_v46 = vld [vmem:[%s4040_s0 + $0x258] sm:$0xff]  ;;  %v187_v47 = vld [vmem:[%s4040_s0 + $0x568] sm:$0xff] }
  0x79   :  { %1985 = vmatprep.mubr.f32.mxu0 %v58_v48  ;;  %2132 = vmatprep.mubr.f32.mxu1 %v156_v49  ;;  %v90_v48 = vld [vmem:[%s4040_s0 + $0x260] sm:$0xff]  ;;  %v188_v49 = vld [vmem:[%s4040_s0 + $0x570] sm:$0xff] }
  0x7c   :  { %1986 = vmatmul.mubr.f32.gmra.mrb[44].mxu0 %v59_v50  ;;  %2133 = vmatmul.mubr.f32.gmra.mrb[44].mxu1 %v157_v51  ;;  %v91_v50 = vld [vmem:[%s4040_s0 + $0x268] sm:$0xff]  ;;  %v189_v51 = vld [vmem:[%s4040_s0 + $0x578] sm:$0xff] }
  0x7d   :  { %1988 = vmatprep.mubr.f32.mxu0 %v60_v52  ;;  %2135 = vmatprep.mubr.f32.mxu1 %v158_v53  ;;  %v92_v52 = vld [vmem:[%s4040_s0 + $0x270] sm:$0xff]  ;;  %v190_v53 = vld [vmem:[%s4040_s0 + $0x580] sm:$0xff] }
  0x80   :  { %1989 = vmatmul.mubr.f32.gmra.mrb[46].mxu0 %v61_v54  ;;  %2136 = vmatmul.mubr.f32.gmra.mrb[46].mxu1 %v159_v55  ;;  %v93_v54 = vld [vmem:[%s4040_s0 + $0x278] sm:$0xff]  ;;  %v191_v55 = vld [vmem:[%s4040_s0 + $0x588] sm:$0xff] }
  0x81   :  { %1991 = vmatprep.mubr.f32.mxu0 %v62_v56  ;;  %2138 = vmatprep.mubr.f32.mxu1 %v160_v57  ;;  %v94_v56 = vld [vmem:[%s4040_s0 + $0x280] sm:$0xff]  ;;  %v192_v57 = vld [vmem:[%s4040_s0 + $0x590] sm:$0xff] }
  0x84   :  { %1992 = vmatmul.mubr.f32.gmra.mrb[48].mxu0 %v63_v58  ;;  %2139 = vmatmul.mubr.f32.gmra.mrb[48].mxu1 %v161_v59  ;;  %v95_v58 = vld [vmem:[%s4040_s0 + $0x288] sm:$0xff]  ;;  %v193_v59 = vld [vmem:[%s4040_s0 + $0x598] sm:$0xff] }
  0x85   :  { %1994 = vmatprep.mubr.f32.mxu0 %v64_v60  ;;  %2141 = vmatprep.mubr.f32.mxu1 %v162_v61  ;;  %v96_v60 = vld [vmem:[%s4040_s0 + $0x290] sm:$0xff]  ;;  %v194_v61 = vld [vmem:[%s4040_s0 + $0x5a0] sm:$0xff] }
  0x88   :  { %1995 = vmatmul.mubr.f32.gmra.mrb[50].mxu0 %v65_v62  ;;  %2142 = vmatmul.mubr.f32.gmra.mrb[50].mxu1 %v163_v63  ;;  %v97_v62 = vld [vmem:[%s4040_s0 + $0x298] sm:$0xff]  ;;  %v195_v63 = vld [vmem:[%s4040_s0 + $0x5a8] sm:$0xff] }
  0x89   :  { %1997 = vmatprep.mubr.f32.mxu0 %v66_v0  ;;  %2144 = vmatprep.mubr.f32.mxu1 %v164_v1  ;;  %v98_v0 = vld [vmem:[%s4040_s0 + $0x2a0] sm:$0xff]  ;;  %v196_v1 = vld [vmem:[%s4040_s0 + $0x5b0] sm:$0xff] }
  0x8c   :  { %1998 = vmatmul.mubr.f32.gmra.mrb[52].mxu0 %v67_v2  ;;  %2145 = vmatmul.mubr.f32.gmra.mrb[52].mxu1 %v165_v3  ;;  %v99_v2 = vld [vmem:[%s4040_s0 + $0x2a8] sm:$0xff]  ;;  %v197_v3 = vld [vmem:[%s4040_s0 + $0x5b8] sm:$0xff] }
  0x8d   :  { %2000 = vmatprep.mubr.f32.mxu0 %v68_v4  ;;  %2147 = vmatprep.mubr.f32.mxu1 %v166_v5  ;;  %v100_v4 = vld [vmem:[%s4040_s0 + $0x2b0] sm:$0xff]  ;;  %v198_v5 = vld [vmem:[%s4040_s0 + $0x5c0] sm:$0xff] }
  0x90   :  { %2001 = vmatmul.mubr.f32.gmra.mrb[54].mxu0 %v69_v6  ;;  %2148 = vmatmul.mubr.f32.gmra.mrb[54].mxu1 %v167_v7  ;;  %v101_v6 = vld [vmem:[%s4040_s0 + $0x2b8] sm:$0xff]  ;;  %v199_v7 = vld [vmem:[%s4040_s0 + $0x5c8] sm:$0xff] }
  0x91   :  { %2003 = vmatprep.mubr.f32.mxu0 %v70_v8  ;;  %2150 = vmatprep.mubr.f32.mxu1 %v168_v9  ;;  %v102_v8 = vld [vmem:[%s4040_s0 + $0x2c0] sm:$0xff]  ;;  %v200_v9 = vld [vmem:[%s4040_s0 + $0x5d0] sm:$0xff] }
  0x94   :  { %2004 = vmatmul.mubr.f32.gmra.mrb[56].mxu0 %v71_v10  ;;  %2151 = vmatmul.mubr.f32.gmra.mrb[56].mxu1 %v169_v11  ;;  %v103_v10 = vld [vmem:[%s4040_s0 + $0x2c8] sm:$0xff]  ;;  %v201_v11 = vld [vmem:[%s4040_s0 + $0x5d8] sm:$0xff] }
  0x95   :  { %2006 = vmatprep.mubr.f32.mxu0 %v72_v12  ;;  %2153 = vmatprep.mubr.f32.mxu1 %v170_v13  ;;  %v104_v12 = vld [vmem:[%s4040_s0 + $0x2d0] sm:$0xff]  ;;  %v202_v13 = vld [vmem:[%s4040_s0 + $0x5e0] sm:$0xff] }
  0x98   :  { %2007 = vmatmul.mubr.f32.gmra.mrb[58].mxu0 %v73_v14  ;;  %2154 = vmatmul.mubr.f32.gmra.mrb[58].mxu1 %v171_v15  ;;  %v105_v14 = vld [vmem:[%s4040_s0 + $0x2d8] sm:$0xff]  ;;  %v203_v15 = vld [vmem:[%s4040_s0 + $0x5e8] sm:$0xff] }
  0x99   :  { %2009 = vmatprep.mubr.f32.mxu0 %v74_v16  ;;  %2156 = vmatprep.mubr.f32.mxu1 %v172_v17  ;;  %v106_v16 = vld [vmem:[%s4040_s0 + $0x2e0] sm:$0xff]  ;;  %v204_v17 = vld [vmem:[%s4040_s0 + $0x5f0] sm:$0xff] }
  0x9c   :  { %2010 = vmatmul.mubr.f32.gmra.mrb[60].mxu0 %v75_v18  ;;  %2157 = vmatmul.mubr.f32.gmra.mrb[60].mxu1 %v173_v19  ;;  %v107_v18 = vld [vmem:[%s4040_s0 + $0x2e8] sm:$0xff]  ;;  %v205_v19 = vld [vmem:[%s4040_s0 + $0x5f8] sm:$0xff] }
  0x9d   :  { %2012 = vmatprep.mubr.f32.mxu0 %v76_v20  ;;  %2159 = vmatprep.mubr.f32.mxu1 %v174_v21  ;;  %v108_v20 = vld [vmem:[%s4040_s0 + $0x2f0] sm:$0xff]  ;;  %v206_v21 = vld [vmem:[%s4040_s0 + $0x600] sm:$0xff] }
  0xa0   :  { %2013 = vmatmul.mubr.f32.gmra.mrb[62].mxu0 %v77_v22  ;;  %2160 = vmatmul.mubr.f32.gmra.mrb[62].mxu1 %v175_v23  ;;  %v109_v22 = vld [vmem:[%s4040_s0 + $0x2f8] sm:$0xff]  ;;  %v207_v23 = vld [vmem:[%s4040_s0 + $0x608] sm:$0xff] }
  0xa1   :  { %2015 = vmatprep.mubr.f32.mxu0 %v78_v24  ;;  %2162 = vmatprep.mubr.f32.mxu1 %v176_v25  ;;  %v110_v24 = vld [vmem:[%s4040_s0 + $0x300] sm:$0xff]  ;;  %v208_v25 = vld [vmem:[%s4040_s0 + $0x610] sm:$0xff] }
  0xa4   :  { %2016 = vmatmul.mubr.f32.gmra.mrb[64].mxu0 %v79_v26  ;;  %2163 = vmatmul.mubr.f32.gmra.mrb[64].mxu1 %v177_v27  ;;  %v111_v26 = vld [vmem:[%s4040_s0 + $0x308] sm:$0xff]  ;;  %v209_v27 = vld [vmem:[%s4040_s0 + $0x618] sm:$0xff] }
  0xa5   :  { %2018 = vmatprep.mubr.f32.mxu0 %v80_v28  ;;  %2165 = vmatprep.mubr.f32.mxu1 %v178_v29 }
  0xa8   :  { %2019 = vmatmul.mubr.f32.gmra.mrb[66].mxu0 %v81_v30  ;;  %2166 = vmatmul.mubr.f32.gmra.mrb[66].mxu1 %v179_v31 }
  0xa9   :  { %2021 = vmatprep.mubr.f32.mxu0 %v82_v32  ;;  %2168 = vmatprep.mubr.f32.mxu1 %v180_v33 }
  0xac   :  { %2022 = vmatmul.mubr.f32.gmra.mrb[68].mxu0 %v83_v34  ;;  %2169 = vmatmul.mubr.f32.gmra.mrb[68].mxu1 %v181_v35 }
  0xad   :  { %2024 = vmatprep.mubr.f32.mxu0 %v84_v36  ;;  %2171 = vmatprep.mubr.f32.mxu1 %v182_v37 }
  0xb0   :  { %2025 = vmatmul.mubr.f32.gmra.mrb[70].mxu0 %v85_v38  ;;  %2172 = vmatmul.mubr.f32.gmra.mrb[70].mxu1 %v183_v39 }
  0xb1   :  { %2027 = vmatprep.mubr.f32.mxu0 %v86_v40  ;;  %2174 = vmatprep.mubr.f32.mxu1 %v184_v41 }
  0xb4   :  { %2028 = vmatmul.mubr.f32.gmra.mrb[72].mxu0 %v87_v42  ;;  %2175 = vmatmul.mubr.f32.gmra.mrb[72].mxu1 %v185_v43 }
  0xb5   :  { %2030 = vmatprep.mubr.f32.mxu0 %v88_v44  ;;  %2177 = vmatprep.mubr.f32.mxu1 %v186_v45 }
  0xb8   :  { %2031 = vmatmul.mubr.f32.gmra.mrb[74].mxu0 %v89_v46  ;;  %2178 = vmatmul.mubr.f32.gmra.mrb[74].mxu1 %v187_v47 }
  0xb9   :  { %2033 = vmatprep.mubr.f32.mxu0 %v90_v48  ;;  %2180 = vmatprep.mubr.f32.mxu1 %v188_v49 }
  0xbc   :  { %2034 = vmatmul.mubr.f32.gmra.mrb[76].mxu0 %v91_v50  ;;  %2181 = vmatmul.mubr.f32.gmra.mrb[76].mxu1 %v189_v51 }
  0xbd   :  { %2036 = vmatprep.mubr.f32.mxu0 %v92_v52  ;;  %2183 = vmatprep.mubr.f32.mxu1 %v190_v53 }
  0xc0   :  { %2037 = vmatmul.mubr.f32.gmra.mrb[78].mxu0 %v93_v54  ;;  %2184 = vmatmul.mubr.f32.gmra.mrb[78].mxu1 %v191_v55 }
  0xc1   :  { %2039 = vmatprep.mubr.f32.mxu0 %v94_v56  ;;  %2186 = vmatprep.mubr.f32.mxu1 %v192_v57 }
  0xc4   :  { %2040 = vmatmul.mubr.f32.gmra.mrb[80].mxu0 %v95_v58  ;;  %2187 = vmatmul.mubr.f32.gmra.mrb[80].mxu1 %v193_v59 }
  0xc5   :  { %2042 = vmatprep.mubr.f32.mxu0 %v96_v60  ;;  %2189 = vmatprep.mubr.f32.mxu1 %v194_v61 }
  0xc8   :  { %2043 = vmatmul.mubr.f32.gmra.mrb[82].mxu0 %v97_v62  ;;  %2190 = vmatmul.mubr.f32.gmra.mrb[82].mxu1 %v195_v63 }
  0xc9   :  { %2045 = vmatprep.mubr.f32.mxu0 %v98_v0  ;;  %2192 = vmatprep.mubr.f32.mxu1 %v196_v1 }
  0xcc   :  { %2046 = vmatmul.mubr.f32.gmra.mrb[84].mxu0 %v99_v2  ;;  %2193 = vmatmul.mubr.f32.gmra.mrb[84].mxu1 %v197_v3 }
  0xcd   :  { %2048 = vmatprep.mubr.f32.mxu0 %v100_v4  ;;  %2195 = vmatprep.mubr.f32.mxu1 %v198_v5 }
  0xd0   :  { %2049 = vmatmul.mubr.f32.gmra.mrb[86].mxu0 %v101_v6  ;;  %2196 = vmatmul.mubr.f32.gmra.mrb[86].mxu1 %v199_v7 }
  0xd1   :  { %2051 = vmatprep.mubr.f32.mxu0 %v102_v8  ;;  %2198 = vmatprep.mubr.f32.mxu1 %v200_v9 }
  0xd4   :  { %2052 = vmatmul.mubr.f32.gmra.mrb[88].mxu0 %v103_v10  ;;  %2199 = vmatmul.mubr.f32.gmra.mrb[88].mxu1 %v201_v11 }
  0xd5   :  { %2054 = vmatprep.mubr.f32.mxu0 %v104_v12  ;;  %2201 = vmatprep.mubr.f32.mxu1 %v202_v13 }
  0xd8   :  { %2055 = vmatmul.mubr.f32.gmra.mrb[90].mxu0 %v105_v14  ;;  %2202 = vmatmul.mubr.f32.gmra.mrb[90].mxu1 %v203_v15 }
  0xd9   :  { %2057 = vmatprep.mubr.f32.mxu0 %v106_v16  ;;  %2204 = vmatprep.mubr.f32.mxu1 %v204_v17 }
  0xdc   :  { %2058 = vmatmul.mubr.f32.gmra.mrb[92].mxu0 %v107_v18  ;;  %2205 = vmatmul.mubr.f32.gmra.mrb[92].mxu1 %v205_v19 }
  0xdd   :  { %2060 = vmatprep.mubr.f32.mxu0 %v108_v20  ;;  %2207 = vmatprep.mubr.f32.mxu1 %v206_v21 }
  0xe0   :  { %2061 = vmatmul.mubr.f32.gmra.mrb[94].mxu0 %v109_v22  ;;  %2208 = vmatmul.mubr.f32.gmra.mrb[94].mxu1 %v207_v23 }
  0xe1   :  { %2063 = vmatprep.mubr.f32.mxu0 %v110_v24  ;;  %2210 = vmatprep.mubr.f32.mxu1 %v208_v25  ;;  %v3041_v24 = vld [vmem:[%s4041_s2] ss:$0 sm:$0xff] }
  0xe4   :  { %2064 = vmatmul.mubr.f32.gmra.mrb[96].mxu0 %v111_v26  ;;  %2211 = vmatmul.mubr.f32.gmra.mrb[96].mxu1 %v209_v27 }
  0xf7   :  { %v2918_v28 = vpop.f32.mrb[0].mxu0  ;;  %v2920_v29 = vpop.f32.mrb[0].mxu1 }
  0xf8   :  { %v2922_v30 = vpop.f32.mrb[1].mxu0  ;;  %v2924_v31 = vpop.f32.mrb[1].mxu1 }
  0xfb   :  { %v2926_v32 = vpop.f32.mrb[2].mxu0  ;;  %v2928_v33 = vpop.f32.mrb[2].mxu1 }
  0xfc   :  { %v2930_v34 = vpop.f32.mrb[3].mxu0  ;;  %v2932_v35 = vpop.f32.mrb[3].mxu1 }
  0xff   :  { %v2934_v36 = vpop.f32.mrb[4].mxu0  ;;  %v2936_v37 = vpop.f32.mrb[4].mxu1 }
 0x100   :  { %v2938_v38 = vpop.f32.mrb[5].mxu0  ;;  %v2940_v39 = vpop.f32.mrb[5].mxu1 }
 0x103   :  { %v2942_v40 = vpop.f32.mrb[6].mxu0  ;;  %v2944_v41 = vpop.f32.mrb[6].mxu1 }
 0x104   :  { %v2946_v42 = vpop.f32.mrb[7].mxu0  ;;  %v2948_v43 = vpop.f32.mrb[7].mxu1 }
 0x107   :  { %v2950_v44 = vpop.f32.mrb[8].mxu0  ;;  %v2952_v45 = vpop.f32.mrb[8].mxu1 }
 0x108   :  { %v2954_v46 = vpop.f32.mrb[9].mxu0  ;;  %v2956_v47 = vpop.f32.mrb[9].mxu1 }
 0x10b   :  { %v2958_v48 = vpop.f32.mrb[10].mxu0  ;;  %v2960_v49 = vpop.f32.mrb[10].mxu1 }
 0x10c   :  { %v2962_v50 = vpop.f32.mrb[11].mxu0  ;;  %v2964_v51 = vpop.f32.mrb[11].mxu1 }
 0x10f   :  { %v2966_v52 = vpop.f32.mrb[12].mxu0  ;;  %v2968_v53 = vpop.f32.mrb[12].mxu1 }
 0x110   :  { %v2970_v54 = vpop.f32.mrb[13].mxu0  ;;  %v2972_v55 = vpop.f32.mrb[13].mxu1 }
 0x113   :  { %v2974_v56 = vpop.f32.mrb[14].mxu0  ;;  %v2976_v57 = vpop.f32.mrb[14].mxu1 }
 0x114   :  { %v2978_v58 = vpop.f32.mrb[15].mxu0  ;;  %v2980_v59 = vpop.f32.mrb[15].mxu1 }
 0x117   :  { %v2982_v60 = vpop.f32.mrb[16].mxu0  ;;  %v2984_v61 = vpop.f32.mrb[16].mxu1 }
 0x118   :  { %v2986_v62 = vpop.f32.mrb[17].mxu0  ;;  %v2988_v63 = vpop.f32.mrb[17].mxu1 }
 0x11b   :  { %v2990_v0 = vpop.f32.mrb[18].mxu0  ;;  %v2992_v1 = vpop.f32.mrb[18].mxu1 }
 0x11c   :  { %v2994_v2 = vpop.f32.mrb[19].mxu0  ;;  %v2996_v3 = vpop.f32.mrb[19].mxu1 }
 0x11f   :  { %v2998_v4 = vpop.f32.mrb[20].mxu0  ;;  %v3000_v5 = vpop.f32.mrb[20].mxu1 }
 0x120   :  { %v3002_v6 = vpop.f32.mrb[21].mxu0  ;;  %v3004_v7 = vpop.f32.mrb[21].mxu1 }
 0x123   :  { %v3006_v8 = vpop.f32.mrb[22].mxu0  ;;  %v3008_v9 = vpop.f32.mrb[22].mxu1 }
 0x124   :  { %v3010_v10 = vpop.f32.mrb[23].mxu0  ;;  %v3012_v11 = vpop.f32.mrb[23].mxu1 }
 0x127   :  { %v3014_v12 = vpop.f32.mrb[24].mxu0  ;;  %v3016_v13 = vpop.f32.mrb[24].mxu1 }
 0x128   :  { %v3018_v14 = vpop.f32.mrb[25].mxu0  ;;  %v3020_v15 = vpop.f32.mrb[25].mxu1 }
 0x12b   :  { %v3022_v16 = vpop.f32.mrb[26].mxu0  ;;  %v3024_v17 = vpop.f32.mrb[26].mxu1 }
 0x12c   :  { %v3026_v18 = vpop.f32.mrb[27].mxu0  ;;  %v3028_v19 = vpop.f32.mrb[27].mxu1 }
 0x12d   :  { %4082 = vst [vmem:[#allocation2_spill] sm:$0xff] %v3026_v18  ;;  %4083 = vst [vmem:[#allocation3_spill] sm:$0xff] %v3028_v19 }
 0x12f   :  { %v3030_v20 = vpop.f32.mrb[28].mxu0  ;;  %v3032_v21 = vpop.f32.mrb[28].mxu1 }
 0x130   :  { %4084 = vst [vmem:[#allocation4_spill] sm:$0xff] %v3030_v20  ;;  %4085 = vst [vmem:[#allocation5_spill] sm:$0xff] %v3032_v21  ;;  %v3034_v22 = vpop.f32.mrb[29].mxu0  ;;  %v3036_v23 = vpop.f32.mrb[29].mxu1  ;;  %v3053_v21 = vadd.f32 %v2918_v28, %v3041_v24  ;;  %v3073_v28 = vadd.f32 %v2928_v33, %v3041_v24 }
 0x131   :  { %4086 = vst [vmem:[#allocation6_spill] sm:$0xff] %v3034_v22  ;;  %4087 = vst [vmem:[#allocation7_spill] sm:$0xff] %v3036_v23  ;;  %v3057_v23 = vadd.f32 %v2920_v29, %v3041_v24  ;;  %v3061_v22 = vadd.f32 %v3041_v24, %v2922_v30  ;;  %v3077_v29 = vadd.f32 %v3041_v24, %v2930_v34 }
 0x132   :  { %4093 = vst [vmem:[#allocation13_spill] sm:$0xff] %v3073_v28  ;;  %v3130_v34 = vadd.f32 %v3041_v24, %v2946_v42  ;;  %v3151_v42 = vadd.f32 %v3041_v24, %v2954_v46  ;;  %v3167_v46 = vadd.f32 %v2960_v49, %v3041_v24  ;;  %v3181_v28 = vadd.f32 %v3041_v24, %v2964_v51 }
 0x133   :  { %v3043_v25 = vpop.f32.mrb[30].mxu0  ;;  %v3045_v26 = vpop.f32.mrb[30].mxu1  ;;  %v3185_v49 = vadd.f32 %v2966_v52, %v3041_v24  ;;  %v3202_v52 = vadd.f32 %v3041_v24, %v2970_v54  ;;  %v3216_v51 = vadd.f32 %v2976_v57, %v3041_v24 }
 0x134   :  { %4088 = vst [vmem:[#allocation8_spill] sm:$0xff] %v3043_v25  ;;  %4089 = vst [vmem:[#allocation9_spill] sm:$0xff] %v3045_v26  ;;  %v3047_v27 = vpop.f32.mrb[31].mxu0  ;;  %v3049_v19 = vpop.f32.mrb[31].mxu1  ;;  %v3065_v25 = vadd.f32 %v3041_v24, %v2924_v31  ;;  %v3085_v31 = vadd.f32 %v3041_v24, %v2932_v35  ;;  %v3120_v35 = vadd.f32 %v2944_v41, %v3041_v24 }
 0x135   :  { %4090 = vst [vmem:[#allocation10_spill] sm:$0xff] %v3047_v27  ;;  %4091 = vst [vmem:[#allocation11_spill] sm:$0xff] %v3049_v19  ;;  %v3069_v27 = vadd.f32 %v2926_v32, %v3041_v24  ;;  %v3089_v32 = vadd.f32 %v2934_v36, %v3041_v24  ;;  %v3106_v36 = vadd.f32 %v3041_v24, %v2938_v38 }
 0x136   :  { %4100 = vst [vmem:[#allocation20_spill] sm:$0xff] %v3120_v35  ;;  %4101 = vst [vmem:[#allocation21_spill] sm:$0xff] %v3130_v34  ;;  %v3206_v34 = vadd.f32 %v3041_v24, %v2972_v55  ;;  %v3243_v55 = vadd.f32 %v2984_v61, %v3041_v24 }
 0x137   :  { %4092 = vst [vmem:[#allocation12_spill] sm:$0xff] %v3069_v27  ;;  %v3079_v19 = vpop.f32.mrb[32].mxu0  ;;  %v3081_v30 = vpop.f32.mrb[32].mxu1  ;;  %4096 = vst [vmem:[#allocation16_spill] sm:$0xff] %v3089_v32  ;;  %v3143_v27 = vadd.f32 %v2950_v44, %v3041_v24  ;;  %v3157_v32 = vadd.f32 %v3041_v24, %v2956_v47  ;;  %v3161_v44 = vadd.f32 %v2958_v48, %v3041_v24 }
 0x138   :  { %4094 = vst [vmem:[#allocation14_spill] sm:$0xff] %v3079_v19  ;;  %4095 = vst [vmem:[#allocation15_spill] sm:$0xff] %v3081_v30  ;;  %v3091_v26 = vpop.f32.mrb[33].mxu0  ;;  %v3093_v33 = vpop.f32.mrb[33].mxu1  ;;  %v3100_v30 = vadd.f32 %v2936_v37, %v3041_v24  ;;  %v3116_v37 = vadd.f32 %v2942_v40, %v3041_v24  ;;  %v3134_v40 = vadd.f32 %v3041_v24, %v2948_v43 }
 0x139   :  { %4097 = vst [vmem:[#allocation17_spill] sm:$0xff] %v3093_v33  ;;  %v3110_v33 = vadd.f32 %v3041_v24, %v2940_v39  ;;  %v3147_v39 = vadd.f32 %v2952_v45, %v3041_v24  ;;  %4103 = vst [vmem:[#allocation23_spill] sm:$0xff] %v3161_v44  ;;  %v3171_v43 = vadd.f32 %v3041_v24, %v2962_v50 }
 0x13a   :  { %4098 = vst [vmem:[#allocation18_spill] sm:$0xff] %v3100_v30  ;;  %4099 = vst [vmem:[#allocation19_spill] sm:$0xff] %v3116_v37  ;;  %v3196_v48 = vadd.f32 %v2968_v53, %v3041_v24  ;;  %v3212_v53 = vadd.f32 %v2974_v56, %v3041_v24  ;;  %v3226_v37 = vadd.f32 %v3041_v24, %v2978_v58 }
 0x13b   :  { %v3122_v18 = vpop.f32.mrb[34].mxu0  ;;  %v3124_v38 = vpop.f32.mrb[34].mxu1  ;;  %4102 = vst [vmem:[#allocation22_spill] sm:$0xff] %v3134_v40  ;;  %4104 = vst [vmem:[#allocation24_spill] sm:$0xff] %v3167_v46  ;;  %v3230_v56 = vadd.f32 %v3041_v24, %v2980_v59  ;;  %v3239_v44 = vadd.f32 %v2982_v60, %v3041_v24  ;;  %v3247_v58 = vadd.f32 %v3041_v24, %v2986_v62 }
 0x13c   :  { %v3136_v20 = vpop.f32.mrb[35].mxu0  ;;  %v3138_v41 = vpop.f32.mrb[35].mxu1  ;;  %4105 = vst [vmem:[#allocation25_spill] sm:$0xff] %v3185_v49  ;;  %4106 = vst [vmem:[#allocation26_spill] sm:$0xff] %v3196_v48  ;;  %v3253_v49 = vadd.f32 %v3041_v24, %v2988_v63  ;;  %v3257_v60 = vadd.f32 %v2990_v0, %v3041_v24  ;;  %v3263_v62 = vadd.f32 %v2992_v1, %v3041_v24 }
 0x13d   :  { %4107 = vst [vmem:[#allocation27_spill] sm:$0xff] %v3212_v53  ;;  %4108 = vst [vmem:[#allocation28_spill] sm:$0xff] %v3216_v51  ;;  %v3267_v59 = vadd.f32 %v3041_v24, %v2994_v2  ;;  %v3277_v46 = vadd.f32 %v3041_v24, %v2996_v3  ;;  %v3281_v1 = vadd.f32 %v2998_v4, %v3041_v24 }
 0x13e   :  { %4109 = vst [vmem:[#allocation29_spill] sm:$0xff] %v3230_v56  ;;  %v3292_v0 = vadd.f32 %v3000_v5, %v3041_v24  ;;  %v3298_v4 = vadd.f32 %v3041_v24, %v3002_v6  ;;  %v3308_v5 = vadd.f32 %v3006_v8, %v3041_v24  ;;  %v3312_v3 = vadd.f32 %v3008_v9, %v3041_v24 }
 0x13f   :  { %v3173_v19 = vpop.f32.mrb[36].mxu0  ;;  %v3175_v47 = vpop.f32.mrb[36].mxu1  ;;  %4110 = vst [vmem:[#allocation30_spill] sm:$0xff] %v3281_v1  ;;  %v3322_v53 = vadd.f32 %v3041_v24, %v3010_v10  ;;  %v3326_v8 = vadd.f32 %v3041_v24, %v3012_v11  ;;  %v3343_v10 = vadd.f32 %v3041_v24, %v3018_v14  ;;  %v3359_v14 = vadd.f32 %v3024_v17, %v3041_v24  ;;  %v4129_v1 = vld [vmem:[#allocation3_spill] sm:$0xff] }
 0x140   :  { %v3187_v45 = vpop.f32.mrb[37].mxu0  ;;  %v3189_v50 = vpop.f32.mrb[37].mxu1  ;;  %4112 = vst [vmem:[#allocation32_spill] sm:$0xff] %v3292_v0  ;;  %4113 = vst [vmem:[#allocation33_spill] sm:$0xff] %v3308_v5  ;;  %v4140_v0 = vld [vmem:[#allocation8_spill] sm:$0xff] }
 0x141   :  { %4114 = vst [vmem:[#allocation34_spill] sm:$0xff] %v3312_v3  ;;  %4117 = vst [vmem:[#allocation37_spill] sm:$0xff] %v3322_v53 }
 0x142   :  { %4118 = vst [vmem:[#allocation38_spill] sm:$0xff] %v3326_v8  ;;  %4124 = vst [vmem:[#allocation44_spill] sm:$0xff] %v3359_v14 }
 0x143   :  { %v3218_v40 = vpop.f32.mrb[38].mxu0  ;;  %v3220_v54 = vpop.f32.mrb[38].mxu1 }
 0x144   :  { %v3232_v35 = vpop.f32.mrb[39].mxu0  ;;  %v3234_v57 = vpop.f32.mrb[39].mxu1 }
 0x147   :  { %v3269_v30 = vpop.f32.mrb[40].mxu0  ;;  %v3271_v63 = vpop.f32.mrb[40].mxu1 }
 0x148   :  { %v3283_v61 = vpop.f32.mrb[41].mxu0  ;;  %v3285_v2 = vpop.f32.mrb[41].mxu1 }
 0x149   :  { %4111 = vst [vmem:[#allocation31_spill] sm:$0xff] %v3285_v2  ;;  %v3302_v2 = vadd.f32 %v3041_v24, %v3004_v7  ;;  %v3339_v7 = vadd.f32 %v3016_v13, %v3041_v24  ;;  %v4130_v13 = vld [vmem:[#allocation4_spill] sm:$0xff] }
 0x14a   :  { %v3377_v17 = vadd.f32 %v4130_v13, %v3041_v24  ;;  %v4136_v13 = vld [vmem:[#allocation6_spill] sm:$0xff] }
 0x14b   :  { %v3314_v56 = vpop.f32.mrb[42].mxu0  ;;  %v3316_v6 = vpop.f32.mrb[42].mxu1  ;;  %4122 = vst [vmem:[#allocation42_spill] sm:$0xff] %v3339_v7  ;;  %v3394_v53 = vadd.f32 %v3041_v24, %v4136_v13 }
 0x14c   :  { %4115 = vst [vmem:[#allocation35_spill] sm:$0xff] %v3314_v56  ;;  %4116 = vst [vmem:[#allocation36_spill] sm:$0xff] %v3316_v6  ;;  %v3328_v51 = vpop.f32.mrb[43].mxu0  ;;  %v3330_v9 = vpop.f32.mrb[43].mxu1  ;;  %v3335_v6 = vadd.f32 %v3014_v12, %v3041_v24  ;;  %v3353_v12 = vadd.f32 %v3022_v16, %v3041_v24  ;;  %v3373_v56 = vadd.f32 %v3041_v24, %v4129_v1  ;;  %v4134_v16 = vld [vmem:[#allocation5_spill] sm:$0xff] }
 0x14d   :  { %4119 = vst [vmem:[#allocation39_spill] sm:$0xff] %v3328_v51  ;;  %4120 = vst [vmem:[#allocation40_spill] sm:$0xff] %v3330_v9  ;;  %v3349_v9 = vadd.f32 %v3041_v24, %v3020_v15  ;;  %v4125_v51 = vld [vmem:[#allocation2_spill] sm:$0xff]  ;;  %v3388_v5 = vadd.f32 %v4134_v16, %v3041_v24  ;;  %v3404_v16 = vadd.f32 %v4140_v0, %v3041_v24  ;;  %v4142_v1 = vld [vmem:[#allocation9_spill] sm:$0xff] }
 0x14e   :  { %4121 = vst [vmem:[#allocation41_spill] sm:$0xff] %v3335_v6  ;;  %4123 = vst [vmem:[#allocation43_spill] sm:$0xff] %v3353_v12  ;;  %v3363_v11 = vadd.f32 %v3041_v24, %v4125_v51  ;;  %v3408_v7 = vadd.f32 %v4142_v1, %v3041_v24  ;;  %v4146_v6 = vld [vmem:[#allocation10_spill] sm:$0xff] }
 0x14f   :  { %v3365_v48 = vpop.f32.mrb[44].mxu0  ;;  %v3367_v15 = vpop.f32.mrb[44].mxu1  ;;  %4131 = vst [vmem:[#allocation3_spill] sm:$0xff] %v3377_v17  ;;  %4135 = vst [vmem:[#allocation5_spill] sm:$0xff] %v3388_v5  ;;  %v4154_v17 = vld [vmem:[#allocation17_spill] sm:$0xff] }
 0x150   :  { %4126 = vst [vmem:[#allocation2_spill] sm:$0xff] %v3363_v11  ;;  %4127 = vst [vmem:[#allocation45_spill] sm:$0xff] %v3365_v48  ;;  %v3379_v3 = vpop.f32.mrb[45].mxu0  ;;  %v3381_v51 = vpop.f32.mrb[45].mxu1  ;;  %v4147_v48 = vld [vmem:[#allocation11_spill] sm:$0xff] }
 0x151   :  { %4128 = vst [vmem:[#allocation46_spill] sm:$0xff] %v3367_v15  ;;  %4132 = vst [vmem:[#allocation4_spill] sm:$0xff] %v3379_v3  ;;  %v4138_v3 = vld [vmem:[#allocation7_spill] sm:$0xff]  ;;  %v3418_v15 = vadd.f32 %v3041_v24, %v4146_v6  ;;  %v3422_v0 = vadd.f32 %v3041_v24, %v4147_v48  ;;  %v3439_v6 = vadd.f32 %v3041_v24, %v3091_v26 }
 0x152   :  { %4133 = vst [vmem:[#allocation47_spill] sm:$0xff] %v3381_v51  ;;  %4137 = vst [vmem:[#allocation6_spill] sm:$0xff] %v3394_v53  ;;  %v3398_v51 = vadd.f32 %v3041_v24, %v4138_v3  ;;  %v4152_v3 = vld [vmem:[#allocation15_spill] sm:$0xff]  ;;  %v3455_v26 = vadd.f32 %v3124_v38, %v3041_v24  ;;  %v3459_v48 = vadd.f32 %v3041_v24, %v3136_v20 }
 0x153   :  { %4141 = vst [vmem:[#allocation8_spill] sm:$0xff] %v3404_v16  ;;  %4143 = vst [vmem:[#allocation9_spill] sm:$0xff] %v3408_v7  ;;  %v3410_v8 = vpop.f32.mrb[46].mxu0  ;;  %v3412_v13 = vpop.f32.mrb[46].mxu1  ;;  %v3435_v12 = vadd.f32 %v4152_v3, %v3041_v24  ;;  %v3474_v53 = vadd.f32 %v3041_v24, %v3138_v41  ;;  %v3482_v38 = vadd.f32 %v3173_v19, %v3041_v24 }
 0x154   :  { %4139 = vst [vmem:[#allocation7_spill] sm:$0xff] %v3398_v51  ;;  %4144 = vst [vmem:[#allocation48_spill] sm:$0xff] %v3410_v8  ;;  %v3424_v14 = vpop.f32.mrb[47].mxu0  ;;  %v3426_v1 = vpop.f32.mrb[47].mxu1  ;;  %v3486_v7 = vadd.f32 %v3175_v47, %v3041_v24  ;;  %v4162_v51 = vmax.f32 %v3061_v22, 0.0  ;;  %v3497_v47 = vadd.f32 %v3041_v24, %v3187_v45 }
 0x155   :  { %4145 = vst [vmem:[#allocation49_spill] sm:$0xff] %v3412_v13  ;;  %4148 = vst [vmem:[#allocation10_spill] sm:$0xff] %v3424_v14  ;;  %v4150_v13 = vld [vmem:[#allocation14_spill] sm:$0xff] }
 0x156   :  { %4149 = vst [vmem:[#allocation11_spill] sm:$0xff] %v3426_v1  ;;  %v3431_v11 = vadd.f32 %v4150_v13, %v3041_v24  ;;  %4153 = vst [vmem:[#allocation15_spill] sm:$0xff] %v3435_v12  ;;  %v3445_v1 = vadd.f32 %v3041_v24, %v4154_v17  ;;  %v3449_v13 = vadd.f32 %v3122_v18, %v3041_v24 }
 0x157   :  { %4156 = vst [vmem:[#allocation50_spill] sm:$0xff] %v3455_v26  ;;  %v1993_v14 = vpop.f32.mrb[48].mxu0  ;;  %v2140_v5 = vpop.f32.mrb[48].mxu1  ;;  %4159 = vst [vmem:[#allocation53_spill] sm:$0xff] %v3474_v53 }
 0x158   :  { %4151 = vst [vmem:[#allocation14_spill] sm:$0xff] %v3431_v11  ;;  %4155 = vst [vmem:[#allocation17_spill] sm:$0xff] %v3449_v13  ;;  %v545_v18 = vadd.f32 %v1993_v14, %v3041_v24  ;;  %v1035_v8 = vadd.f32 %v2140_v5, %v3041_v24  ;;  %v3465_v16 = vpop.f32.mrb[49].mxu0  ;;  %v3467_v3 = vpop.f32.mrb[49].mxu1 }
 0x159   :  { %4157 = vst [vmem:[#allocation51_spill] sm:$0xff] %v3465_v16  ;;  %4158 = vst [vmem:[#allocation52_spill] sm:$0xff] %v3467_v3 }
 0x15a   :  { %v1327_v17 = vmax.f32 %v545_v18, 0.0  ;;  %v1425_v5 = vmax.f32 %v1035_v8, 0.0  ;;  %4160 = vst [vmem:[#allocation54_spill] sm:$0xff] %v3482_v38  ;;  %4161 = vst [vmem:[#allocation55_spill] sm:$0xff] %v3486_v7  ;;  %v4163_v18 = vmax.f32 %v3065_v25, 0.0  ;;  %v3503_v25 = vadd.f32 %v3041_v24, %v3189_v50 }
 0x15b   :  { %v1996_v41 = vpop.f32.mrb[50].mxu0  ;;  %v2143_v20 = vpop.f32.mrb[50].mxu1  ;;  %v4165_v50 = vmax.f32 %v3085_v31, 0.0 }
 0x15c   :  { %v1474_v12 = vmax.f32 %v4162_v51, %v1327_v17  ;;  %v1523_v8 = vmax.f32 %v4163_v18, %v1425_v5  ;;  %v555_v16 = vadd.f32 %v1996_v41, %v3041_v24  ;;  %v1045_v14 = vadd.f32 %v2143_v20, %v3041_v24  ;;  %v549_v3 = vpop.f32.mrb[51].mxu0  ;;  %v1039_v26 = vpop.f32.mrb[51].mxu1 }
 0x15d   :  { %v550_v13 = vadd.f32 %v3041_v24, %v549_v3  ;;  %v1040_v22 = vadd.f32 %v3041_v24, %v1039_v26  ;;  %v4164_v3 = vmax.f32 %v3077_v29, 0.0  ;;  %v4167_v20 = vmax.f32 %v3057_v23, 0.0 }
 0x15e   :  { %v1572_v51 = vmax.f32 %v1474_v12, %v1523_v8  ;;  %v1329_v17 = vmax.f32 %v555_v16, 0.0  ;;  %v1427_v5 = vmax.f32 %v1045_v14, 0.0  ;;  %v4168_v23 = vmax.f32 %v3106_v36, 0.0 }
 0x15f   :  { %v1328_v18 = vmax.f32 %v550_v13, 0.0  ;;  %v1426_v19 = vmax.f32 %v1040_v22, 0.0  ;;  %v1999_v11 = vpop.f32.mrb[52].mxu0  ;;  %v2146_v45 = vpop.f32.mrb[52].mxu1  ;;  %v4166_v13 = vmax.f32 %v3053_v21, 0.0 }
 0x160   :  { %1621 = vst [vmem:[%s4042_s3] sm:$0xff] %v1572_v51  ;;  %v1476_v26 = vmax.f32 %v4164_v3, %v1329_v17  ;;  %v1525_v12 = vmax.f32 %v4165_v50, %v1427_v5  ;;  %v565_v16 = vadd.f32 %v1999_v11, %v3041_v24  ;;  %v1055_v14 = vadd.f32 %v2146_v45, %v3041_v24  ;;  %v559_v8 = vpop.f32.mrb[53].mxu0  ;;  %v1049_v41 = vpop.f32.mrb[53].mxu1 }
 0x161   :  { %v1475_v22 = vmax.f32 %v4166_v13, %v1328_v18  ;;  %v1524_v7 = vmax.f32 %v4167_v20, %v1426_v19  ;;  %v560_v51 = vadd.f32 %v3041_v24, %v559_v8  ;;  %v1050_v29 = vadd.f32 %v3041_v24, %v1049_v41  ;;  %v4172_v13 = vld [vmem:[#allocation13_spill] sm:$0xff] }
 0x162   :  { %v1314_v17 = vmax.f32 %v3497_v47, 0.0  ;;  %v1574_v31 = vmax.f32 %v1476_v26, %v1525_v12  ;;  %v1331_v5 = vmax.f32 %v565_v16, 0.0  ;;  %v1429_v3 = vmax.f32 %v1055_v14, 0.0  ;;  %v4170_v16 = vld [vmem:[#allocation12_spill] sm:$0xff] }
 0x163   :  { %v1412_v11 = vmax.f32 %v3503_v25, 0.0  ;;  %v1573_v45 = vmax.f32 %v1475_v22, %v1524_v7  ;;  %v1330_v50 = vmax.f32 %v560_v51, 0.0  ;;  %v1428_v38 = vmax.f32 %v1050_v29, 0.0  ;;  %v2002_v53 = vpop.f32.mrb[54].mxu0  ;;  %v2149_v21 = vpop.f32.mrb[54].mxu1 }
 0x164   :  { %1623 = vst [vmem:[%s4042_s3 + $0x10] sm:$0xff] %v1574_v31  ;;  %v1478_v19 = vmax.f32 %v4168_v23, %v1331_v5  ;;  %v4169_v20 = vmax.f32 %v3110_v33, 0.0  ;;  %v575_v18 = vadd.f32 %v2002_v53, %v3041_v24  ;;  %v1065_v26 = vadd.f32 %v2149_v21, %v3041_v24  ;;  %v569_v12 = vpop.f32.mrb[55].mxu0  ;;  %v1059_v7 = vpop.f32.mrb[55].mxu1 }
 0x165   :  { %1622 = vst [vmem:[%s4042_s3 + $0x8] sm:$0xff] %v1573_v45  ;;  %v4171_v14 = vmax.f32 %v4170_v16, 0.0  ;;  %v4173_v22 = vmax.f32 %v4172_v13, 0.0  ;;  %v570_v51 = vadd.f32 %v3041_v24, %v569_v12  ;;  %v1060_v33 = vadd.f32 %v3041_v24, %v1059_v7  ;;  %v4176_v7 = vld [vmem:[#allocation22_spill] sm:$0xff] }
 0x166   :  { %v1527_v41 = vmax.f32 %v4169_v20, %v1429_v3  ;;  %v3544_v53 = vadd.f32 %v3218_v40, %v3041_v24  ;;  %v1333_v31 = vmax.f32 %v575_v18, 0.0  ;;  %v1431_v5 = vmax.f32 %v1065_v26, 0.0  ;;  %v4174_v20 = vld [vmem:[#allocation21_spill] sm:$0xff] }
 0x167   :  { %v1477_v8 = vmax.f32 %v4171_v14, %v1330_v50  ;;  %v1526_v36 = vmax.f32 %v4173_v22, %v1428_v38  ;;  %v3548_v3 = vadd.f32 %v3220_v54, %v3041_v24  ;;  %v1332_v50 = vmax.f32 %v570_v51, 0.0  ;;  %v2005_v23 = vpop.f32.mrb[56].mxu0  ;;  %v2152_v38 = vpop.f32.mrb[56].mxu1  ;;  %v4178_v14 = vld [vmem:[#allocation16_spill] sm:$0xff]  ;;  %v4180_v22 = vld [vmem:[#allocation18_spill] sm:$0xff] }
 0x168   :  { %v1576_v29 = vmax.f32 %v1478_v19, %v1527_v41  ;;  %v1430_v21 = vmax.f32 %v1060_v33, 0.0  ;;  %v4175_v12 = vmax.f32 %v4174_v20, 0.0  ;;  %v4177_v19 = vmax.f32 %v4176_v7, 0.0  ;;  %v579_v26 = vpop.f32.mrb[57].mxu0  ;;  %v1069_v16 = vpop.f32.mrb[57].mxu1 }
 0x169   :  { %v1575_v45 = vmax.f32 %v1477_v8, %v1526_v36  ;;  %v585_v18 = vadd.f32 %v2005_v23, %v3041_v24  ;;  %v1075_v54 = vadd.f32 %v2152_v38, %v3041_v24  ;;  %v4179_v8 = vmax.f32 %v4178_v14, 0.0 }
 0x16a   :  { %1625 = vst [vmem:[%s4042_s3 + $0x20] sm:$0xff] %v1576_v29  ;;  %v1480_v40 = vmax.f32 %v4175_v12, %v1333_v31  ;;  %v1529_v41 = vmax.f32 %v4177_v19, %v1431_v5  ;;  %v4181_v36 = vmax.f32 %v4180_v22, 0.0  ;;  %v580_v33 = vadd.f32 %v3041_v24, %v579_v26 }
 0x16b   :  { %1624 = vst [vmem:[%s4042_s3 + $0x18] sm:$0xff] %v1575_v45  ;;  %v1479_v13 = vmax.f32 %v4179_v8, %v1332_v50  ;;  %v1070_v29 = vadd.f32 %v3041_v24, %v1069_v16  ;;  %v3570_v31 = vadd.f32 %v3041_v24, %v3232_v35  ;;  %v1335_v23 = vmax.f32 %v585_v18, 0.0  ;;  %v2008_v7 = vpop.f32.mrb[58].mxu0  ;;  %v4184_v16 = vld [vmem:[#allocation19_spill] sm:$0xff] }
 0x16c   :  { %v1528_v51 = vmax.f32 %v4181_v36, %v1430_v21  ;;  %v1578_v5 = vmax.f32 %v1480_v40, %v1529_v41  ;;  %v1433_v38 = vmax.f32 %v1075_v54, 0.0  ;;  %v3574_v45 = vadd.f32 %v3041_v24, %v3234_v57  ;;  %v2155_v21 = vpop.f32.mrb[58].mxu1  ;;  %v589_v54 = vpop.f32.mrb[59].mxu0 }
 0x16d   :  { %v1334_v50 = vmax.f32 %v580_v33, 0.0  ;;  %v1432_v12 = vmax.f32 %v1070_v29, 0.0  ;;  %v4182_v19 = vmax.f32 %v3151_v42, 0.0  ;;  %v4183_v40 = vmax.f32 %v3157_v32, 0.0  ;;  %v1079_v26 = vpop.f32.mrb[59].mxu1 }
 0x16e   :  { %v1577_v20 = vmax.f32 %v1479_v13, %v1528_v51  ;;  %1627 = vst [vmem:[%s4042_s3 + $0x30] sm:$0xff] %v1578_v5  ;;  %v595_v18 = vadd.f32 %v2008_v7, %v3041_v24  ;;  %v1085_v57 = vadd.f32 %v2155_v21, %v3041_v24  ;;  %v4185_v14 = vmax.f32 %v4184_v16, 0.0  ;;  %v4186_v13 = vld [vmem:[#allocation20_spill] sm:$0xff] }
 0x16f   :  { %v1482_v35 = vmax.f32 %v4182_v19, %v1335_v23  ;;  %v1531_v41 = vmax.f32 %v4183_v40, %v1433_v38  ;;  %v4187_v22 = vmax.f32 %v4186_v13, 0.0  ;;  %v590_v36 = vadd.f32 %v3041_v24, %v589_v54  ;;  %v2011_v21 = vpop.f32.mrb[60].mxu0  ;;  %v2158_v19 = vpop.f32.mrb[60].mxu1 }
 0x170   :  { %1626 = vst [vmem:[%s4042_s3 + $0x28] sm:$0xff] %v1577_v20  ;;  %v1481_v8 = vmax.f32 %v4185_v14, %v1334_v50  ;;  %v1080_v32 = vadd.f32 %v3041_v24, %v1079_v26  ;;  %v1317_v51 = vmax.f32 %v3544_v53, 0.0  ;;  %v1337_v29 = vmax.f32 %v595_v18, 0.0  ;;  %v599_v18 = vpop.f32.mrb[61].mxu0 }
 0x171   :  { %v1530_v42 = vmax.f32 %v4187_v22, %v1432_v12  ;;  %v1580_v33 = vmax.f32 %v1482_v35, %v1531_v41  ;;  %v1435_v5 = vmax.f32 %v1085_v57, 0.0  ;;  %v1415_v23 = vmax.f32 %v3548_v3, 0.0  ;;  %v1089_v57 = vpop.f32.mrb[61].mxu1 }
 0x172   :  { %v1336_v7 = vmax.f32 %v590_v36, 0.0  ;;  %v1434_v20 = vmax.f32 %v1080_v32, 0.0  ;;  %v4188_v50 = vmax.f32 %v3171_v43, 0.0  ;;  %v4189_v40 = vmax.f32 %v3181_v28, 0.0 }
 0x173   :  { %v1579_v38 = vmax.f32 %v1481_v8, %v1530_v42  ;;  %1629 = vst [vmem:[%s4042_s3 + $0x40] sm:$0xff] %v1580_v33  ;;  %v605_v35 = vadd.f32 %v2011_v21, %v3041_v24  ;;  %v1095_v41 = vadd.f32 %v2158_v19, %v3041_v24  ;;  %v4190_v26 = vmax.f32 %v3143_v27, 0.0  ;;  %v2161_v27 = vpop.f32.mrb[62].mxu1 }
 0x174   :  { %v1484_v12 = vmax.f32 %v4188_v50, %v1337_v29  ;;  %v1533_v54 = vmax.f32 %v4189_v40, %v1435_v5  ;;  %v4191_v14 = vmax.f32 %v3147_v39, 0.0  ;;  %v600_v8 = vadd.f32 %v3041_v24, %v599_v18  ;;  %v1099_v40 = vpop.f32.mrb[63].mxu1  ;;  %v4196_v18 = vld [vmem:[#allocation24_spill] sm:$0xff] }
 0x175   :  { %1628 = vst [vmem:[%s4042_s3 + $0x38] sm:$0xff] %v1579_v38  ;;  %v1483_v16 = vmax.f32 %v4190_v26, %v1336_v7  ;;  %v1090_v28 = vadd.f32 %v3041_v24, %v1089_v57  ;;  %v1316_v13 = vmax.f32 %v3570_v31, 0.0  ;;  %v1339_v42 = vmax.f32 %v605_v35, 0.0  ;;  %v2014_v38 = vpop.f32.mrb[62].mxu0 }
 0x176   :  { %v1532_v43 = vmax.f32 %v4191_v14, %v1434_v20  ;;  %v1582_v22 = vmax.f32 %v1484_v12, %v1533_v54  ;;  %v1437_v36 = vmax.f32 %v1095_v41, 0.0  ;;  %v1414_v32 = vmax.f32 %v3574_v45, 0.0  ;;  %v609_v12 = vpop.f32.mrb[63].mxu0  ;;  %v4194_v54 = vld [vmem:[#allocation23_spill] sm:$0xff] }
 0x177   :  { %v1338_v29 = vmax.f32 %v600_v8, 0.0  ;;  %v1436_v5 = vmax.f32 %v1090_v28, 0.0  ;;  %v4192_v39 = vmax.f32 %v3202_v52, 0.0  ;;  %v4193_v20 = vmax.f32 %v3206_v34, 0.0 }
 0x178   :  { %v1581_v33 = vmax.f32 %v1483_v16, %v1532_v43  ;;  %1631 = vst [vmem:[%s4042_s3 + $0x50] sm:$0xff] %v1582_v22  ;;  %v615_v19 = vadd.f32 %v2014_v38, %v3041_v24  ;;  %v1105_v50 = vadd.f32 %v2161_v27, %v3041_v24  ;;  %v4195_v35 = vmax.f32 %v4194_v54, 0.0  ;;  %v4199_v38 = vld [vmem:[#allocation29_spill] sm:$0xff] }
 0x179   :  { %v1486_v7 = vmax.f32 %v4192_v39, %v1339_v42  ;;  %v1535_v21 = vmax.f32 %v4193_v20, %v1437_v36  ;;  %v4197_v57 = vmax.f32 %v4196_v18, 0.0  ;;  %v610_v26 = vadd.f32 %v3041_v24, %v609_v12 }
 0x17a   :  { %1630 = vst [vmem:[%s4042_s3 + $0x48] sm:$0xff] %v1581_v33  ;;  %v1485_v41 = vmax.f32 %v4195_v35, %v1338_v29  ;;  %v1100_v34 = vadd.f32 %v3041_v24, %v1099_v40  ;;  %v3636_v16 = vadd.f32 %v3269_v30, %v3041_v24  ;;  %v1341_v43 = vmax.f32 %v615_v19, 0.0  ;;  %v2017_v33 = vpop.f32.mrb[64].mxu0  ;;  %v2164_v29 = vpop.f32.mrb[64].mxu1  ;;  %v4201_v19 = vld [vmem:[#allocation25_spill] sm:$0xff]  ;;  %v4203_v40 = vld [vmem:[#allocation26_spill] sm:$0xff] }
 0x17b   :  { %v1534_v52 = vmax.f32 %v4197_v57, %v1436_v5  ;;  %v1584_v14 = vmax.f32 %v1486_v7, %v1535_v21  ;;  %v1439_v8 = vmax.f32 %v1105_v50, 0.0  ;;  %v3640_v28 = vadd.f32 %v3271_v63, %v3041_v24  ;;  %v619_v20 = vpop.f32.mrb[65].mxu0  ;;  %v1109_v21 = vpop.f32.mrb[65].mxu1 }
 0x17c   :  { %v1340_v42 = vmax.f32 %v610_v26, 0.0  ;;  %v1438_v36 = vmax.f32 %v1100_v34, 0.0  ;;  %v4198_v5 = vmax.f32 %v3226_v37, 0.0  ;;  %v4200_v27 = vmax.f32 %v4199_v38, 0.0  ;;  %v4205_v34 = vld [vmem:[#allocation31_spill] sm:$0xff] }
 0x17d   :  { %v1583_v22 = vmax.f32 %v1485_v41, %v1534_v52  ;;  %1633 = vst [vmem:[%s4042_s3 + $0x60] sm:$0xff] %v1584_v14  ;;  %v625_v7 = vadd.f32 %v2017_v33, %v3041_v24  ;;  %v1115_v63 = vadd.f32 %v2164_v29, %v3041_v24  ;;  %v4202_v50 = vmax.f32 %v4201_v19, 0.0 }
 0x17e   :  { %v1488_v30 = vmax.f32 %v4198_v5, %v1341_v43  ;;  %v1537_v39 = vmax.f32 %v4200_v27, %v1439_v8  ;;  %v4204_v54 = vmax.f32 %v4203_v40, 0.0  ;;  %v620_v35 = vadd.f32 %v3041_v24, %v619_v20 }
 0x17f   :  { %1632 = vst [vmem:[%s4042_s3 + $0x58] sm:$0xff] %v1583_v22  ;;  %v1487_v12 = vmax.f32 %v4202_v50, %v1340_v42  ;;  %v1110_v41 = vadd.f32 %v3041_v24, %v1109_v21  ;;  %v3662_v18 = vadd.f32 %v3041_v24, %v3283_v61  ;;  %v1343_v52 = vmax.f32 %v625_v7, 0.0  ;;  %v2020_v42 = vpop.f32.mrb[66].mxu0  ;;  %v4208_v7 = vld [vmem:[#allocation27_spill] sm:$0xff]  ;;  %v4210_v21 = vld [vmem:[#allocation28_spill] sm:$0xff] }
 0x180   :  { %v1536_v37 = vmax.f32 %v4204_v54, %v1438_v36  ;;  %v1586_v57 = vmax.f32 %v1488_v30, %v1537_v39  ;;  %v1441_v26 = vmax.f32 %v1115_v63, 0.0  ;;  %v3666_v14 = vadd.f32 %v3041_v24, %v4205_v34  ;;  %v2167_v36 = vpop.f32.mrb[66].mxu1  ;;  %v629_v27 = vpop.f32.mrb[67].mxu0 }
 0x181   :  { %v1342_v8 = vmax.f32 %v620_v35, 0.0  ;;  %v1440_v22 = vmax.f32 %v1110_v41, 0.0  ;;  %v4206_v33 = vmax.f32 %v3247_v58, 0.0  ;;  %v4207_v29 = vmax.f32 %v3253_v49, 0.0  ;;  %v1119_v39 = vpop.f32.mrb[67].mxu1 }
 0x182   :  { %v1585_v43 = vmax.f32 %v1487_v12, %v1536_v37  ;;  %1635 = vst [vmem:[%s4042_s3 + $0x70] sm:$0xff] %v1586_v57  ;;  %v635_v30 = vadd.f32 %v2020_v42, %v3041_v24  ;;  %v1125_v38 = vadd.f32 %v2167_v36, %v3041_v24  ;;  %v4209_v63 = vmax.f32 %v4208_v7, 0.0  ;;  %v2170_v34 = vpop.f32.mrb[68].mxu1 }
 0x183   :  { %v1490_v61 = vmax.f32 %v4206_v33, %v1343_v52  ;;  %v1539_v5 = vmax.f32 %v4207_v29, %v1441_v26  ;;  %v4211_v19 = vmax.f32 %v4210_v21, 0.0  ;;  %v630_v50 = vadd.f32 %v3041_v24, %v629_v27  ;;  %v2023_v26 = vpop.f32.mrb[68].mxu0  ;;  %v1129_v29 = vpop.f32.mrb[69].mxu1 }
 0x184   :  { %1634 = vst [vmem:[%s4042_s3 + $0x68] sm:$0xff] %v1585_v43  ;;  %v1489_v20 = vmax.f32 %v4209_v63, %v1342_v8  ;;  %v1120_v49 = vadd.f32 %v3041_v24, %v1119_v39  ;;  %v1319_v12 = vmax.f32 %v3636_v16, 0.0  ;;  %v1345_v54 = vmax.f32 %v635_v30, 0.0 }
 0x185   :  { %v1538_v58 = vmax.f32 %v4211_v19, %v1440_v22  ;;  %v1588_v40 = vmax.f32 %v1490_v61, %v1539_v5  ;;  %v1443_v37 = vmax.f32 %v1125_v38, 0.0  ;;  %v1417_v35 = vmax.f32 %v3640_v28, 0.0  ;;  %v639_v61 = vpop.f32.mrb[69].mxu0 }
 0x186   :  { %v1344_v57 = vmax.f32 %v630_v50, 0.0  ;;  %v1442_v52 = vmax.f32 %v1120_v49, 0.0  ;;  %v4212_v43 = vmax.f32 %v3267_v59, 0.0  ;;  %v4213_v22 = vmax.f32 %v3277_v46, 0.0  ;;  %v2026_v49 = vpop.f32.mrb[70].mxu0 }
 0x187   :  { %v1587_v41 = vmax.f32 %v1489_v20, %v1538_v58  ;;  %1637 = vst [vmem:[%s4042_s3 + $0x80] sm:$0xff] %v1588_v40  ;;  %v645_v36 = vadd.f32 %v2023_v26, %v3041_v24  ;;  %v1135_v33 = vadd.f32 %v2170_v34, %v3041_v24  ;;  %v4214_v5 = vmax.f32 %v3239_v44, 0.0  ;;  %v2173_v44 = vpop.f32.mrb[70].mxu1 }
 0x188   :  { %v1492_v8 = vmax.f32 %v4212_v43, %v1345_v54  ;;  %v1541_v42 = vmax.f32 %v4213_v22, %v1443_v37  ;;  %v4215_v38 = vmax.f32 %v3243_v55, 0.0  ;;  %v640_v27 = vadd.f32 %v3041_v24, %v639_v61  ;;  %v1139_v26 = vpop.f32.mrb[71].mxu1 }
 0x189   :  { %1636 = vst [vmem:[%s4042_s3 + $0x78] sm:$0xff] %v1587_v41  ;;  %v1491_v30 = vmax.f32 %v4214_v5, %v1344_v57  ;;  %v1130_v46 = vadd.f32 %v3041_v24, %v1129_v29  ;;  %v1318_v39 = vmax.f32 %v3662_v18, 0.0  ;;  %v1347_v63 = vmax.f32 %v645_v36, 0.0  ;;  %v4221_v5 = vld [vmem:[#allocation36_spill] sm:$0xff] }
 0x18a   :  { %v1540_v59 = vmax.f32 %v4215_v38, %v1442_v52  ;;  %v1590_v7 = vmax.f32 %v1492_v8, %v1541_v42  ;;  %v1445_v20 = vmax.f32 %v1135_v33, 0.0  ;;  %v1416_v21 = vmax.f32 %v3666_v14, 0.0  ;;  %v649_v52 = vpop.f32.mrb[71].mxu0  ;;  %v4220_v42 = vld [vmem:[#allocation35_spill] sm:$0xff] }
 0x18b   :  { %v1346_v58 = vmax.f32 %v640_v27, 0.0  ;;  %v1444_v50 = vmax.f32 %v1130_v46, 0.0  ;;  %v4216_v55 = vmax.f32 %v3298_v4, 0.0  ;;  %v4217_v54 = vmax.f32 %v3302_v2, 0.0  ;;  %v2176_v27 = vpop.f32.mrb[72].mxu1  ;;  %v4222_v46 = vld [vmem:[#allocation37_spill] sm:$0xff] }
 0x18c   :  { %v1589_v19 = vmax.f32 %v1491_v30, %v1540_v59  ;;  %1639 = vst [vmem:[%s4042_s3 + $0x90] sm:$0xff] %v1590_v7  ;;  %v655_v41 = vadd.f32 %v2026_v49, %v3041_v24  ;;  %v1145_v57 = vadd.f32 %v2173_v44, %v3041_v24  ;;  %v4218_v34 = vmax.f32 %v3257_v60, 0.0 }
 0x18d   :  { %v1494_v40 = vmax.f32 %v4216_v55, %v1347_v63  ;;  %v1543_v37 = vmax.f32 %v4217_v54, %v1445_v20  ;;  %v4219_v8 = vmax.f32 %v3263_v62, 0.0  ;;  %v650_v22 = vadd.f32 %v3041_v24, %v649_v52  ;;  %v2029_v62 = vpop.f32.mrb[72].mxu0  ;;  %v4224_v20 = vld [vmem:[#allocation38_spill] sm:$0xff]  ;;  %v1149_v55 = vpop.f32.mrb[73].mxu1 }
 0x18e   :  { %1638 = vst [vmem:[%s4042_s3 + $0x88] sm:$0xff] %v1589_v19  ;;  %v1493_v43 = vmax.f32 %v4218_v34, %v1346_v58  ;;  %v1140_v2 = vadd.f32 %v3041_v24, %v1139_v26  ;;  %v3728_v36 = vadd.f32 %v4220_v42, %v3041_v24  ;;  %v1349_v61 = vmax.f32 %v655_v41, 0.0  ;;  %v659_v44 = vpop.f32.mrb[73].mxu0  ;;  %v4228_v41 = vld [vmem:[#allocation32_spill] sm:$0xff] }
 0x18f   :  { %v1542_v4 = vmax.f32 %v4219_v8, %v1444_v50  ;;  %v1592_v33 = vmax.f32 %v1494_v40, %v1543_v37  ;;  %v1447_v29 = vmax.f32 %v1145_v57, 0.0  ;;  %v3732_v30 = vadd.f32 %v4221_v5, %v3041_v24  ;;  %v4226_v40 = vld [vmem:[#allocation30_spill] sm:$0xff]  ;;  %v4231_v42 = vld [vmem:[#allocation40_spill] sm:$0xff] }
 0x190   :  { %v1348_v38 = vmax.f32 %v650_v22, 0.0  ;;  %v1446_v59 = vmax.f32 %v1140_v2, 0.0  ;;  %v4223_v7 = vmax.f32 %v4222_v46, 0.0  ;;  %v4225_v19 = vmax.f32 %v4224_v20, 0.0 }
 0x191   :  { %v1591_v60 = vmax.f32 %v1493_v43, %v1542_v4  ;;  %1641 = vst [vmem:[%s4042_s3 + $0xa0] sm:$0xff] %v1592_v33  ;;  %v665_v50 = vadd.f32 %v2029_v62, %v3041_v24  ;;  %v1155_v49 = vadd.f32 %v2176_v27, %v3041_v24  ;;  %v4227_v54 = vmax.f32 %v4226_v40, 0.0  ;;  %v4230_v43 = vld [vmem:[#allocation39_spill] sm:$0xff] }
 0x192   :  { %v1496_v63 = vmax.f32 %v4223_v7, %v1349_v61  ;;  %v1545_v58 = vmax.f32 %v4225_v19, %v1447_v29  ;;  %v4229_v57 = vmax.f32 %v4228_v41, 0.0  ;;  %v660_v26 = vadd.f32 %v3041_v24, %v659_v44  ;;  %v4236_v44 = vld [vmem:[#allocation34_spill] sm:$0xff] }
 0x193   :  { %1640 = vst [vmem:[%s4042_s3 + $0x98] sm:$0xff] %v1591_v60  ;;  %v1495_v37 = vmax.f32 %v4227_v54, %v1348_v38  ;;  %v1150_v34 = vadd.f32 %v3041_v24, %v1149_v55  ;;  %v3754_v8 = vadd.f32 %v3041_v24, %v4230_v43  ;;  %v1351_v22 = vmax.f32 %v665_v50, 0.0  ;;  %v2032_v60 = vpop.f32.mrb[74].mxu0  ;;  %v2179_v38 = vpop.f32.mrb[74].mxu1 }
 0x194   :  { %v1544_v52 = vmax.f32 %v4229_v57, %v1446_v59  ;;  %v1594_v4 = vmax.f32 %v1496_v63, %v1545_v58  ;;  %v1449_v2 = vmax.f32 %v1155_v49, 0.0  ;;  %v3758_v33 = vadd.f32 %v3041_v24, %v4231_v42  ;;  %v669_v20 = vpop.f32.mrb[75].mxu0  ;;  %v1159_v19 = vpop.f32.mrb[75].mxu1  ;;  %v4234_v58 = vld [vmem:[#allocation33_spill] sm:$0xff] }
 0x195   :  { %v1350_v29 = vmax.f32 %v660_v26, 0.0  ;;  %v1448_v5 = vmax.f32 %v1150_v34, 0.0  ;;  %v4232_v59 = vmax.f32 %v3343_v10, 0.0  ;;  %v4233_v27 = vmax.f32 %v3349_v9, 0.0 }
 0x196   :  { %v1593_v61 = vmax.f32 %v1495_v37, %v1544_v52  ;;  %1643 = vst [vmem:[%s4042_s3 + $0xb0] sm:$0xff] %v1594_v4  ;;  %v675_v7 = vadd.f32 %v2032_v60, %v3041_v24  ;;  %v1165_v63 = vadd.f32 %v2179_v38, %v3041_v24  ;;  %v4235_v50 = vmax.f32 %v4234_v58, 0.0  ;;  %v2035_v4 = vpop.f32.mrb[76].mxu0 }
 0x197   :  { %v1498_v62 = vmax.f32 %v4232_v59, %v1351_v22  ;;  %v1547_v46 = vmax.f32 %v4233_v27, %v1449_v2  ;;  %v4237_v55 = vmax.f32 %v4236_v44, 0.0  ;;  %v670_v40 = vadd.f32 %v3041_v24, %v669_v20  ;;  %v2182_v22 = vpop.f32.mrb[76].mxu1  ;;  %v4238_v2 = vld [vmem:[#allocation2_spill] sm:$0xff]  ;;  %v679_v59 = vpop.f32.mrb[77].mxu0  ;;  %v4241_v27 = vld [vmem:[#allocation41_spill] sm:$0xff] }
 0x198   :  { %1642 = vst [vmem:[%s4042_s3 + $0xa8] sm:$0xff] %v1593_v61  ;;  %v1497_v49 = vmax.f32 %v4235_v50, %v1350_v29  ;;  %v1160_v9 = vadd.f32 %v3041_v24, %v1159_v19  ;;  %v1321_v54 = vmax.f32 %v3728_v36, 0.0  ;;  %v1353_v41 = vmax.f32 %v675_v7, 0.0 }
 0x199   :  { %v1546_v10 = vmax.f32 %v4237_v55, %v1448_v5  ;;  %v1596_v37 = vmax.f32 %v1498_v62, %v1547_v46  ;;  %v1451_v57 = vmax.f32 %v1165_v63, 0.0  ;;  %v1419_v52 = vmax.f32 %v3732_v30, 0.0  ;;  %v1169_v62 = vpop.f32.mrb[77].mxu1  ;;  %v4243_v63 = vld [vmem:[#allocation42_spill] sm:$0xff] }
 0x19a   :  { %v1352_v34 = vmax.f32 %v670_v40, 0.0  ;;  %v1450_v43 = vmax.f32 %v1160_v9, 0.0  ;;  %v4239_v42 = vmax.f32 %v4238_v2, 0.0  ;;  %v4240_v29 = vmax.f32 %v3373_v56, 0.0 }
 0x19b   :  { %v1595_v26 = vmax.f32 %v1497_v49, %v1546_v10  ;;  %1645 = vst [vmem:[%s4042_s3 + $0xc0] sm:$0xff] %v1596_v37  ;;  %v685_v60 = vadd.f32 %v2035_v4, %v3041_v24  ;;  %v1175_v38 = vadd.f32 %v2182_v22, %v3041_v24  ;;  %v4242_v46 = vmax.f32 %v4241_v27, 0.0  ;;  %v4247_v4 = vld [vmem:[#allocation7_spill] sm:$0xff] }
 0x19c   :  { %v1500_v61 = vmax.f32 %v4239_v42, %v1353_v41  ;;  %v1549_v5 = vmax.f32 %v4240_v29, %v1451_v57  ;;  %v4244_v20 = vmax.f32 %v4243_v63, 0.0  ;;  %v680_v58 = vadd.f32 %v3041_v24, %v679_v59  ;;  %v2038_v41 = vpop.f32.mrb[78].mxu0  ;;  %v2185_v57 = vpop.f32.mrb[78].mxu1 }
 0x19d   :  { %1644 = vst [vmem:[%s4042_s3 + $0xb8] sm:$0xff] %v1595_v26  ;;  %v1499_v7 = vmax.f32 %v4242_v46, %v1352_v34  ;;  %v1170_v56 = vadd.f32 %v3041_v24, %v1169_v62  ;;  %v1320_v50 = vmax.f32 %v3754_v8, 0.0  ;;  %v1355_v44 = vmax.f32 %v685_v60, 0.0  ;;  %v4245_v26 = vld [vmem:[#allocation6_spill] sm:$0xff]  ;;  %v689_v29 = vpop.f32.mrb[79].mxu0  ;;  %v4249_v60 = vld [vmem:[#allocation43_spill] sm:$0xff] }
 0x19e   :  { %v1548_v19 = vmax.f32 %v4244_v20, %v1450_v43  ;;  %v1598_v49 = vmax.f32 %v1500_v61, %v1549_v5  ;;  %v1453_v55 = vmax.f32 %v1175_v38, 0.0  ;;  %v1418_v10 = vmax.f32 %v3758_v33, 0.0  ;;  %v1179_v5 = vpop.f32.mrb[79].mxu1  ;;  %v4251_v62 = vld [vmem:[#allocation44_spill] sm:$0xff]  ;;  %v4253_v20 = vld [vmem:[#allocation45_spill] sm:$0xff] }
 0x19f   :  { %v1354_v9 = vmax.f32 %v680_v58, 0.0  ;;  %v1452_v37 = vmax.f32 %v1170_v56, 0.0  ;;  %v4246_v34 = vmax.f32 %v4245_v26, 0.0  ;;  %v4248_v22 = vmax.f32 %v4247_v4, 0.0  ;;  %v2188_v26 = vpop.f32.mrb[80].mxu1 }
 0x1a0   :  { %v1597_v40 = vmax.f32 %v1499_v7, %v1548_v19  ;;  %1647 = vst [vmem:[%s4042_s3 + $0xd0] sm:$0xff] %v1598_v49  ;;  %v695_v42 = vadd.f32 %v2038_v41, %v3041_v24  ;;  %v1185_v61 = vadd.f32 %v2185_v57, %v3041_v24  ;;  %v4250_v38 = vmax.f32 %v4249_v60, 0.0  ;;  %v2041_v57 = vpop.f32.mrb[80].mxu0 }
 0x1a1   :  { %v1502_v43 = vmax.f32 %v4246_v34, %v1355_v44  ;;  %v1551_v2 = vmax.f32 %v4248_v22, %v1453_v55  ;;  %v4252_v27 = vmax.f32 %v4251_v62, 0.0  ;;  %v690_v7 = vadd.f32 %v3041_v24, %v689_v29  ;;  %v3825_v44 = vld [vmem:[%s4041_s2] ss:$0 sm:$0xff]  ;;  %v4257_v29 = vld [vmem:[#allocation3_spill] sm:$0xff] }
 0x1a2   :  { %1646 = vst [vmem:[%s4042_s3 + $0xc8] sm:$0xff] %v1597_v40  ;;  %v1501_v59 = vmax.f32 %v4250_v38, %v1354_v9  ;;  %v1180_v63 = vadd.f32 %v3041_v24, %v1179_v5  ;;  %v3820_v19 = vadd.f32 %v4253_v20, %v3041_v24  ;;  %v1357_v56 = vmax.f32 %v695_v42, 0.0  ;;  %v4254_v55 = vld [vmem:[#allocation46_spill] sm:$0xff]  ;;  %v699_v42 = vpop.f32.mrb[81].mxu0  ;;  %v4259_v38 = vld [vmem:[#allocation5_spill] sm:$0xff] }
 0x1a3   :  { %v1550_v46 = vmax.f32 %v4252_v27, %v1452_v37  ;;  %v1600_v58 = vmax.f32 %v1502_v43, %v1551_v2  ;;  %v1455_v49 = vmax.f32 %v1185_v61, 0.0  ;;  %v3829_v40 = vadd.f32 %v3825_v44, %v4254_v55  ;;  %v1189_v61 = vpop.f32.mrb[81].mxu1  ;;  %v4261_v27 = vld [vmem:[#allocation4_spill] sm:$0xff] }
 0x1a4   :  { %v1356_v37 = vmax.f32 %v690_v7, 0.0  ;;  %v1454_v41 = vmax.f32 %v1180_v63, 0.0  ;;  %v4255_v24 = vmax.f32 %v3418_v15, 0.0  ;;  %v4256_v43 = vmax.f32 %v3422_v0, 0.0 }
 0x1a5   :  { %v1599_v9 = vmax.f32 %v1501_v59, %v1550_v46  ;;  %1649 = vst [vmem:[%s4042_s3 + $0xe0] sm:$0xff] %v1600_v58  ;;  %v705_v22 = vadd.f32 %v3825_v44, %v2041_v57  ;;  %v1195_v2 = vadd.f32 %v3825_v44, %v2188_v26  ;;  %v4258_v5 = vmax.f32 %v4257_v29, 0.0  ;;  %v4262_v58 = vld [vmem:[#allocation47_spill] sm:$0xff] }
 0x1a6   :  { %v1504_v34 = vmax.f32 %v4255_v24, %v1357_v56  ;;  %v1553_v4 = vmax.f32 %v4256_v43, %v1455_v49  ;;  %v4260_v59 = vmax.f32 %v4259_v38, 0.0  ;;  %v700_v62 = vadd.f32 %v3825_v44, %v699_v42  ;;  %v4265_v42 = vld [vmem:[#allocation8_spill] sm:$0xff] }
 0x1a7   :  { %1648 = vst [vmem:[%s4042_s3 + $0xd8] sm:$0xff] %v1599_v9  ;;  %v1503_v60 = vmax.f32 %v4258_v5, %v1356_v37  ;;  %v1190_v0 = vadd.f32 %v3825_v44, %v1189_v61  ;;  %v3851_v46 = vadd.f32 %v3825_v44, %v4261_v27  ;;  %v1359_v63 = vmax.f32 %v705_v22, 0.0  ;;  %v2044_v37 = vpop.f32.mrb[82].mxu0  ;;  %v4267_v5 = vld [vmem:[#allocation9_spill] sm:$0xff] }
 0x1a8   :  { %v1552_v15 = vmax.f32 %v4260_v59, %v1454_v41  ;;  %v1602_v7 = vmax.f32 %v1504_v34, %v1553_v4  ;;  %v1457_v20 = vmax.f32 %v1195_v2, 0.0  ;;  %v3855_v56 = vadd.f32 %v3825_v44, %v4262_v58  ;;  %v2191_v41 = vpop.f32.mrb[82].mxu1  ;;  %v709_v22 = vpop.f32.mrb[83].mxu0 }
 0x1a9   :  { %v1358_v55 = vmax.f32 %v700_v62, 0.0  ;;  %v1456_v9 = vmax.f32 %v1190_v0, 0.0  ;;  %v4263_v57 = vmax.f32 %v3439_v6, 0.0  ;;  %v4264_v24 = vmax.f32 %v3445_v1, 0.0  ;;  %v1199_v2 = vpop.f32.mrb[83].mxu1  ;;  %v2047_v58 = vpop.f32.mrb[84].mxu0 }
 0x1aa   :  { %v1601_v49 = vmax.f32 %v1503_v60, %v1552_v15  ;;  %1651 = vst [vmem:[%s4042_s3 + $0xf0] sm:$0xff] %v1602_v7  ;;  %v715_v43 = vadd.f32 %v3825_v44, %v2044_v37  ;;  %v1205_v4 = vadd.f32 %v3825_v44, %v2191_v41  ;;  %v4266_v61 = vmax.f32 %v4265_v42, 0.0  ;;  %v4270_v37 = vld [vmem:[#allocation53_spill] sm:$0xff]  ;;  %v4274_v42 = vld [vmem:[#allocation15_spill] sm:$0xff] }
 0x1ab   :  { %v1506_v26 = vmax.f32 %v4263_v57, %v1359_v63  ;;  %v1555_v34 = vmax.f32 %v4264_v24, %v1457_v20  ;;  %v4268_v60 = vmax.f32 %v4267_v5, 0.0  ;;  %v710_v38 = vadd.f32 %v3825_v44, %v709_v22 }
 0x1ac   :  { %1650 = vst [vmem:[%s4042_s3 + $0xe8] sm:$0xff] %v1601_v49  ;;  %v1505_v29 = vmax.f32 %v4266_v61, %v1358_v55  ;;  %v1200_v1 = vadd.f32 %v3825_v44, %v1199_v2  ;;  %v1323_v59 = vmax.f32 %v3820_v19, 0.0  ;;  %v1361_v62 = vmax.f32 %v715_v43, 0.0  ;;  %v2194_v49 = vpop.f32.mrb[84].mxu1 }
 0x1ad   :  { %v1554_v6 = vmax.f32 %v4268_v60, %v1456_v9  ;;  %v1604_v15 = vmax.f32 %v1506_v26, %v1555_v34  ;;  %v1459_v0 = vmax.f32 %v1205_v4, 0.0  ;;  %v1421_v27 = vmax.f32 %v3829_v40, 0.0  ;;  %v719_v34 = vpop.f32.mrb[85].mxu0  ;;  %v1209_v43 = vpop.f32.mrb[85].mxu1  ;;  %v4272_v4 = vld [vmem:[#allocation14_spill] sm:$0xff] }
 0x1ae   :  { %v1360_v63 = vmax.f32 %v710_v38, 0.0  ;;  %v1458_v20 = vmax.f32 %v1200_v1, 0.0  ;;  %v4269_v55 = vmax.f32 %v3459_v48, 0.0  ;;  %v4271_v41 = vmax.f32 %v4270_v37, 0.0 }
 0x1af   :  { %v1603_v7 = vmax.f32 %v1505_v29, %v1554_v6  ;;  %1653 = vst [vmem:[%s4042_s3 + $0x100] sm:$0xff] %v1604_v15  ;;  %v725_v26 = vadd.f32 %v3825_v44, %v2047_v58  ;;  %v1215_v24 = vadd.f32 %v3825_v44, %v2194_v49  ;;  %v4273_v22 = vmax.f32 %v4272_v4, 0.0  ;;  %v2050_v58 = vpop.f32.mrb[86].mxu0  ;;  %v2197_v49 = vpop.f32.mrb[86].mxu1 }
 0x1b0   :  { %v1508_v9 = vmax.f32 %v4269_v55, %v1361_v62  ;;  %v1557_v57 = vmax.f32 %v4271_v41, %v1459_v0  ;;  %v4275_v61 = vmax.f32 %v4274_v42, 0.0  ;;  %v720_v29 = vadd.f32 %v3825_v44, %v719_v34  ;;  %v729_v37 = vpop.f32.mrb[87].mxu0  ;;  %v1219_v41 = vpop.f32.mrb[87].mxu1  ;;  %v4278_v34 = vld [vmem:[#allocation50_spill] sm:$0xff] }
 0x1b1   :  { %1652 = vst [vmem:[%s4042_s3 + $0xf8] sm:$0xff] %v1603_v7  ;;  %v1507_v2 = vmax.f32 %v4273_v22, %v1360_v63  ;;  %v1210_v5 = vadd.f32 %v3825_v44, %v1209_v43  ;;  %v1322_v60 = vmax.f32 %v3851_v46, 0.0  ;;  %v1363_v38 = vmax.f32 %v725_v26, 0.0 }
 0x1b2   :  { %v1556_v48 = vmax.f32 %v4275_v61, %v1458_v20  ;;  %v1606_v6 = vmax.f32 %v1508_v9, %v1557_v57  ;;  %v1461_v1 = vmax.f32 %v1215_v24, 0.0  ;;  %v1420_v15 = vmax.f32 %v3855_v56, 0.0  ;;  %v4276_v57 = vld [vmem:[#allocation17_spill] sm:$0xff] }
 0x1b3   :  { %v1362_v0 = vmax.f32 %v720_v29, 0.0  ;;  %v1460_v7 = vmax.f32 %v1210_v5, 0.0  ;;  %v1510_v63 = vmax.f32 %v1314_v17, %v1363_v38  ;;  %v735_v55 = vadd.f32 %v3825_v44, %v2050_v58  ;;  %v4281_v61 = vld [vmem:[#allocation49_spill] sm:$0xff]  ;;  %v2053_v38 = vpop.f32.mrb[88].mxu0 }
 0x1b4   :  { %v1605_v62 = vmax.f32 %v1507_v2, %v1556_v48  ;;  %1655 = vst [vmem:[%s4042_s3 + $0x110] sm:$0xff] %v1606_v6  ;;  %v1559_v20 = vmax.f32 %v1412_v11, %v1461_v1  ;;  %v1225_v9 = vadd.f32 %v3825_v44, %v2197_v49  ;;  %v4277_v26 = vmax.f32 %v4276_v57, 0.0  ;;  %v4280_v11 = vld [vmem:[#allocation48_spill] sm:$0xff]  ;;  %v2200_v1 = vpop.f32.mrb[88].mxu1  ;;  %v739_v49 = vpop.f32.mrb[89].mxu0 }
 0x1b5   :  { %v4279_v43 = vmax.f32 %v4278_v34, 0.0  ;;  %v730_v17 = vadd.f32 %v3825_v44, %v729_v37  ;;  %v1220_v25 = vadd.f32 %v3825_v44, %v1219_v41  ;;  %v3917_v4 = vadd.f32 %v3825_v44, %v4280_v11  ;;  %v4284_v37 = vld [vmem:[#allocation55_spill] sm:$0xff] }
 0x1b6   :  { %1654 = vst [vmem:[%s4042_s3 + $0x108] sm:$0xff] %v1605_v62  ;;  %v1509_v24 = vmax.f32 %v4277_v26, %v1362_v0  ;;  %v1608_v22 = vmax.f32 %v1510_v63, %v1559_v20  ;;  %v1365_v2 = vmax.f32 %v735_v55, 0.0  ;;  %v1463_v42 = vmax.f32 %v1225_v9, 0.0  ;;  %v1229_v63 = vpop.f32.mrb[89].mxu1  ;;  %v4282_v20 = vld [vmem:[#allocation54_spill] sm:$0xff] }
 0x1b7   :  { %v1558_v47 = vmax.f32 %v4279_v43, %v1460_v7  ;;  %v3921_v48 = vadd.f32 %v3825_v44, %v4281_v61  ;;  %v1364_v5 = vmax.f32 %v730_v17, 0.0  ;;  %v1462_v6 = vmax.f32 %v1220_v25, 0.0  ;;  %v4287_v43 = vld [vmem:[#allocation11_spill] sm:$0xff] }
 0x1b8   :  { %1657 = vst [vmem:[%s4042_s3 + $0x120] sm:$0xff] %v1608_v22  ;;  %v1512_v62 = vmax.f32 %v1316_v13, %v1365_v2  ;;  %v1561_v0 = vmax.f32 %v1414_v32, %v1463_v42  ;;  %v745_v7 = vadd.f32 %v3825_v44, %v2053_v38  ;;  %v1235_v58 = vadd.f32 %v3825_v44, %v2200_v1  ;;  %v4286_v32 = vld [vmem:[#allocation10_spill] sm:$0xff]  ;;  %v2056_v22 = vpop.f32.mrb[90].mxu0  ;;  %v2203_v2 = vpop.f32.mrb[90].mxu1 }
 0x1b9   :  { %v1607_v29 = vmax.f32 %v1509_v24, %v1558_v47  ;;  %v4283_v55 = vmax.f32 %v4282_v20, 0.0  ;;  %v4285_v41 = vmax.f32 %v4284_v37, 0.0  ;;  %v740_v13 = vadd.f32 %v3825_v44, %v739_v49  ;;  %v1239_v38 = vpop.f32.mrb[91].mxu1 }
 0x1ba   :  { %v1230_v45 = vadd.f32 %v3825_v44, %v1229_v63  ;;  %v3943_v57 = vadd.f32 %v3825_v44, %v4286_v32  ;;  %v1610_v26 = vmax.f32 %v1512_v62, %v1561_v0  ;;  %v1367_v24 = vmax.f32 %v745_v7, 0.0  ;;  %v2206_v53 = vpop.f32.mrb[92].mxu1 }
 0x1bb   :  { %1656 = vst [vmem:[%s4042_s3 + $0x118] sm:$0xff] %v1607_v29  ;;  %v1511_v9 = vmax.f32 %v4283_v55, %v1364_v5  ;;  %v1560_v31 = vmax.f32 %v4285_v41, %v1462_v6  ;;  %v1465_v34 = vmax.f32 %v1235_v58, 0.0  ;;  %v3947_v47 = vadd.f32 %v3825_v44, %v4287_v43  ;;  %v749_v6 = vpop.f32.mrb[91].mxu0  ;;  %v1249_v41 = vpop.f32.mrb[93].mxu1 }
 0x1bc   :  { %v1366_v25 = vmax.f32 %v740_v13, 0.0  ;;  %v1464_v11 = vmax.f32 %v1230_v45, 0.0  ;;  %1659 = vst [vmem:[%s4042_s3 + $0x130] sm:$0xff] %v1610_v26  ;;  %v1514_v42 = vmax.f32 %v1318_v39, %v1367_v24  ;;  %v755_v29 = vadd.f32 %v3825_v44, %v2056_v22  ;;  %v2059_v55 = vpop.f32.mrb[92].mxu0 }
 0x1bd   :  { %v1609_v17 = vmax.f32 %v1511_v9, %v1560_v31  ;;  %v1563_v61 = vmax.f32 %v1416_v21, %v1465_v34  ;;  %v1245_v5 = vadd.f32 %v3825_v44, %v2203_v2  ;;  %v750_v39 = vadd.f32 %v3825_v44, %v749_v6  ;;  %v759_v37 = vpop.f32.mrb[93].mxu0 }
 0x1be   :  { %v1513_v1 = vmax.f32 %v1317_v51, %v1366_v25  ;;  %v1562_v18 = vmax.f32 %v1415_v23, %v1464_v11  ;;  %v1240_v14 = vadd.f32 %v3825_v44, %v1239_v38  ;;  %v1325_v21 = vmax.f32 %v3917_v4, 0.0  ;;  %v2062_v16 = vpop.f32.mrb[94].mxu0 }
 0x1bf   :  { %1658 = vst [vmem:[%s4042_s3 + $0x128] sm:$0xff] %v1609_v17  ;;  %v1612_v62 = vmax.f32 %v1514_v42, %v1563_v61  ;;  %v1369_v0 = vmax.f32 %v755_v29, 0.0  ;;  %v1467_v7 = vmax.f32 %v1245_v5, 0.0  ;;  %v1324_v58 = vmax.f32 %v3943_v57, 0.0  ;;  %v4288_v57 = vld [vmem:[#allocation51_spill] sm:$0xff]  ;;  %v769_v25 = vpop.f32.mrb[95].mxu0 }
 0x1c0   :  { %v1611_v49 = vmax.f32 %v1513_v1, %v1562_v18  ;;  %v1368_v63 = vmax.f32 %v750_v39, 0.0  ;;  %v1466_v20 = vmax.f32 %v1240_v14, 0.0  ;;  %v765_v23 = vadd.f32 %v3825_v44, %v2059_v55  ;;  %v2065_v18 = vpop.f32.mrb[96].mxu0 }
 0x1c1   :  { %1661 = vst [vmem:[%s4042_s3 + $0x140] sm:$0xff] %v1612_v62  ;;  %v1516_v3 = vmax.f32 %v1320_v50, %v1369_v0  ;;  %v1565_v51 = vmax.f32 %v1418_v10, %v1467_v7  ;;  %v1255_v9 = vadd.f32 %v3825_v44, %v2206_v53  ;;  %v760_v50 = vadd.f32 %v3825_v44, %v759_v37  ;;  %v779_v14 = vpop.f32.mrb[97].mxu0 }
 0x1c2   :  { %1660 = vst [vmem:[%s4042_s3 + $0x138] sm:$0xff] %v1611_v49  ;;  %v1515_v31 = vmax.f32 %v1319_v12, %v1368_v63  ;;  %v1564_v8 = vmax.f32 %v1417_v35, %v1466_v20  ;;  %v1250_v33 = vadd.f32 %v3825_v44, %v1249_v41  ;;  %v1422_v10 = vmax.f32 %v3947_v47, 0.0  ;;  %v2209_v12 = vpop.f32.mrb[94].mxu1 }
 0x1c3   :  { %v1614_v13 = vmax.f32 %v1516_v3, %v1565_v51  ;;  %v1371_v45 = vmax.f32 %v765_v23, 0.0  ;;  %v1469_v32 = vmax.f32 %v1255_v9, 0.0  ;;  %v540_v26 = vadd.f32 %v3825_v44, %v4288_v57  ;;  %v1259_v11 = vpop.f32.mrb[95].mxu1 }
 0x1c4   :  { %v1613_v24 = vmax.f32 %v1515_v31, %v1564_v8  ;;  %v1370_v34 = vmax.f32 %v760_v50, 0.0  ;;  %v1468_v43 = vmax.f32 %v1250_v33, 0.0  ;;  %v775_v47 = vadd.f32 %v3825_v44, %v2062_v16  ;;  %v2212_v36 = vpop.f32.mrb[96].mxu1 }
 0x1c5   :  { %1663 = vst [vmem:[%s4042_s3 + $0x150] sm:$0xff] %v1614_v13  ;;  %v1518_v28 = vmax.f32 %v1322_v60, %v1371_v45  ;;  %v1567_v35 = vmax.f32 %v1420_v15, %v1469_v32  ;;  %v1265_v17 = vadd.f32 %v3825_v44, %v2209_v12  ;;  %v770_v60 = vadd.f32 %v3825_v44, %v769_v25  ;;  %v4289_v15 = vld [vmem:[#allocation52_spill] sm:$0xff]  ;;  %v1269_v62 = vpop.f32.mrb[97].mxu1 }
 0x1c6   :  { %1662 = vst [vmem:[%s4042_s3 + $0x148] sm:$0xff] %v1613_v24  ;;  %v1517_v22 = vmax.f32 %v1321_v54, %v1370_v34  ;;  %v1566_v46 = vmax.f32 %v1419_v52, %v1468_v43  ;;  %v1260_v56 = vadd.f32 %v3825_v44, %v1259_v11  ;;  %v1030_v2 = vadd.f32 %v3825_v44, %v4289_v15 }
 0x1c7   :  { %v1616_v42 = vmax.f32 %v1518_v28, %v1567_v35  ;;  %v1373_v61 = vmax.f32 %v775_v47, 0.0  ;;  %v1471_v29 = vmax.f32 %v1265_v17, 0.0  ;;  %v1326_v5 = vmax.f32 %v540_v26, 0.0 }
 0x1c8   :  { %v1615_v6 = vmax.f32 %v1517_v22, %v1566_v46  ;;  %v1372_v38 = vmax.f32 %v770_v60, 0.0  ;;  %v1470_v1 = vmax.f32 %v1260_v56, 0.0  ;;  %v785_v52 = vadd.f32 %v3825_v44, %v2065_v18 }
 0x1c9   :  { %1665 = vst [vmem:[%s4042_s3 + $0x160] sm:$0xff] %v1616_v42  ;;  %v1520_v30 = vmax.f32 %v1324_v58, %v1373_v61  ;;  %v1569_v54 = vmax.f32 %v1422_v10, %v1471_v29  ;;  %v1275_v39 = vadd.f32 %v3825_v44, %v2212_v36  ;;  %v780_v49 = vadd.f32 %v3825_v44, %v779_v14 }
 0x1ca   :  { %1664 = vst [vmem:[%s4042_s3 + $0x158] sm:$0xff] %v1615_v6  ;;  %v1519_v0 = vmax.f32 %v1323_v59, %v1372_v38  ;;  %v1568_v7 = vmax.f32 %v1421_v27, %v1470_v1  ;;  %v1270_v58 = vadd.f32 %v3825_v44, %v1269_v62  ;;  %v1424_v63 = vmax.f32 %v1030_v2, 0.0 }
 0x1cb   :  { %v1618_v20 = vmax.f32 %v1520_v30, %v1569_v54  ;;  %v1375_v55 = vmax.f32 %v785_v52, 0.0  ;;  %v1473_v53 = vmax.f32 %v1275_v39, 0.0  ;;  %v1423_v3 = vmax.f32 %v3921_v48, 0.0 }
 0x1cc   :  { %v1617_v51 = vmax.f32 %v1519_v0, %v1568_v7  ;;  %v1374_v23 = vmax.f32 %v780_v49, 0.0  ;;  %v1472_v9 = vmax.f32 %v1270_v58, 0.0 }
 0x1cd   :  { %1667 = vst [vmem:[%s4042_s3 + $0x170] sm:$0xff] %v1618_v20  ;;  %v1522_v19 = vmax.f32 %v1326_v5, %v1375_v55  ;;  %v1571_v40 = vmax.f32 %v1424_v63, %v1473_v53 }
 0x1ce   :  { %1666 = vst [vmem:[%s4042_s3 + $0x168] sm:$0xff] %v1617_v51  ;;  %v1521_v44 = vmax.f32 %v1325_v21, %v1374_v23  ;;  %v1570_v59 = vmax.f32 %v1423_v3, %v1472_v9 }
 0x1cf   :  { %v1620_v27 = vmax.f32 %v1522_v19, %v1571_v40 }
 0x1d0   :  { %v1619_v37 = vmax.f32 %v1521_v44, %v1570_v59 }
 0x1d1   :  { %1669 = vst [vmem:[%s4042_s3 + $0x180] sm:$0xff] %v1620_v27 }
 0x1d2   :  { %1668 = vst [vmem:[%s4042_s3 + $0x178] sm:$0xff] %v1619_v37 }

// kernel: hdr_m_forward.4
= control target key start
LH: loop header
LB: loop body
LE: loop exit
PB: predicated region body
PF: predicated region fallthrough
CT: control target
= control target key end

     0   :  { %v456_v0 = vmov 0.0|0.0   ;;  %s845_s1 = inlined_call_operand.vmem [shape: f32[256,128], index: 1, kind: input, shape index: {}]   ;;  %s846_s0 = inlined_call_operand.vmem [shape: f32[224,256], index: 0, kind: input, shape index: {}]   ;;  %s847_s2 = inlined_call_operand.vmem [shape: f32[1,128], index: 2, kind: input, shape index: {}]   ;;  %s848_s3 = inlined_call_operand.vmem [shape: f32[56,128], index: 3, kind: output, shape index: {}]  }
   0x1   :  { %375 = vmatprep.subr.bf16.mxu0 %v456_v0  ;;  %423 = vmatprep.subr.bf16.mxu1 %v456_v0  ;;  %v70_v1 = vld [vmem:[%s845_s1] sm:$0xff]  ;;  %v71_v2 = vld [vmem:[%s845_s1 + $0x8] sm:$0xff]  ;;  %v72_v3 = vld [vmem:[%s845_s1 + $0x10] sm:$0xff] }
   0x2   :  { %v376_v4 = vpack.c.bf16 %v71_v2, %v70_v1  ;;  %v73_v5 = vld [vmem:[%s845_s1 + $0x18] sm:$0xff]  ;;  %v74_v7 = vld [vmem:[%s845_s1 + $0x20] sm:$0xff]  ;;  %v75_v8 = vld [vmem:[%s845_s1 + $0x28] sm:$0xff] }
   0x3   :  { %v379_v6 = vpack.c.bf16 %v73_v5, %v72_v3  ;;  %v382_v9 = vpack.c.bf16 %v75_v8, %v74_v7  ;;  %v76_v10 = vld [vmem:[%s845_s1 + $0x30] sm:$0xff]  ;;  %v77_v11 = vld [vmem:[%s845_s1 + $0x38] sm:$0xff]  ;;  %v15_v12 = vld [vmem:[%s846_s0 + $0x8] sm:$0xff] }
   0x4   :  { %377 = vmatpush1.bf16.msra.mxu0 %v376_v4  ;;  %439 = vmatpush1.bf16.msra.mxu1 %v376_v4  ;;  %v385_v13 = vpack.c.bf16 %v77_v11, %v76_v10  ;;  %v43_v14 = vld [vmem:[%s846_s0 + $0xe8] sm:$0xff]  ;;  %v78_v15 = vld [vmem:[%s845_s1 + $0x40] sm:$0xff]  ;;  %v80_v18 = vld [vmem:[%s845_s1 + $0x50] sm:$0xff] }
   0x5   :  { %378 = vmatprep.subr.bf16.mxu0 %v456_v0  ;;  %424 = vmatprep.subr.bf16.mxu1 %v456_v0  ;;  %v79_v16 = vld [vmem:[%s845_s1 + $0x48] sm:$0xff]  ;;  %v81_v19 = vld [vmem:[%s845_s1 + $0x58] sm:$0xff]  ;;  %v82_v21 = vld [vmem:[%s845_s1 + $0x60] sm:$0xff] }
   0x6   :  { %173 = vmatprep.mubr.f32.mxu0 %v15_v12  ;;  %243 = vmatprep.mubr.f32.mxu1 %v43_v14  ;;  %v388_v17 = vpack.c.bf16 %v79_v16, %v78_v15  ;;  %v391_v20 = vpack.c.bf16 %v81_v19, %v80_v18  ;;  %v83_v22 = vld [vmem:[%s845_s1 + $0x68] sm:$0xff]  ;;  %v84_v24 = vld [vmem:[%s845_s1 + $0x70] sm:$0xff]  ;;  %v85_v25 = vld [vmem:[%s845_s1 + $0x78] sm:$0xff] }
   0x7   :  { %v394_v23 = vpack.c.bf16 %v83_v22, %v82_v21  ;;  %v397_v26 = vpack.c.bf16 %v85_v25, %v84_v24  ;;  %v86_v27 = vld [vmem:[%s845_s1 + $0x80] sm:$0xff]  ;;  %v87_v28 = vld [vmem:[%s845_s1 + $0x88] sm:$0xff]  ;;  %v88_v30 = vld [vmem:[%s845_s1 + $0x90] sm:$0xff] }
   0x8   :  { %380 = vmatpush1.bf16.msra.mxu0 %v379_v6  ;;  %440 = vmatpush1.bf16.msra.mxu1 %v379_v6  ;;  %v400_v29 = vpack.c.bf16 %v87_v28, %v86_v27  ;;  %v89_v31 = vld [vmem:[%s845_s1 + $0x98] sm:$0xff]  ;;  %v90_v33 = vld [vmem:[%s845_s1 + $0xa0] sm:$0xff]  ;;  %v91_v34 = vld [vmem:[%s845_s1 + $0xa8] sm:$0xff] }
   0x9   :  { %381 = vmatprep.subr.bf16.mxu0 %v456_v0  ;;  %425 = vmatprep.subr.bf16.mxu1 %v456_v0  ;;  %v403_v32 = vpack.c.bf16 %v89_v31, %v88_v30  ;;  %v406_v35 = vpack.c.bf16 %v91_v34, %v90_v33  ;;  %v92_v36 = vld [vmem:[%s845_s1 + $0xb0] sm:$0xff]  ;;  %v93_v37 = vld [vmem:[%s845_s1 + $0xb8] sm:$0xff]  ;;  %v94_v39 = vld [vmem:[%s845_s1 + $0xc0] sm:$0xff] }
   0xa   :  { %v409_v38 = vpack.c.bf16 %v93_v37, %v92_v36  ;;  %v95_v40 = vld [vmem:[%s845_s1 + $0xc8] sm:$0xff]  ;;  %v96_v42 = vld [vmem:[%s845_s1 + $0xd0] sm:$0xff]  ;;  %v97_v43 = vld [vmem:[%s845_s1 + $0xd8] sm:$0xff] }
   0xb   :  { %v412_v41 = vpack.c.bf16 %v95_v40, %v94_v39  ;;  %v415_v44 = vpack.c.bf16 %v97_v43, %v96_v42  ;;  %v98_v45 = vld [vmem:[%s845_s1 + $0xe0] sm:$0xff]  ;;  %v99_v46 = vld [vmem:[%s845_s1 + $0xe8] sm:$0xff]  ;;  %v100_v48 = vld [vmem:[%s845_s1 + $0xf0] sm:$0xff] }
   0xc   :  { %383 = vmatpush1.bf16.msra.mxu0 %v382_v9  ;;  %441 = vmatpush1.bf16.msra.mxu1 %v382_v9  ;;  %v418_v47 = vpack.c.bf16 %v99_v46, %v98_v45  ;;  %v101_v49 = vld [vmem:[%s845_s1 + $0xf8] sm:$0xff]  ;;  %v14_v51 = vld [vmem:[%s846_s0] sm:$0xff]  ;;  %v16_v55 = vld [vmem:[%s846_s0 + $0x10] sm:$0xff] }
   0xd   :  { %384 = vmatprep.subr.bf16.mxu0 %v456_v0  ;;  %426 = vmatprep.subr.bf16.mxu1 %v456_v0  ;;  %v421_v50 = vpack.c.bf16 %v101_v49, %v100_v48  ;;  %v42_v52 = vld [vmem:[%s846_s0 + $0xe0] sm:$0xff]  ;;  %v17_v53 = vld [vmem:[%s846_s0 + $0x18] sm:$0xff]  ;;  %v44_v56 = vld [vmem:[%s846_s0 + $0xf0] sm:$0xff] }
   0xe   :  { %v45_v54 = vld [vmem:[%s846_s0 + $0xf8] sm:$0xff]  ;;  %v19_v57 = vld [vmem:[%s846_s0 + $0x28] sm:$0xff]  ;;  %v18_v59 = vld [vmem:[%s846_s0 + $0x20] sm:$0xff] }
   0xf   :  { %v47_v58 = vld [vmem:[%s846_s0 + $0x108] sm:$0xff]  ;;  %v46_v60 = vld [vmem:[%s846_s0 + $0x100] sm:$0xff]  ;;  %v21_v61 = vld [vmem:[%s846_s0 + $0x38] sm:$0xff] }
  0x10   :  { %386 = vmatpush1.bf16.msra.mxu0 %v385_v13  ;;  %442 = vmatpush1.bf16.msra.mxu1 %v385_v13  ;;  %v49_v62 = vld [vmem:[%s846_s0 + $0x118] sm:$0xff]  ;;  %v20_v63 = vld [vmem:[%s846_s0 + $0x30] sm:$0xff]  ;;  %v23_v1 = vld [vmem:[%s846_s0 + $0x48] sm:$0xff] }
  0x11   :  { %387 = vmatprep.subr.bf16.mxu0 %v456_v0  ;;  %427 = vmatprep.subr.bf16.mxu1 %v456_v0  ;;  %v51_v2 = vld [vmem:[%s846_s0 + $0x128] sm:$0xff]  ;;  %v22_v3 = vld [vmem:[%s846_s0 + $0x40] sm:$0xff]  ;;  %v25_v5 = vld [vmem:[%s846_s0 + $0x58] sm:$0xff] }
  0x12   :  { %v50_v4 = vld [vmem:[%s846_s0 + $0x120] sm:$0xff]  ;;  %v53_v6 = vld [vmem:[%s846_s0 + $0x138] sm:$0xff]  ;;  %v24_v7 = vld [vmem:[%s846_s0 + $0x50] sm:$0xff] }
  0x13   :  { %v52_v8 = vld [vmem:[%s846_s0 + $0x130] sm:$0xff]  ;;  %v27_v9 = vld [vmem:[%s846_s0 + $0x68] sm:$0xff]  ;;  %v26_v11 = vld [vmem:[%s846_s0 + $0x60] sm:$0xff] }
  0x14   :  { %389 = vmatpush1.bf16.msra.mxu0 %v388_v17  ;;  %443 = vmatpush1.bf16.msra.mxu1 %v388_v17  ;;  %v55_v10 = vld [vmem:[%s846_s0 + $0x148] sm:$0xff]  ;;  %v54_v12 = vld [vmem:[%s846_s0 + $0x140] sm:$0xff]  ;;  %v29_v13 = vld [vmem:[%s846_s0 + $0x78] sm:$0xff] }
  0x15   :  { %390 = vmatprep.subr.bf16.mxu0 %v456_v0  ;;  %428 = vmatprep.subr.bf16.mxu1 %v456_v0  ;;  %v57_v14 = vld [vmem:[%s846_s0 + $0x158] sm:$0xff]  ;;  %v28_v15 = vld [vmem:[%s846_s0 + $0x70] sm:$0xff]  ;;  %v31_v17 = vld [vmem:[%s846_s0 + $0x88] sm:$0xff] }
  0x16   :  { %v56_v16 = vld [vmem:[%s846_s0 + $0x150] sm:$0xff]  ;;  %v59_v18 = vld [vmem:[%s846_s0 + $0x168] sm:$0xff]  ;;  %v30_v19 = vld [vmem:[%s846_s0 + $0x80] sm:$0xff] }
  0x17   :  { %v33_v21 = vld [vmem:[%s846_s0 + $0x98] sm:$0xff]  ;;  %v60_v24 = vld [vmem:[%s846_s0 + $0x170] sm:$0xff]  ;;  %v35_v25 = vld [vmem:[%s846_s0 + $0xa8] sm:$0xff] }
  0x18   :  { %392 = vmatpush1.bf16.msra.mxu0 %v391_v20  ;;  %444 = vmatpush1.bf16.msra.mxu1 %v391_v20  ;;  %v58_v20 = vld [vmem:[%s846_s0 + $0x160] sm:$0xff]  ;;  %v61_v22 = vld [vmem:[%s846_s0 + $0x178] sm:$0xff]  ;;  %v36_v31 = vld [vmem:[%s846_s0 + $0xb0] sm:$0xff] }
  0x19   :  { %393 = vmatprep.subr.bf16.mxu0 %v456_v0  ;;  %429 = vmatprep.subr.bf16.mxu1 %v456_v0  ;;  %v34_v27 = vld [vmem:[%s846_s0 + $0xa0] sm:$0xff]  ;;  %v65_v30 = vld [vmem:[%s846_s0 + $0x198] sm:$0xff]  ;;  %v39_v33 = vld [vmem:[%s846_s0 + $0xc8] sm:$0xff] }
  0x1a   :  { %v62_v28 = vld [vmem:[%s846_s0 + $0x180] sm:$0xff]  ;;  %v67_v34 = vld [vmem:[%s846_s0 + $0x1a8] sm:$0xff]  ;;  %v41_v37 = vld [vmem:[%s846_s0 + $0xd8] sm:$0xff] }
  0x1b   :  { %v66_v36 = vld [vmem:[%s846_s0 + $0x1a0] sm:$0xff]  ;;  %v40_v39 = vld [vmem:[%s846_s0 + $0xd0] sm:$0xff] }
  0x1c   :  { %395 = vmatpush1.bf16.msra.mxu0 %v394_v23  ;;  %445 = vmatpush1.bf16.msra.mxu1 %v394_v23  ;;  %v32_v23 = vld [vmem:[%s846_s0 + $0x90] sm:$0xff] }
  0x1d   :  { %396 = vmatprep.subr.bf16.mxu0 %v456_v0  ;;  %430 = vmatprep.subr.bf16.mxu1 %v456_v0  ;;  %v68_v40 = vld [vmem:[%s846_s0 + $0x1b0] sm:$0xff] }
  0x20   :  { %398 = vmatpush1.bf16.msra.mxu0 %v397_v26  ;;  %446 = vmatpush1.bf16.msra.mxu1 %v397_v26  ;;  %v63_v26 = vld [vmem:[%s846_s0 + $0x188] sm:$0xff] }
  0x21   :  { %399 = vmatprep.subr.bf16.mxu0 %v456_v0  ;;  %431 = vmatprep.subr.bf16.mxu1 %v456_v0 }
  0x24   :  { %401 = vmatpush1.bf16.msra.mxu0 %v400_v29  ;;  %447 = vmatpush1.bf16.msra.mxu1 %v400_v29  ;;  %v37_v29 = vld [vmem:[%s846_s0 + $0xb8] sm:$0xff] }
  0x25   :  { %402 = vmatprep.subr.bf16.mxu0 %v456_v0  ;;  %432 = vmatprep.subr.bf16.mxu1 %v456_v0 }
  0x28   :  { %404 = vmatpush1.bf16.msra.mxu0 %v403_v32  ;;  %448 = vmatpush1.bf16.msra.mxu1 %v403_v32  ;;  %v64_v32 = vld [vmem:[%s846_s0 + $0x190] sm:$0xff] }
  0x29   :  { %405 = vmatprep.subr.bf16.mxu0 %v456_v0  ;;  %433 = vmatprep.subr.bf16.mxu1 %v456_v0 }
  0x2c   :  { %407 = vmatpush1.bf16.msra.mxu0 %v406_v35  ;;  %449 = vmatpush1.bf16.msra.mxu1 %v406_v35  ;;  %v38_v35 = vld [vmem:[%s846_s0 + $0xc0] sm:$0xff] }
  0x2d   :  { %408 = vmatprep.subr.bf16.mxu0 %v456_v0  ;;  %434 = vmatprep.subr.bf16.mxu1 %v456_v0 }
  0x30   :  { %410 = vmatpush1.bf16.msra.mxu0 %v409_v38  ;;  %450 = vmatpush1.bf16.msra.mxu1 %v409_v38  ;;  %v69_v38 = vld [vmem:[%s846_s0 + $0x1b8] sm:$0xff] }
  0x31   :  { %411 = vmatprep.subr.bf16.mxu0 %v456_v0  ;;  %435 = vmatprep.subr.bf16.mxu1 %v456_v0 }
  0x34   :  { %413 = vmatpush1.bf16.msra.mxu0 %v412_v41  ;;  %451 = vmatpush1.bf16.msra.mxu1 %v412_v41 }
  0x35   :  { %414 = vmatprep.subr.bf16.mxu0 %v456_v0  ;;  %436 = vmatprep.subr.bf16.mxu1 %v456_v0 }
  0x38   :  { %416 = vmatpush1.bf16.msra.mxu0 %v415_v44  ;;  %452 = vmatpush1.bf16.msra.mxu1 %v415_v44 }
  0x39   :  { %417 = vmatprep.subr.bf16.mxu0 %v456_v0  ;;  %437 = vmatprep.subr.bf16.mxu1 %v456_v0 }
  0x3c   :  { %419 = vmatpush1.bf16.msra.mxu0 %v418_v47  ;;  %453 = vmatpush1.bf16.msra.mxu1 %v418_v47 }
  0x3d   :  { %420 = vmatprep.subr.bf16.mxu0 %v456_v0  ;;  %438 = vmatprep.subr.bf16.mxu1 %v456_v0  ;;  %v48_v0 = vld [vmem:[%s846_s0 + $0x110] sm:$0xff] }
  0x40   :  { %422 = vmatpush1.bf16.msra.mxu0 %v421_v50  ;;  %454 = vmatpush1.bf16.msra.mxu1 %v421_v50 }
  0x43   :  { %174 = vmatmul.mubr.f32.vlgmr.msra.gmra.mrb[0].mxu0 %v14_v51  ;;  %244 = vmatmul.mubr.f32.vlgmr.msra.gmra.mrb[0].mxu1 %v42_v52 }
  0x44   :  { %178 = vmatprep.mubr.f32.mxu0 %v17_v53  ;;  %248 = vmatprep.mubr.f32.mxu1 %v45_v54 }
  0x47   :  { %179 = vmatmul.mubr.f32.gmra.mrb[2].mxu0 %v16_v55  ;;  %249 = vmatmul.mubr.f32.gmra.mrb[2].mxu1 %v44_v56 }
  0x48   :  { %183 = vmatprep.mubr.f32.mxu0 %v19_v57  ;;  %253 = vmatprep.mubr.f32.mxu1 %v47_v58 }
  0x4b   :  { %184 = vmatmul.mubr.f32.gmra.mrb[4].mxu0 %v18_v59  ;;  %254 = vmatmul.mubr.f32.gmra.mrb[4].mxu1 %v46_v60 }
  0x4c   :  { %188 = vmatprep.mubr.f32.mxu0 %v21_v61  ;;  %258 = vmatprep.mubr.f32.mxu1 %v49_v62 }
  0x4f   :  { %189 = vmatmul.mubr.f32.gmra.mrb[6].mxu0 %v20_v63  ;;  %259 = vmatmul.mubr.f32.gmra.mrb[6].mxu1 %v48_v0 }
  0x50   :  { %193 = vmatprep.mubr.f32.mxu0 %v23_v1  ;;  %263 = vmatprep.mubr.f32.mxu1 %v51_v2  ;;  %v784_v1 = vld [vmem:[%s847_s2] ss:$0 sm:$0xff] }
  0x53   :  { %194 = vmatmul.mubr.f32.gmra.mrb[8].mxu0 %v22_v3  ;;  %264 = vmatmul.mubr.f32.gmra.mrb[8].mxu1 %v50_v4 }
  0x54   :  { %198 = vmatprep.mubr.f32.mxu0 %v25_v5  ;;  %268 = vmatprep.mubr.f32.mxu1 %v53_v6 }
  0x57   :  { %199 = vmatmul.mubr.f32.gmra.mrb[10].mxu0 %v24_v7  ;;  %269 = vmatmul.mubr.f32.gmra.mrb[10].mxu1 %v52_v8 }
  0x58   :  { %203 = vmatprep.mubr.f32.mxu0 %v27_v9  ;;  %273 = vmatprep.mubr.f32.mxu1 %v55_v10 }
  0x5b   :  { %204 = vmatmul.mubr.f32.gmra.mrb[12].mxu0 %v26_v11  ;;  %274 = vmatmul.mubr.f32.gmra.mrb[12].mxu1 %v54_v12 }
  0x5c   :  { %208 = vmatprep.mubr.f32.mxu0 %v29_v13  ;;  %278 = vmatprep.mubr.f32.mxu1 %v57_v14 }
  0x5f   :  { %209 = vmatmul.mubr.f32.gmra.mrb[14].mxu0 %v28_v15  ;;  %279 = vmatmul.mubr.f32.gmra.mrb[14].mxu1 %v56_v16 }
  0x60   :  { %213 = vmatprep.mubr.f32.mxu0 %v31_v17  ;;  %283 = vmatprep.mubr.f32.mxu1 %v59_v18 }
  0x63   :  { %214 = vmatmul.mubr.f32.gmra.mrb[16].mxu0 %v30_v19  ;;  %284 = vmatmul.mubr.f32.gmra.mrb[16].mxu1 %v58_v20 }
  0x64   :  { %218 = vmatprep.mubr.f32.mxu0 %v33_v21  ;;  %288 = vmatprep.mubr.f32.mxu1 %v61_v22 }
  0x67   :  { %219 = vmatmul.mubr.f32.gmra.mrb[18].mxu0 %v32_v23  ;;  %289 = vmatmul.mubr.f32.gmra.mrb[18].mxu1 %v60_v24 }
  0x68   :  { %223 = vmatprep.mubr.f32.mxu0 %v35_v25  ;;  %293 = vmatprep.mubr.f32.mxu1 %v63_v26 }
  0x6b   :  { %224 = vmatmul.mubr.f32.gmra.mrb[20].mxu0 %v34_v27  ;;  %294 = vmatmul.mubr.f32.gmra.mrb[20].mxu1 %v62_v28 }
  0x6c   :  { %228 = vmatprep.mubr.f32.mxu0 %v37_v29  ;;  %298 = vmatprep.mubr.f32.mxu1 %v65_v30 }
  0x6f   :  { %229 = vmatmul.mubr.f32.gmra.mrb[22].mxu0 %v36_v31  ;;  %299 = vmatmul.mubr.f32.gmra.mrb[22].mxu1 %v64_v32 }
  0x70   :  { %233 = vmatprep.mubr.f32.mxu0 %v39_v33  ;;  %303 = vmatprep.mubr.f32.mxu1 %v67_v34 }
  0x73   :  { %234 = vmatmul.mubr.f32.gmra.mrb[24].mxu0 %v38_v35  ;;  %304 = vmatmul.mubr.f32.gmra.mrb[24].mxu1 %v66_v36 }
  0x74   :  { %238 = vmatprep.mubr.f32.mxu0 %v41_v37  ;;  %308 = vmatprep.mubr.f32.mxu1 %v69_v38 }
  0x77   :  { %239 = vmatmul.mubr.f32.gmra.mrb[26].mxu0 %v40_v39  ;;  %309 = vmatmul.mubr.f32.gmra.mrb[26].mxu1 %v68_v40 }
 0x116   :  { %v175_v41 = vpop.f32.mrb[0].mxu0  ;;  %v245_v42 = vpop.f32.mrb[0].mxu1 }
 0x117   :  { %v177_v43 = vpop.f32.mrb[1].mxu0  ;;  %v247_v44 = vpop.f32.mrb[1].mxu1  ;;  %v176_v6 = vadd.f32 %v784_v1, %v175_v41  ;;  %v246_v7 = vadd.f32 %v784_v1, %v245_v42 }
 0x119   :  { %v314_v16 = vmax.f32 %v176_v6, 0.0  ;;  %v328_v17 = vmax.f32 %v246_v7, 0.0 }
 0x11a   :  { %v180_v45 = vpop.f32.mrb[2].mxu0  ;;  %v250_v46 = vpop.f32.mrb[2].mxu1 }
 0x11b   :  { %v182_v47 = vpop.f32.mrb[3].mxu0  ;;  %v252_v48 = vpop.f32.mrb[3].mxu1  ;;  %v181_v14 = vadd.f32 %v784_v1, %v180_v45  ;;  %v251_v15 = vadd.f32 %v784_v1, %v250_v46 }
 0x11d   :  { %v315_v28 = vmax.f32 %v181_v14, 0.0  ;;  %v329_v29 = vmax.f32 %v251_v15, 0.0 }
 0x11e   :  { %v185_v49 = vpop.f32.mrb[4].mxu0  ;;  %v255_v50 = vpop.f32.mrb[4].mxu1 }
 0x11f   :  { %v187_v51 = vpop.f32.mrb[5].mxu0  ;;  %v257_v52 = vpop.f32.mrb[5].mxu1  ;;  %v186_v30 = vadd.f32 %v784_v1, %v185_v49  ;;  %v256_v31 = vadd.f32 %v784_v1, %v255_v50 }
 0x121   :  { %v316_v43 = vmax.f32 %v186_v30, 0.0  ;;  %v330_v46 = vmax.f32 %v256_v31, 0.0 }
 0x122   :  { %v190_v53 = vpop.f32.mrb[6].mxu0  ;;  %v260_v54 = vpop.f32.mrb[6].mxu1 }
 0x123   :  { %v192_v55 = vpop.f32.mrb[7].mxu0  ;;  %v262_v56 = vpop.f32.mrb[7].mxu1  ;;  %v191_v44 = vadd.f32 %v784_v1, %v190_v53  ;;  %v261_v45 = vadd.f32 %v784_v1, %v260_v54 }
 0x125   :  { %v331_v54 = vmax.f32 %v261_v45, 0.0 }
 0x126   :  { %v773_v57 = vpop.f32.mrb[8].mxu0  ;;  %v775_v58 = vpop.f32.mrb[8].mxu1 }
 0x127   :  { %v197_v59 = vpop.f32.mrb[9].mxu0  ;;  %v267_v60 = vpop.f32.mrb[9].mxu1 }
 0x12a   :  { %v777_v61 = vpop.f32.mrb[10].mxu0  ;;  %v779_v62 = vpop.f32.mrb[10].mxu1 }
 0x12b   :  { %v202_v63 = vpop.f32.mrb[11].mxu0  ;;  %v272_v0 = vpop.f32.mrb[11].mxu1 }
 0x12c   :  { %v317_v63 = vmax.f32 %v191_v44, 0.0  ;;  %v196_v0 = vadd.f32 %v784_v1, %v773_v57 }
 0x12e   :  { %v786_v2 = vpop.f32.mrb[12].mxu0  ;;  %v788_v3 = vpop.f32.mrb[12].mxu1  ;;  %v318_v15 = vmax.f32 %v196_v0, 0.0 }
 0x12f   :  { %v207_v4 = vpop.f32.mrb[13].mxu0  ;;  %v277_v5 = vpop.f32.mrb[13].mxu1  ;;  %v276_v30 = vadd.f32 %v784_v1, %v788_v3 }
 0x130   :  { %v266_v4 = vadd.f32 %v784_v1, %v775_v58  ;;  %v201_v58 = vadd.f32 %v784_v1, %v777_v61 }
 0x132   :  { %v210_v8 = vpop.f32.mrb[14].mxu0  ;;  %v280_v9 = vpop.f32.mrb[14].mxu1 }
 0x133   :  { %v211_v10 = vadd.f32 %v784_v1, %v210_v8  ;;  %v281_v11 = vadd.f32 %v784_v1, %v280_v9  ;;  %v212_v12 = vpop.f32.mrb[15].mxu0  ;;  %v282_v13 = vpop.f32.mrb[15].mxu1 }
 0x135   :  { %v321_v18 = vmax.f32 %v211_v10, 0.0  ;;  %v335_v19 = vmax.f32 %v281_v11, 0.0 }
 0x136   :  { %v215_v20 = vpop.f32.mrb[16].mxu0  ;;  %v285_v21 = vpop.f32.mrb[16].mxu1 }
 0x137   :  { %v342_v22 = vmax.f32 %v314_v16, %v321_v18  ;;  %v349_v23 = vmax.f32 %v328_v17, %v335_v19  ;;  %v216_v24 = vadd.f32 %v784_v1, %v215_v20  ;;  %v286_v25 = vadd.f32 %v784_v1, %v285_v21  ;;  %v217_v26 = vpop.f32.mrb[17].mxu0  ;;  %v287_v27 = vpop.f32.mrb[17].mxu1 }
 0x138   :  { %v271_v16 = vadd.f32 %v784_v1, %v779_v62  ;;  %v332_v17 = vmax.f32 %v266_v4, 0.0 }
 0x139   :  { %v356_v32 = vmax.f32 %v342_v22, %v349_v23  ;;  %v322_v33 = vmax.f32 %v216_v24, 0.0  ;;  %v336_v34 = vmax.f32 %v286_v25, 0.0 }
 0x13a   :  { %v220_v35 = vpop.f32.mrb[18].mxu0  ;;  %v290_v36 = vpop.f32.mrb[18].mxu1  ;;  %v333_v62 = vmax.f32 %v271_v16, 0.0 }
 0x13b   :  { %363 = vst [vmem:[%s848_s3] sm:$0xff] %v356_v32  ;;  %v343_v37 = vmax.f32 %v315_v28, %v322_v33  ;;  %v350_v38 = vmax.f32 %v329_v29, %v336_v34  ;;  %v221_v39 = vadd.f32 %v784_v1, %v220_v35  ;;  %v291_v40 = vadd.f32 %v784_v1, %v290_v36  ;;  %v222_v41 = vpop.f32.mrb[19].mxu0  ;;  %v292_v42 = vpop.f32.mrb[19].mxu1 }
 0x13c   :  { %v319_v28 = vmax.f32 %v201_v58, 0.0  ;;  %v206_v29 = vadd.f32 %v784_v1, %v786_v2  ;;  %v334_v42 = vmax.f32 %v276_v30, 0.0 }
 0x13d   :  { %v357_v47 = vmax.f32 %v343_v37, %v350_v38  ;;  %v323_v48 = vmax.f32 %v221_v39, 0.0  ;;  %v337_v49 = vmax.f32 %v291_v40, 0.0 }
 0x13e   :  { %v225_v50 = vpop.f32.mrb[20].mxu0  ;;  %v295_v51 = vpop.f32.mrb[20].mxu1  ;;  %v320_v41 = vmax.f32 %v206_v29, 0.0 }
 0x13f   :  { %364 = vst [vmem:[%s848_s3 + $0x8] sm:$0xff] %v357_v47  ;;  %v344_v52 = vmax.f32 %v316_v43, %v323_v48  ;;  %v351_v55 = vmax.f32 %v330_v46, %v337_v49  ;;  %v226_v56 = vadd.f32 %v784_v1, %v225_v50  ;;  %v296_v59 = vadd.f32 %v784_v1, %v295_v51  ;;  %v227_v60 = vpop.f32.mrb[21].mxu0  ;;  %v297_v53 = vpop.f32.mrb[21].mxu1 }
 0x141   :  { %v358_v5 = vmax.f32 %v344_v52, %v351_v55  ;;  %v324_v6 = vmax.f32 %v226_v56, 0.0  ;;  %v338_v7 = vmax.f32 %v296_v59, 0.0 }
 0x142   :  { %v230_v8 = vpop.f32.mrb[22].mxu0  ;;  %v300_v9 = vpop.f32.mrb[22].mxu1 }
 0x143   :  { %365 = vst [vmem:[%s848_s3 + $0x10] sm:$0xff] %v358_v5  ;;  %v345_v10 = vmax.f32 %v317_v63, %v324_v6  ;;  %v352_v11 = vmax.f32 %v331_v54, %v338_v7  ;;  %v231_v12 = vadd.f32 %v784_v1, %v230_v8  ;;  %v301_v13 = vadd.f32 %v784_v1, %v300_v9  ;;  %v232_v14 = vpop.f32.mrb[23].mxu0  ;;  %v302_v57 = vpop.f32.mrb[23].mxu1 }
 0x145   :  { %v359_v18 = vmax.f32 %v345_v10, %v352_v11  ;;  %v325_v19 = vmax.f32 %v231_v12, 0.0  ;;  %v339_v20 = vmax.f32 %v301_v13, 0.0 }
 0x146   :  { %v235_v21 = vpop.f32.mrb[24].mxu0  ;;  %v305_v22 = vpop.f32.mrb[24].mxu1 }
 0x147   :  { %366 = vst [vmem:[%s848_s3 + $0x18] sm:$0xff] %v359_v18  ;;  %v346_v23 = vmax.f32 %v318_v15, %v325_v19  ;;  %v353_v24 = vmax.f32 %v332_v17, %v339_v20  ;;  %v236_v25 = vadd.f32 %v784_v1, %v235_v21  ;;  %v306_v26 = vadd.f32 %v784_v1, %v305_v22  ;;  %v237_v61 = vpop.f32.mrb[25].mxu0  ;;  %v307_v27 = vpop.f32.mrb[25].mxu1 }
 0x149   :  { %v360_v31 = vmax.f32 %v346_v23, %v353_v24  ;;  %v326_v32 = vmax.f32 %v236_v25, 0.0  ;;  %v340_v33 = vmax.f32 %v306_v26, 0.0 }
 0x14a   :  { %v240_v34 = vpop.f32.mrb[26].mxu0  ;;  %v310_v35 = vpop.f32.mrb[26].mxu1 }
 0x14b   :  { %367 = vst [vmem:[%s848_s3 + $0x20] sm:$0xff] %v360_v31  ;;  %v347_v36 = vmax.f32 %v319_v28, %v326_v32  ;;  %v354_v37 = vmax.f32 %v333_v62, %v340_v33  ;;  %v241_v38 = vadd.f32 %v784_v1, %v240_v34  ;;  %v311_v39 = vadd.f32 %v784_v1, %v310_v35  ;;  %v242_v40 = vpop.f32.mrb[27].mxu0  ;;  %v312_v2 = vpop.f32.mrb[27].mxu1 }
 0x14d   :  { %v361_v3 = vmax.f32 %v347_v36, %v354_v37  ;;  %v327_v43 = vmax.f32 %v241_v38, 0.0  ;;  %v341_v44 = vmax.f32 %v311_v39, 0.0 }
 0x14f   :  { %368 = vst [vmem:[%s848_s3 + $0x28] sm:$0xff] %v361_v3  ;;  %v348_v45 = vmax.f32 %v320_v41, %v327_v43  ;;  %v355_v46 = vmax.f32 %v334_v42, %v341_v44 }
 0x151   :  { %v362_v47 = vmax.f32 %v348_v45, %v355_v46 }
 0x153   :  { %369 = vst [vmem:[%s848_s3 + $0x30] sm:$0xff] %v362_v47 }

// kernel: hdr_m_forward.5
= control target key start
LH: loop header
LB: loop body
LE: loop exit
PB: predicated region body
PF: predicated region fallthrough
CT: control target
= control target key end

     0   :  { %v801_v47 = vmov 1983009808   ;;  %v104_v49 = vlaneseq  ;;  %s1176_s0 = inlined_call_operand.vmem [shape: f32[2,512], index: 0, kind: input, shape index: {}]   ;;  %s1177_s1 = inlined_call_operand.vmem [shape: f32[512,128], index: 1, kind: input, shape index: {}]   ;;  %s1178_s2 = inlined_call_operand.vmem [shape: f32[1,128], index: 2, kind: input, shape index: {}]   ;;  %s1179_s3 = inlined_call_operand.vmem [shape: f32[128,128], index: 3, kind: input, shape index: {}]   ;;  %s1180_s4 = inlined_call_operand.vmem [shape: f32[1,128], index: 4, kind: input, shape index: {}]   ;;  %s1181_s5 = inlined_call_operand.vmem [shape: f32[128,128], index: 5, kind: input, shape index: {}]   ;;  %s1182_s6 = inlined_call_operand.vmem [shape: f32[1,128], index: 6, kind: input, shape index: {}]   ;;  %s1183_s7 = inlined_call_operand.hbm [shape: f32[2,128], index: 7, kind: output, shape index: {}]  }
   0x1   :  { %v44_v0 = vld [vmem:[%s1177_s1 + $0x80] sm:$0xff]  ;;  %v45_v1 = vld [vmem:[%s1177_s1 + $0x88] sm:$0xff]  ;;  %v46_v11 = vld [vmem:[%s1177_s1 + $0x90] sm:$0xff]  ;;  %v102_v48 = vunpack.c.l.s4 %v801_v47 }
   0x2   :  { %v28_v2 = vld [vmem:[%s1177_s1] sm:$0xff]  ;;  %v655_v3 = vpack.c.bf16 %v45_v1, %v44_v0  ;;  %v29_v4 = vld [vmem:[%s1177_s1 + $0x8] sm:$0xff]  ;;  %v47_v13 = vld [vmem:[%s1177_s1 + $0x98] sm:$0xff]  ;;  %v105_v0 = vshrl.u32 %v104_v49, 7 }
   0x3   :  { %v76_v5 = vld [vmem:[%s1177_s1 + $0x180] sm:$0xff]  ;;  %v77_v6 = vld [vmem:[%s1177_s1 + $0x188] sm:$0xff]  ;;  %v657_v7 = vpack.c.bf16 %v29_v4, %v28_v2  ;;  %v30_v14 = vld [vmem:[%s1177_s1 + $0x10] sm:$0xff]  ;;  %v659_v16 = vpack.c.bf16 %v47_v13, %v46_v11  ;;  %v103_v63 = vunpack.c.0.s8 %v102_v48 }
   0x4   :  { %v687_v8 = vpack.c.bf16 %v77_v6, %v76_v5  ;;  %v60_v9 = vld [vmem:[%s1177_s1 + $0x100] sm:$0xff]  ;;  %v61_v10 = vld [vmem:[%s1177_s1 + $0x108] sm:$0xff]  ;;  %656 = vmatprep.subr.bf16.mxu0 %v655_v3  ;;  %v31_v15 = vld [vmem:[%s1177_s1 + $0x18] sm:$0xff] }
   0x5   :  { %v689_v12 = vpack.c.bf16 %v61_v10, %v60_v9  ;;  %658 = vmatpush3.bf16.msra.mxu0 %v657_v7  ;;  %v661_v17 = vpack.c.bf16 %v31_v15, %v30_v14  ;;  %v78_v18 = vld [vmem:[%s1177_s1 + $0x190] sm:$0xff]  ;;  %v79_v19 = vld [vmem:[%s1177_s1 + $0x198] sm:$0xff]  ;;  %v48_v23 = vld [vmem:[%s1177_s1 + $0xa0] sm:$0xff]  ;;  %v106_v13 = vsub.s32 %v103_v63, %v105_v0 }
   0x6   :  { %688 = vmatprep.subr.bf16.mxu1 %v687_v8  ;;  %v62_v20 = vld [vmem:[%s1177_s1 + $0x110] sm:$0xff]  ;;  %v691_v21 = vpack.c.bf16 %v79_v19, %v78_v18  ;;  %v63_v22 = vld [vmem:[%s1177_s1 + $0x118] sm:$0xff]  ;;  %v49_v24 = vld [vmem:[%s1177_s1 + $0xa8] sm:$0xff]  ;;  %660 = vmatprep.subr.bf16.mxu0 %v659_v16 }
   0x7   :  { %690 = vmatpush3.bf16.msra.mxu1 %v689_v12  ;;  %v693_v25 = vpack.c.bf16 %v63_v22, %v62_v20  ;;  %v663_v26 = vpack.c.bf16 %v49_v24, %v48_v23  ;;  %v32_v27 = vld [vmem:[%s1177_s1 + $0x20] sm:$0xff]  ;;  %v33_v28 = vld [vmem:[%s1177_s1 + $0x28] sm:$0xff]  ;;  %v50_v35 = vld [vmem:[%s1177_s1 + $0xb0] sm:$0xff] }
   0x8   :  { %v80_v29 = vld [vmem:[%s1177_s1 + $0x1a0] sm:$0xff]  ;;  %692 = vmatprep.subr.bf16.mxu1 %v691_v21  ;;  %v81_v30 = vld [vmem:[%s1177_s1 + $0x1a8] sm:$0xff]  ;;  %v665_v33 = vpack.c.bf16 %v33_v28, %v32_v27  ;;  %v51_v36 = vld [vmem:[%s1177_s1 + $0xb8] sm:$0xff] }
   0x9   :  { %v64_v31 = vld [vmem:[%s1177_s1 + $0x120] sm:$0xff]  ;;  %v65_v32 = vld [vmem:[%s1177_s1 + $0x128] sm:$0xff]  ;;  %662 = vmatpush3.bf16.msra.mxu0 %v661_v17  ;;  %v695_v34 = vpack.c.bf16 %v81_v30, %v80_v29  ;;  %v34_v37 = vld [vmem:[%s1177_s1 + $0x30] sm:$0xff]  ;;  %v667_v39 = vpack.c.bf16 %v51_v36, %v50_v35 }
   0xa   :  { %664 = vmatprep.subr.bf16.mxu0 %v663_v26  ;;  %v697_v38 = vpack.c.bf16 %v65_v32, %v64_v31  ;;  %v35_v40 = vld [vmem:[%s1177_s1 + $0x38] sm:$0xff]  ;;  %v82_v41 = vld [vmem:[%s1177_s1 + $0x1b0] sm:$0xff]  ;;  %v52_v46 = vld [vmem:[%s1177_s1 + $0xc0] sm:$0xff] }
   0xb   :  { %694 = vmatpush3.bf16.msra.mxu1 %v693_v25  ;;  %v83_v42 = vld [vmem:[%s1177_s1 + $0x1b8] sm:$0xff]  ;;  %v66_v44 = vld [vmem:[%s1177_s1 + $0x130] sm:$0xff]  ;;  %v53_v50 = vld [vmem:[%s1177_s1 + $0xc8] sm:$0xff]  ;;  %v669_v51 = vpack.c.bf16 %v35_v40, %v34_v37 }
   0xc   :  { %696 = vmatprep.subr.bf16.mxu1 %v695_v34  ;;  %v699_v43 = vpack.c.bf16 %v83_v42, %v82_v41  ;;  %v67_v45 = vld [vmem:[%s1177_s1 + $0x138] sm:$0xff]  ;;  %v84_v52 = vld [vmem:[%s1177_s1 + $0x1c0] sm:$0xff]  ;;  %v85_v53 = vld [vmem:[%s1177_s1 + $0x1c8] sm:$0xff]  ;;  %v671_v55 = vpack.c.bf16 %v53_v50, %v52_v46 }
   0xd   :  { %666 = vmatpush3.bf16.msra.mxu0 %v665_v33  ;;  %v701_v54 = vpack.c.bf16 %v67_v45, %v66_v44  ;;  %v36_v56 = vld [vmem:[%s1177_s1 + $0x40] sm:$0xff]  ;;  %v37_v57 = vld [vmem:[%s1177_s1 + $0x48] sm:$0xff]  ;;  %v703_v59 = vpack.c.bf16 %v85_v53, %v84_v52  ;;  %v54_v61 = vld [vmem:[%s1177_s1 + $0xd0] sm:$0xff] }
   0xe   :  { %668 = vmatprep.subr.bf16.mxu0 %v667_v39  ;;  %v68_v58 = vld [vmem:[%s1177_s1 + $0x140] sm:$0xff]  ;;  %v69_v60 = vld [vmem:[%s1177_s1 + $0x148] sm:$0xff]  ;;  %v55_v62 = vld [vmem:[%s1177_s1 + $0xd8] sm:$0xff]  ;;  %v673_v3 = vpack.c.bf16 %v37_v57, %v36_v56 }
   0xf   :  { %698 = vmatpush3.bf16.msra.mxu1 %v697_v38  ;;  %v86_v1 = vld [vmem:[%s1177_s1 + $0x1d0] sm:$0xff]  ;;  %v87_v2 = vld [vmem:[%s1177_s1 + $0x1d8] sm:$0xff]  ;;  %v705_v4 = vpack.c.bf16 %v69_v60, %v68_v58  ;;  %v675_v5 = vpack.c.bf16 %v55_v62, %v54_v61  ;;  %v56_v11 = vld [vmem:[%s1177_s1 + $0xe0] sm:$0xff] }
  0x10   :  { %700 = vmatprep.subr.bf16.mxu1 %v699_v43  ;;  %v38_v6 = vld [vmem:[%s1177_s1 + $0x50] sm:$0xff]  ;;  %v39_v7 = vld [vmem:[%s1177_s1 + $0x58] sm:$0xff]  ;;  %v707_v9 = vpack.c.bf16 %v87_v2, %v86_v1  ;;  %v57_v12 = vld [vmem:[%s1177_s1 + $0xe8] sm:$0xff] }
  0x11   :  { %670 = vmatpush3.bf16.msra.mxu0 %v669_v51  ;;  %v70_v8 = vld [vmem:[%s1177_s1 + $0x150] sm:$0xff]  ;;  %v71_v10 = vld [vmem:[%s1177_s1 + $0x158] sm:$0xff]  ;;  %v88_v14 = vld [vmem:[%s1177_s1 + $0x1e0] sm:$0xff]  ;;  %v677_v16 = vpack.c.bf16 %v39_v7, %v38_v6  ;;  %v679_v19 = vpack.c.bf16 %v57_v12, %v56_v11 }
  0x12   :  { %672 = vmatprep.subr.bf16.mxu0 %v671_v55  ;;  %v89_v15 = vld [vmem:[%s1177_s1 + $0x1e8] sm:$0xff]  ;;  %v40_v17 = vld [vmem:[%s1177_s1 + $0x60] sm:$0xff]  ;;  %v709_v18 = vpack.c.bf16 %v71_v10, %v70_v8  ;;  %v58_v25 = vld [vmem:[%s1177_s1 + $0xf0] sm:$0xff] }
  0x13   :  { %702 = vmatpush3.bf16.msra.mxu1 %v701_v54  ;;  %v41_v20 = vld [vmem:[%s1177_s1 + $0x68] sm:$0xff]  ;;  %v72_v21 = vld [vmem:[%s1177_s1 + $0x160] sm:$0xff]  ;;  %v711_v23 = vpack.c.bf16 %v89_v15, %v88_v14  ;;  %v59_v26 = vld [vmem:[%s1177_s1 + $0xf8] sm:$0xff] }
  0x14   :  { %704 = vmatprep.subr.bf16.mxu1 %v703_v59  ;;  %v27_v22 = vld [vmem:[%s1176_s0] sm:$0xff]  ;;  %v73_v24 = vld [vmem:[%s1177_s1 + $0x168] sm:$0xff]  ;;  %v90_v29 = vld [vmem:[%s1177_s1 + $0x1f0] sm:$0xff]  ;;  %v681_v31 = vpack.c.bf16 %v41_v20, %v40_v17  ;;  %v683_v35 = vpack.c.bf16 %v59_v26, %v58_v25 }
  0x15   :  { %674 = vmatpush3.bf16.msra.mxu0 %v673_v3  ;;  %v107_v27 = vrot.slane %v27_v22, %v106_v13  ;;  %v100_v28 = vcombine.high %v27_v22, %v27_v22  ;;  %v91_v30 = vld [vmem:[%s1177_s1 + $0x1f8] sm:$0xff]  ;;  %v713_v34 = vpack.c.bf16 %v73_v24, %v72_v21  ;;  %v42_v36 = vld [vmem:[%s1177_s1 + $0x70] sm:$0xff] }
  0x16   :  { %676 = vmatprep.subr.bf16.mxu0 %v675_v5  ;;  %v43_v37 = vld [vmem:[%s1177_s1 + $0x78] sm:$0xff] }
  0x17   :  { %706 = vmatpush3.bf16.msra.mxu1 %v705_v4  ;;  %v115_v32 = vcombine.high %v107_v27, %v107_v27  ;;  %v114_v33 = vrot.slane %v100_v28, %v106_v13 }
  0x18   :  { %708 = vmatprep.subr.bf16.mxu1 %v707_v9 }
  0x19   :  { %678 = vmatpush3.bf16.msra.mxu0 %v677_v16 }
  0x1a   :  { %680 = vmatprep.subr.bf16.mxu0 %v679_v19 }
  0x1b   :  { %710 = vmatpush3.bf16.msra.mxu1 %v709_v18 }
  0x1c   :  { %12 = vsyncpa [#allocation3], 0  ;;  %712 = vmatprep.subr.bf16.mxu1 %v711_v23  ;;  %v715_v38 = vpack.c.bf16 %v91_v30, %v90_v29  ;;  %v74_v39 = vld [vmem:[%s1177_s1 + $0x170] sm:$0xff]  ;;  %v75_v40 = vld [vmem:[%s1177_s1 + $0x178] sm:$0xff]  ;;  %185 = vmatprep.mubr.f32.mxu0 %v115_v32  ;;  %v116_v41 = vcombine.high %v114_v33, %v114_v33  ;;  %v685_v42 = vpack.c.bf16 %v43_v37, %v42_v36  ;;  %v802_v47 = vmov 0.0|0.0  }
  0x1d   :  { %682 = vmatpush3.bf16.msra.mxu0 %v681_v31  ;;  %v717_v43 = vpack.c.bf16 %v75_v40, %v74_v39  ;;  %v261_v44 = vld [vmem:[%s1179_s3] sm:$0xff]  ;;  %v262_v45 = vld [vmem:[%s1179_s3 + $0x8] sm:$0xff]  ;;  %v263_v48 = vld [vmem:[%s1179_s3 + $0x10] sm:$0xff]  ;;  %vm803_vm0 = vmmov 0   ;;  %v804_v6 = vmov 0.0   ;;  %vm451_vm2 = vcmask 1041408  }
  0x1e   :  { %255 = vmatprep.mubr.f32.mxu1 %v116_v41  ;;  %684 = vmatprep.subr.bf16.mxu0 %v683_v35  ;;  %v720_v46 = vpack.c.bf16 %v262_v45, %v261_v44  ;;  %v264_v50 = vld [vmem:[%s1179_s3 + $0x18] sm:$0xff]  ;;  %v265_v52 = vld [vmem:[%s1179_s3 + $0x20] sm:$0xff]  ;;  %v266_v53 = vld [vmem:[%s1179_s3 + $0x28] sm:$0xff]  ;;  %v448_v44 = vand.u32 127, %v104_v49 }
  0x1f   :  { %714 = vmatpush3.bf16.msra.mxu1 %v713_v34  ;;  %v723_v51 = vpack.c.bf16 %v264_v50, %v263_v48  ;;  %v726_v54 = vpack.c.bf16 %v266_v53, %v265_v52  ;;  %v267_v55 = vld [vmem:[%s1179_s3 + $0x30] sm:$0xff]  ;;  %v268_v56 = vld [vmem:[%s1179_s3 + $0x38] sm:$0xff]  ;;  %v269_v58 = vld [vmem:[%s1179_s3 + $0x40] sm:$0xff] }
  0x20   :  { %716 = vmatprep.subr.bf16.mxu1 %v715_v38  ;;  %v729_v57 = vpack.c.bf16 %v268_v56, %v267_v55  ;;  %v270_v59 = vld [vmem:[%s1179_s3 + $0x48] sm:$0xff]  ;;  %v271_v61 = vld [vmem:[%s1179_s3 + $0x50] sm:$0xff]  ;;  %v272_v62 = vld [vmem:[%s1179_s3 + $0x58] sm:$0xff]  ;;  %vm449_vm1 = vcmp.lt.s32.totalorder %v448_v44, 10 }
  0x21   :  { %686 = vmatpush3.bf16.msra.mxu0 %v685_v42  ;;  %v732_v60 = vpack.c.bf16 %v270_v59, %v269_v58  ;;  %v735_v63 = vpack.c.bf16 %v272_v62, %v271_v61  ;;  %v273_v0 = vld [vmem:[%s1179_s3 + $0x60] sm:$0xff]  ;;  %v274_v1 = vld [vmem:[%s1179_s3 + $0x68] sm:$0xff]  ;;  %v275_v3 = vld [vmem:[%s1179_s3 + $0x70] sm:$0xff] }
  0x22   :  { %719 = vmatprep.subr.bf16.mxu0 %v802_v47  ;;  %v738_v2 = vpack.c.bf16 %v274_v1, %v273_v0  ;;  %v276_v4 = vld [vmem:[%s1179_s3 + $0x78] sm:$0xff]  ;;  %v354_v7 = vld [vmem:[%s1181_s5] sm:$0xff]  ;;  %v355_v8 = vld [vmem:[%s1181_s5 + $0x8] sm:$0xff] }
  0x23   :  { %718 = vmatpush3.bf16.msra.mxu1 %v717_v43  ;;  %v741_v5 = vpack.c.bf16 %v276_v4, %v275_v3  ;;  %v356_v9 = vld [vmem:[%s1181_s5 + $0x10] sm:$0xff]  ;;  %v744_v10 = vpack.c.bf16 %v355_v8, %v354_v7  ;;  %v357_v11 = vld [vmem:[%s1181_s5 + $0x18] sm:$0xff]  ;;  %v358_v13 = vld [vmem:[%s1181_s5 + $0x20] sm:$0xff] }
  0x24   :  { %743 = vmatprep.subr.bf16.mxu1 %v802_v47  ;;  %186 = vmatmul.mubr.f32.vlgmr.msra.gmra.mrb[0].mxu0 %v107_v27  ;;  %v747_v12 = vpack.c.bf16 %v357_v11, %v356_v9  ;;  %v359_v14 = vld [vmem:[%s1181_s5 + $0x28] sm:$0xff]  ;;  %v360_v16 = vld [vmem:[%s1181_s5 + $0x30] sm:$0xff]  ;;  %v361_v17 = vld [vmem:[%s1181_s5 + $0x38] sm:$0xff] }
  0x25   :  { %721 = vmatpush3.bf16.msra.mxu0 %v720_v46  ;;  %617 = vmatprep.mubr.msk.f32.mxu0 %vm803_vm0, %v804_v6  ;;  %v750_v15 = vpack.c.bf16 %v359_v14, %v358_v13  ;;  %v753_v18 = vpack.c.bf16 %v361_v17, %v360_v16  ;;  %v362_v19 = vld [vmem:[%s1181_s5 + $0x40] sm:$0xff]  ;;  %v363_v20 = vld [vmem:[%s1181_s5 + $0x48] sm:$0xff]  ;;  %v364_v22 = vld [vmem:[%s1181_s5 + $0x50] sm:$0xff] }
  0x26   :  { %256 = vmatmul.mubr.f32.vlgmr.msra.gmra.mrb[0].mxu1 %v114_v33  ;;  %722 = vmatprep.subr.bf16.mxu0 %v802_v47  ;;  %v756_v21 = vpack.c.bf16 %v363_v20, %v362_v19  ;;  %v365_v23 = vld [vmem:[%s1181_s5 + $0x58] sm:$0xff]  ;;  %v366_v25 = vld [vmem:[%s1181_s5 + $0x60] sm:$0xff]  ;;  %v367_v26 = vld [vmem:[%s1181_s5 + $0x68] sm:$0xff] }
  0x27   :  { %652 = vmatprep.mubr.msk.f32.mxu1 %vm803_vm0, %v804_v6  ;;  %745 = vmatpush3.bf16.msra.mxu1 %v744_v10  ;;  %v759_v24 = vpack.c.bf16 %v365_v23, %v364_v22  ;;  %v762_v27 = vpack.c.bf16 %v367_v26, %v366_v25  ;;  %v478_v29 = vld [vmem:[%s1178_s2] ss:$0 sm:$0xff]  ;;  %v368_v37 = vld [vmem:[%s1181_s5 + $0x70] sm:$0xff]  ;;  %v369_v38 = vld [vmem:[%s1181_s5 + $0x78] sm:$0xff] }
  0x28   :  { %746 = vmatprep.subr.bf16.mxu1 %v802_v47  ;;  %v765_v39 = vpack.c.bf16 %v369_v38, %v368_v37  ;;  %v479_v40 = vld [vmem:[%s1180_s4] ss:$0 sm:$0xff]  ;;  %s805_s4 = smov [#allocation2]  }
  0x29   :  { %724 = vmatpush3.bf16.msra.mxu0 %v723_v51  ;;  %v480_v45 = vld [vmem:[%s1182_s6] ss:$0 sm:$0xff]  ;;  %s470_s5 = sshll.u32 %s805_s4, 4  ;;  %s471_s5 = int_to_ptr.vmem [resolvable:$true] %s470_s5 }
  0x2a   :  { %725 = vmatprep.subr.bf16.mxu0 %v802_v47  ;;  %s777_s6 = scalar_lea.vmem %s471_s5, 32  ;;  %p782_p1 = scmp.lt.s32.totalorder %s471_s5, %s471_s5 }
  0x2b   :  { %748 = vmatpush3.bf16.msra.mxu1 %v747_v12  ;;  %p778_p0 = scmp.ne.s32.totalorder %s471_s5, %s777_s6  ;;  %p783_p2 = scmp.lt.s32.totalorder %s777_s6, %s777_s6 }
  0x2c   :  { %749 = vmatprep.subr.bf16.mxu1 %v802_v47 }
  0x2d   :  { %727 = vmatpush3.bf16.msra.mxu0 %v726_v54  ;;  %p784_p3 = por %p783_p2, %p782_p1 }
  0x2e   :  { %728 = vmatprep.subr.bf16.mxu0 %v802_v47 }
  0x2f   :  { %751 = vmatpush3.bf16.msra.mxu1 %v750_v15  ;;  %p785_p4 = pnand %p784_p3, %p778_p0 }
  0x30   :  { %752 = vmatprep.subr.bf16.mxu1 %v802_v47 }
  0x31   :  { %730 = vmatpush3.bf16.msra.mxu0 %v729_v57 }
  0x32   :  { %731 = vmatprep.subr.bf16.mxu0 %v802_v47 }
  0x33   :  { %754 = vmatpush3.bf16.msra.mxu1 %v753_v18 }
  0x34   :  { %755 = vmatprep.subr.bf16.mxu1 %v802_v47 }
  0x35   :  { %733 = vmatpush3.bf16.msra.mxu0 %v732_v60 }
  0x36   :  { %734 = vmatprep.subr.bf16.mxu0 %v802_v47 }
  0x37   :  { %757 = vmatpush3.bf16.msra.mxu1 %v756_v21 }
  0x38   :  { %758 = vmatprep.subr.bf16.mxu1 %v802_v47 }
  0x39   :  { %736 = vmatpush3.bf16.msra.mxu0 %v735_v63 }
  0x3a   :  { %737 = vmatprep.subr.bf16.mxu0 %v802_v47 }
  0x3b   :  { %760 = vmatpush3.bf16.msra.mxu1 %v759_v24 }
  0x3c   :  { %761 = vmatprep.subr.bf16.mxu1 %v802_v47 }
  0x3d   :  { %739 = vmatpush3.bf16.msra.mxu0 %v738_v2 }
  0x3e   :  { %740 = vmatprep.subr.bf16.mxu0 %v802_v47 }
  0x3f   :  { %763 = vmatpush3.bf16.msra.mxu1 %v762_v27 }
  0x40   :  { %764 = vmatprep.subr.bf16.mxu1 %v802_v47 }
  0x41   :  { %742 = vmatpush3.bf16.msra.mxu0 %v741_v5 }
  0x43   :  { %766 = vmatpush3.bf16.msra.mxu1 %v765_v39 }
  0xf7   :  { %v513_v28 = vpop.f32.mrb[0].mxu0 }
  0xf8   :  { %v514_v30 = vpop.f32.mrb[1].mxu0 }
  0xf9   :  { %v548_v31 = vpop.f32.mrb[0].mxu1  ;;  %v515_v32 = vadd.f32 %v514_v30, %v513_v28 }
  0xfa   :  { %v549_v33 = vpop.f32.mrb[1].mxu1 }
  0xfb   :  { %v550_v34 = vadd.f32 %v549_v33, %v548_v31  ;;  %v188_v35 = vadd.f32 %v515_v32, %v478_v29 }
  0xfd   :  { %v258_v36 = vadd.f32 %v550_v34, %v188_v35 }
  0xff   :  { %618 = vmatmul.mubr.f32.vlgmr.msra.gmra.mrb[2].mxu0 %v258_v36 }
 0x1d2   :  { %v350_v41 = vpop.f32.mrb[2].mxu0 }
 0x1d3   :  { %v351_v42 = vadd.f32 %v479_v40, %v350_v41  ;;  %v619_v43 = vpop.f32.mrb[3].mxu0 }
 0x1d5   :  { %653 = vmatmul.mubr.f32.vlgmr.msra.gmra.mrb[2].mxu1 %v351_v42 }
 0x2a8   :  { %v443_v46 = vpop.f32.mrb[2].mxu1 }
 0x2a9   :  { %v444_v47 = vadd.f32 %v480_v45, %v443_v46  ;;  %v654_v48 = vpop.f32.mrb[3].mxu1 }
 0x2ab   :  { %v450_v50 = vsel %vm449_vm1, %v444_v47, -1e+30 }
 0x2ac   :  { %v452_v51 = vsel %vm451_vm2, %v450_v50, -inf }
 0x2ad   :  { %453 = vmax.xlane.f32.xlu0 %v452_v51 }
 0x33a   :  { %v454_v52 = vpop.xlane.xlu0 %453 }
 0x33b   :  { %v455_v53 = vsub.f32 %v450_v50, %v454_v52 }
 0x33d   :  { %v456_v54 = vmul.f32 1.442695, %v455_v53 }
 0x33f   :  { %773 = vpow2.f32 %v456_v54 }
 0x349   :  { %v774_v55 = vpop.eup %773 }
 0x34a   :  { %v458_v56 = vsel %vm451_vm2, %v774_v55, 0.0 }
 0x34b   :  { %459 = vadd.xlane.f32.xlu0 %v458_v56 }
 0x3d8   :  { %v460_v49 = vpop.xlane.xlu0 %459 }
 0x3d9   :  { %775 = vrcp.f32 %v460_v49 }
 0x3e3   :  { %v776_v57 = vpop.eup %775 }
 0x3e4   :  { %v462_v58 = vmul.f32 %v776_v57, %v774_v55 }
 0x3e6   :  { %463 = vst [vmem:[#allocation2] sm:$0x3] %v462_v58 }
 0x3e7   :  { %788 = shalt.err (!%p785_p4)
}
 0x3e8   :  { %s789_s9 = scalar_lea.hbm %s1183_s7, 32 }
 0x3e9   :  { %p790_p5 = scmp.ne.s32.totalorder %s1183_s7, %s789_s9  ;;  %p793_p6 = scmp.lt.u32.totalorder %s789_s9, %s1183_s7 }
 0x3eb   :  { %p795_p7 = pnand %p793_p6, %p790_p5 }
 0x3ed   :  { %798 = shalt.err (!%p795_p7)
}
 0x3ee   :  { %473 = dma.vmem_to_hbm [thread:$0]  %s471_s5, 32, %s1183_s7, [#allocation3]  }
 0x3ef   :  { %799 = dma.done.wait [#allocation3], 32  }
 0x3f0   :  { %800 = vsyncadd [#allocation3], 4294967264 }
 0x3f1   :  { %477 = vsyncpa [#allocation3], 1 }

</bundles_post_ra>
